<compile_context>
chip_gen: v7x
topology: tpu7x:2x2x1
jax: 0.10.0
libtpu: 0.0.40
codegen_flags: <defaults>
</compile_context>

<pallas_src>
import math

import jax
import jax.numpy as jnp
from jax.experimental import pallas as pl
from jax.experimental.pallas import tpu as pltpu

# ------------------------- small hyperparameters -------------------------
D_MODEL = 32
NUM_HEADS = 4
D_K = D_MODEL // NUM_HEADS
D_FF = 64
NUM_LAYERS = 2
MAX_SEQ = 16
SRC_VOCAB = 100
TGT_VOCAB = 80
V_PAD = ((TGT_VOCAB + 127) // 128) * 128          # lane-dense padded vocab (=128)
LN_EPS = 1e-5
NEG_INF = -1e9
_SCALE = 1.0 / math.sqrt(D_K)


def _vmem_spec():
    # whole-array block resident in VMEM (no grid)
    return pl.BlockSpec(memory_space=pltpu.MemorySpace.VMEM)


def _rep(shape):
    # weight broadcast: same block every grid step
    n = len(shape)
    return pl.BlockSpec(shape, lambda i, n=n: (0,) * n)


# --------------------- in-kernel helpers (traced Python) ---------------------
def _mha(xq, xkv, bias, wq_ref, bq_ref, wk_ref, bk_ref, wv_ref, bv_ref,
         wo_ref, bo_ref):
    """Multi-head attention for one batch element (everything stays in VMEM).

    xq:(Sq,D)  xkv:(Sk,D)  bias:(Sq,Sk) additive (0 keep / -1e9 mask)
    wq/wk/wv_ref:(H,D,Dk)  bq/bk/bv_ref:(H,1,Dk)  wo_ref:(H,Dk,D)  bo_ref:(1,D)
    """
    num_heads = wq_ref.shape[0]
    proj = jnp.zeros(xq.shape, jnp.float32)
    for h in range(num_heads):               # unrolled (H=4)
        qh = jnp.dot(xq, wq_ref[h], preferred_element_type=jnp.float32) + bq_ref[h]
        kh = jnp.dot(xkv, wk_ref[h], preferred_element_type=jnp.float32) + bk_ref[h]
        vh = jnp.dot(xkv, wv_ref[h], preferred_element_type=jnp.float32) + bv_ref[h]

        # scores = qh @ kh^T expressed as a contraction (no explicit transpose)
        s = jax.lax.dot_general(qh, kh, (((1,), (1,)), ((), ())),
                                preferred_element_type=jnp.float32) * _SCALE + bias
        m = jnp.max(s, axis=-1, keepdims=True)
        p = jnp.exp(s - m)
        p = p / jnp.sum(p, axis=-1, keepdims=True)          # softmax(dim=-1)

        oh = jnp.dot(p, vh, preferred_element_type=jnp.float32)            # (Sq, Dk)
        proj = proj + jnp.dot(oh, wo_ref[h], preferred_element_type=jnp.float32)
    return proj + bo_ref[...]


def _layer_norm(y, g, b):
    mean = jnp.mean(y, axis=-1, keepdims=True)
    var = jnp.mean((y - mean) ** 2, axis=-1, keepdims=True)   # biased, like torch
    return (y - mean) * jax.lax.rsqrt(var + LN_EPS) * g + b


def _ffn(x, w1, b1, w2, b2):
    h = jnp.maximum(jnp.dot(x, w1, preferred_element_type=jnp.float32) + b1, 0.0)
    return jnp.dot(h, w2, preferred_element_type=jnp.float32) + b2


# ------------------------------ fused layer kernels ------------------------------
def _encoder_layer_kernel(x_ref, bias_ref,
                          wq, bq, wk, bk, wv, bv, wo, bo,
                          ln1_g, ln1_b,
                          fw1, fb1, fw2, fb2,
                          ln2_g, ln2_b,
                          o_ref):
    x = x_ref[0]                                              # (S, D)
    attn = _mha(x, x, bias_ref[0], wq, bq, wk, bk, wv, bv, wo, bo)
    y = _layer_norm(x + attn, ln1_g[...], ln1_b[...])
    f = _ffn(y, fw1[...], fb1[...], fw2[...], fb2[...])
    o_ref[0] = _layer_norm(y + f, ln2_g[...], ln2_b[...])


def _decoder_layer_kernel(x_ref, enc_ref, dec_bias_ref, cross_bias_ref,
                          swq, sbq, swk, sbk, swv, sbv, swo, sbo,
                          ln1_g, ln1_b,
                          cwq, cbq, cwk, cbk, cwv, cbv, cwo, cbo,
                          ln2_g, ln2_b,
                          fw1, fb1, fw2, fb2,
                          ln3_g, ln3_b,
                          o_ref):
    x = x_ref[0]                                              # (St, D)
    enc = enc_ref[0]                                          # (Ss, D)
    a1 = _mha(x, x, dec_bias_ref[0], swq, sbq, swk, sbk, swv, sbv, swo, sbo)
    y1 = _layer_norm(x + a1, ln1_g[...], ln1_b[...])
    a2 = _mha(y1, enc, cross_bias_ref[0], cwq, cbq, cwk, cbk, cwv, cbv, cwo, cbo)
    y2 = _layer_norm(y1 + a2, ln2_g[...], ln2_b[...])
    f = _ffn(y2, fw1[...], fb1[...], fw2[...], fb2[...])
    o_ref[0] = _layer_norm(y2 + f, ln3_g[...], ln3_b[...])


def _proj_kernel(x_ref, w_ref, b_ref, o_ref):
    """Final vocab projection, lane-dense (padded) output."""
    o_ref[...] = (jnp.dot(x_ref[...], w_ref[...], preferred_element_type=jnp.float32)
                  + b_ref[...])


# ------------------------------ kernel wrappers ------------------------------
def _mha_args(p):
    """Repack flat (D,D)/(D,) weights into per-head layout (cheap reshapes under jit)."""
    H, Dk, D = NUM_HEADS, D_K, D_MODEL
    return (
        p["wq"].reshape(D, H, Dk).transpose(1, 0, 2),    # (H, D, Dk)
        p["bq"].reshape(H, 1, Dk),
        p["wk"].reshape(D, H, Dk).transpose(1, 0, 2),
        p["bk"].reshape(H, 1, Dk),
        p["wv"].reshape(D, H, Dk).transpose(1, 0, 2),
        p["bv"].reshape(H, 1, Dk),
        p["wo"].reshape(H, Dk, D),                       # (H, Dk, D)
        p["bo"].reshape(1, D),
    )


def encoder_layer(x, bias, p):
    """x: (B, S, D), bias: (B, S, S) -> (B, S, D). One fused kernel per layer."""
    B, S, D = x.shape
    ff = p["ff"]
    args = (x, bias) + _mha_args(p["self_attn"]) + (
        p["norm1_g"].reshape(1, D), p["norm1_b"].reshape(1, D),
        ff["w1"], ff["b1"].reshape(1, D_FF), ff["w2"], ff["b2"].reshape(1, D),
        p["norm2_g"].reshape(1, D), p["norm2_b"].reshape(1, D))

    in_specs = [pl.BlockSpec((1, S, D), lambda i: (i, 0, 0)),     # x
                pl.BlockSpec((1, S, S), lambda i: (i, 0, 0))]     # bias
    in_specs += [_rep(a.shape) for a in args[2:]]                 # weights (replicated)

    return pl.pallas_call(
        _encoder_layer_kernel,
        out_shape=jax.ShapeDtypeStruct((B, S, D), jnp.float32),
        grid=(B,),
        in_specs=in_specs,
        out_specs=pl.BlockSpec((1, S, D), lambda i: (i, 0, 0)),
        compiler_params=pltpu.CompilerParams(
            dimension_semantics=("parallel",)),                   # batch across TCs
    )(*args)


def decoder_layer(x, enc, cross_bias, dec_bias, p):
    """x: (B, St, D), enc: (B, Ss, D) -> (B, St, D). One fused kernel per layer."""
    B, St, D = x.shape
    Ss = enc.shape[1]
    ff = p["ff"]
    args = (x, enc, dec_bias, cross_bias) + _mha_args(p["self_attn"]) + (
        p["norm1_g"].reshape(1, D), p["norm1_b"].reshape(1, D)) + \
        _mha_args(p["cross_attn"]) + (
        p["norm2_g"].reshape(1, D), p["norm2_b"].reshape(1, D),
        ff["w1"], ff["b1"].reshape(1, D_FF), ff["w2"], ff["b2"].reshape(1, D),
        p["norm3_g"].reshape(1, D), p["norm3_b"].reshape(1, D))

    in_specs = [pl.BlockSpec((1, St, D), lambda i: (i, 0, 0)),    # x
                pl.BlockSpec((1, Ss, D), lambda i: (i, 0, 0)),    # enc_output
                pl.BlockSpec((1, St, St), lambda i: (i, 0, 0)),   # dec self-attn bias
                pl.BlockSpec((1, St, Ss), lambda i: (i, 0, 0))]   # cross-attn bias
    in_specs += [_rep(a.shape) for a in args[4:]]                 # weights (replicated)

    return pl.pallas_call(
        _decoder_layer_kernel,
        out_shape=jax.ShapeDtypeStruct((B, St, D), jnp.float32),
        grid=(B,),
        in_specs=in_specs,
        out_specs=pl.BlockSpec((1, St, D), lambda i: (i, 0, 0)),
        compiler_params=pltpu.CompilerParams(
            dimension_semantics=("parallel",)),
    )(*args)


def final_projection(x, w_pad, b_pad):
    """x: (B, S, D) -> logits (B, S, TGT_VOCAB) via lane-dense padded matmul."""
    B, S, D = x.shape
    logits_pad = pl.pallas_call(
        _proj_kernel,
        out_shape=jax.ShapeDtypeStruct((B * S, V_PAD), jnp.float32),
        in_specs=[_vmem_spec(), _vmem_spec(), _vmem_spec()],
        out_specs=_vmem_spec(),
    )(x.reshape(B * S, D), w_pad, b_pad)
    return logits_pad.reshape(B, S, V_PAD)[..., :TGT_VOCAB]


# ------------------------------ model glue ------------------------------
def positional_encoding(max_len, d_model):
    pos = jnp.arange(max_len, dtype=jnp.float32)[:, None]
    div = jnp.exp(jnp.arange(0, d_model, 2, dtype=jnp.float32)
                  * -(math.log(10000.0) / d_model))
    pe = jnp.zeros((max_len, d_model), jnp.float32)
    pe = pe.at[:, 0::2].set(jnp.sin(pos * div))
    pe = pe.at[:, 1::2].set(jnp.cos(pos * div))
    return pe


def build_attention_biases(src, tgt):
    """Additive biases (0 keep / -1e9 mask), matching the torch mask semantics."""
    B, Ss = src.shape
    St = tgt.shape[1]
    src_keep = (src != 0)                                     # (B, Ss) — key-side padding
    tgt_keep = (tgt != 0)                                     # (B, St) — query-side padding
    causal = jnp.tril(jnp.ones((St, St), dtype=bool))

    src_bias_row = jnp.where(src_keep[:, None, :], 0.0, NEG_INF).astype(jnp.float32)
    enc_bias = jnp.broadcast_to(src_bias_row, (B, Ss, Ss))            # encoder self-attn
    cross_bias = jnp.broadcast_to(src_bias_row, (B, St, Ss))          # decoder cross-attn

    tgt_mask = tgt_keep[:, :, None] & causal[None, :, :]              # (B, St, St)
    dec_bias = jnp.where(tgt_mask, 0.0, NEG_INF).astype(jnp.float32)  # decoder self-attn
    return enc_bias, cross_bias, dec_bias


def transformer_forward(params, src, tgt):
    enc_bias, cross_bias, dec_bias = build_attention_biases(src, tgt)
    pe = params["pe"]

    # embedding + positional encoding (dropout = identity, eval semantics)
    src_emb = jnp.take(params["enc_emb"], src, axis=0) + pe[None, : src.shape[1]]
    tgt_emb = jnp.take(params["dec_emb"], tgt, axis=0) + pe[None, : tgt.shape[1]]

    enc = src_emb
    for lp in params["enc_layers"]:
        enc = encoder_layer(enc, enc_bias, lp)

    dec = tgt_emb
    for lp in params["dec_layers"]:
        dec = decoder_layer(dec, enc, cross_bias, dec_bias, lp)

    return final_projection(dec, params["fc_w_pad"], params["fc_b_pad"])


# --------------------------- parameter construction ---------------------------
def init_params(key):
    keys = iter(jax.random.split(key, 256))

    def w(shape, scale=0.02):
        return jax.random.normal(next(keys), shape, jnp.float32) * scale

    def mha_params():
        return {
            "wq": w((D_MODEL, D_MODEL)), "bq": jnp.zeros((D_MODEL,), jnp.float32),
            "wk": w((D_MODEL, D_MODEL)), "bk": jnp.zeros((D_MODEL,), jnp.float32),
            "wv": w((D_MODEL, D_MODEL)), "bv": jnp.zeros((D_MODEL,), jnp.float32),
            "wo": w((D_MODEL, D_MODEL)), "bo": jnp.zeros((D_MODEL,), jnp.float32),
        }

    def ff_params():
        return {
            "w1": w((D_MODEL, D_FF)), "b1": jnp.zeros((D_FF,), jnp.float32),
            "w2": w((D_FF, D_MODEL)), "b2": jnp.zeros((D_MODEL,), jnp.float32),
        }

    def enc_layer_params():
        return {
            "self_attn": mha_params(), "ff": ff_params(),
            "norm1_g": jnp.ones((D_MODEL,), jnp.float32), "norm1_b": jnp.zeros((D_MODEL,), jnp.float32),
            "norm2_g": jnp.ones((D_MODEL,), jnp.float32), "norm2_b": jnp.zeros((D_MODEL,), jnp.float32),
        }

    def dec_layer_params():
        return {
            "self_attn": mha_params(), "cross_attn": mha_params(), "ff": ff_params(),
            "norm1_g": jnp.ones((D_MODEL,), jnp.float32), "norm1_b": jnp.zeros((D_MODEL,), jnp.float32),
            "norm2_g": jnp.ones((D_MODEL,), jnp.float32), "norm2_b": jnp.zeros((D_MODEL,), jnp.float32),
            "norm3_g": jnp.ones((D_MODEL,), jnp.float32), "norm3_b": jnp.zeros((D_MODEL,), jnp.float32),
        }

    # final projection, zero-padded to a lane-dense (multiple of 128) output
    fc_w = w((D_MODEL, TGT_VOCAB))
    fc_b = jnp.zeros((TGT_VOCAB,), jnp.float32)
    fc_w_pad = jnp.zeros((D_MODEL, V_PAD), jnp.float32).at[:, :TGT_VOCAB].set(fc_w)
    fc_b_pad = jnp.zeros((1, V_PAD), jnp.float32).at[:, :TGT_VOCAB].set(fc_b)

    return {
        "enc_emb": w((SRC_VOCAB, D_MODEL), 0.02),
        "dec_emb": w((TGT_VOCAB, D_MODEL), 0.02),
        "pe": positional_encoding(MAX_SEQ, D_MODEL),
        "enc_layers": [enc_layer_params() for _ in range(NUM_LAYERS)],
        "dec_layers": [dec_layer_params() for _ in range(NUM_LAYERS)],
        "fc_w_pad": fc_w_pad,
        "fc_b_pad": fc_b_pad,
    }


# ------------------------------------ main ------------------------------------
if __name__ == "__main__":
    key = jax.random.PRNGKey(0)
    k_p, k_src, k_tgt = jax.random.split(key, 3)

    params = init_params(k_p)

    B, S_SRC, S_TGT = 2, 8, 8
    src = jax.random.randint(k_src, (B, S_SRC), 1, SRC_VOCAB, dtype=jnp.int32)
    tgt = jax.random.randint(k_tgt, (B, S_TGT), 1, TGT_VOCAB, dtype=jnp.int32)
    # a bit of padding (token id 0) to exercise the masks
    src = src.at[0, -2:].set(0)
    tgt = tgt.at[1, -1:].set(0)

    forward = jax.jit(transformer_forward)
    out = jax.block_until_ready(forward(params, src, tgt))

    assert out.shape == (B, S_TGT, TGT_VOCAB), out.shape
    assert bool(jnp.all(jnp.isfinite(out)))
    print("KERNEL_OK")
</pallas_src>

<mosaic_0001>
module attributes {stable_mosaic.version = 11 : i64} {
  func.func @_proj_kernel(%arg0: memref<16x32xf32, #tpu.memory_space<vmem>>, %arg1: memref<32x128xf32, #tpu.memory_space<vmem>>, %arg2: memref<1x128xf32, #tpu.memory_space<vmem>>, %arg3: memref<16x128xf32, #tpu.memory_space<vmem>>) attributes {dimension_semantics = [], scalar_prefetch = 0 : i64, scratch_operands = 0 : i64, tpu.core_type = #tpu.core_type<tc>} {
    %c0 = arith.constant 0 : index
    %c0_0 = arith.constant 0 : index
    %0 = vector.load %arg0[%c0, %c0_0] : memref<16x32xf32, #tpu.memory_space<vmem>>, vector<16x32xf32>
    %c0_1 = arith.constant 0 : index
    %c0_2 = arith.constant 0 : index
    %1 = vector.load %arg1[%c0_1, %c0_2] : memref<32x128xf32, #tpu.memory_space<vmem>>, vector<32x128xf32>
    %cst = arith.constant dense<0.000000e+00> : vector<16x128xf32>
    %2 = tpu.matmul %0, %1, %cst {dimension_numbers = #tpu.dot_dimension_numbers<[1], [0], [0], [1], [0, 0, 1, 1], [], []>} : vector<16x32xf32>, vector<32x128xf32>, vector<16x128xf32> -> vector<16x128xf32>
    %c0_3 = arith.constant 0 : index
    %c0_4 = arith.constant 0 : index
    %3 = vector.load %arg2[%c0_3, %c0_4] : memref<1x128xf32, #tpu.memory_space<vmem>>, vector<1x128xf32>
    %4 = vector.broadcast %3 : vector<1x128xf32> to vector<16x128xf32>
    %5 = arith.addf %2, %4 : vector<16x128xf32>
    %c0_5 = arith.constant 0 : index
    %c0_6 = arith.constant 0 : index
    %6 = vector.load %arg3[%c0_5, %c0_6] : memref<16x128xf32, #tpu.memory_space<vmem>>, vector<16x128xf32>
    tpu.vector_store %arg3[%c0_5, %c0_6], %5 {strides = array<i32>} : memref<16x128xf32, #tpu.memory_space<vmem>>, vector<16x128xf32>,
    return
  }
}

module attributes {stable_mosaic.version = 11 : i64} {
  func.func @_encoder_layer_kernel(%arg0: i32, %arg1: memref<1x8x32xf32, #tpu.memory_space<vmem>>, %arg2: memref<1x8x8xf32, #tpu.memory_space<vmem>>, %arg3: memref<4x32x8xf32, #tpu.memory_space<vmem>>, %arg4: memref<4x1x8xf32, #tpu.memory_space<vmem>>, %arg5: memref<4x32x8xf32, #tpu.memory_space<vmem>>, %arg6: memref<4x1x8xf32, #tpu.memory_space<vmem>>, %arg7: memref<4x32x8xf32, #tpu.memory_space<vmem>>, %arg8: memref<4x1x8xf32, #tpu.memory_space<vmem>>, %arg9: memref<4x8x32xf32, #tpu.memory_space<vmem>>, %arg10: memref<1x32xf32, #tpu.memory_space<vmem>>, %arg11: memref<1x32xf32, #tpu.memory_space<vmem>>, %arg12: memref<1x32xf32, #tpu.memory_space<vmem>>, %arg13: memref<32x64xf32, #tpu.memory_space<vmem>>, %arg14: memref<1x64xf32, #tpu.memory_space<vmem>>, %arg15: memref<64x32xf32, #tpu.memory_space<vmem>>, %arg16: memref<1x32xf32, #tpu.memory_space<vmem>>, %arg17: memref<1x32xf32, #tpu.memory_space<vmem>>, %arg18: memref<1x32xf32, #tpu.memory_space<vmem>>, %arg19: memref<1x8x32xf32, #tpu.memory_space<vmem>>) attributes {dimension_semantics = [#tpu.dimension_semantics<parallel>], iteration_bounds = array<i64: 2>, scalar_prefetch = 0 : i64, scratch_operands = 0 : i64, tpu.core_type = #tpu.core_type<tc>, window_params = [{transform_indices = @transform_0, window_bounds = array<i64: 1, 8, 32>}, {transform_indices = @transform_1, window_bounds = array<i64: 1, 8, 8>}, {pipeline_mode = #tpu.pipeline_mode<synchronous>, transform_indices = @transform_2, window_bounds = array<i64: 4, 32, 8>}, {pipeline_mode = #tpu.pipeline_mode<synchronous>, transform_indices = @transform_3, window_bounds = array<i64: 4, 1, 8>}, {pipeline_mode = #tpu.pipeline_mode<synchronous>, transform_indices = @transform_4, window_bounds = array<i64: 4, 32, 8>}, {pipeline_mode = #tpu.pipeline_mode<synchronous>, transform_indices = @transform_5, window_bounds = array<i64: 4, 1, 8>}, {pipeline_mode = #tpu.pipeline_mode<synchronous>, transform_indices = @transform_6, window_bounds = array<i64: 4, 32, 8>}, {pipeline_mode = #tpu.pipeline_mode<synchronous>, transform_indices = @transform_7, window_bounds = array<i64: 4, 1, 8>}, {pipeline_mode = #tpu.pipeline_mode<synchronous>, transform_indices = @transform_8, window_bounds = array<i64: 4, 8, 32>}, {pipeline_mode = #tpu.pipeline_mode<synchronous>, transform_indices = @transform_9, window_bounds = array<i64: 1, 32>}, {pipeline_mode = #tpu.pipeline_mode<synchronous>, transform_indices = @transform_10, window_bounds = array<i64: 1, 32>}, {pipeline_mode = #tpu.pipeline_mode<synchronous>, transform_indices = @transform_11, window_bounds = array<i64: 1, 32>}, {pipeline_mode = #tpu.pipeline_mode<synchronous>, transform_indices = @transform_12, window_bounds = array<i64: 32, 64>}, {pipeline_mode = #tpu.pipeline_mode<synchronous>, transform_indices = @transform_13, window_bounds = array<i64: 1, 64>}, {pipeline_mode = #tpu.pipeline_mode<synchronous>, transform_indices = @transform_14, window_bounds = array<i64: 64, 32>}, {pipeline_mode = #tpu.pipeline_mode<synchronous>, transform_indices = @transform_15, window_bounds = array<i64: 1, 32>}, {pipeline_mode = #tpu.pipeline_mode<synchronous>, transform_indices = @transform_16, window_bounds = array<i64: 1, 32>}, {pipeline_mode = #tpu.pipeline_mode<synchronous>, transform_indices = @transform_17, window_bounds = array<i64: 1, 32>}, {transform_indices = @transform_18, window_bounds = array<i64: 1, 8, 32>}]} {
    %c0 = arith.constant 0 : index
    %c0_0 = arith.constant 0 : index
    %c0_1 = arith.constant 0 : index
    %0 = vector.load %arg1[%c0, %c0_0, %c0_1] : memref<1x8x32xf32, #tpu.memory_space<vmem>>, vector<1x8x32xf32>
    %1 = vector.shape_cast %0 : vector<1x8x32xf32> to vector<8x32xf32>
    %c0_2 = arith.constant 0 : index
    %c0_3 = arith.constant 0 : index
    %c0_4 = arith.constant 0 : index
    %2 = vector.load %arg2[%c0_2, %c0_3, %c0_4] : memref<1x8x8xf32, #tpu.memory_space<vmem>>, vector<1x8x8xf32>
    %3 = vector.shape_cast %2 : vector<1x8x8xf32> to vector<8x8xf32>
    %cst = arith.constant 0.000000e+00 : f32
    %4 = vector.broadcast %cst : f32 to vector<8x32xf32>
    %c0_5 = arith.constant 0 : index
    %c0_6 = arith.constant 0 : index
    %c0_7 = arith.constant 0 : index
    %5 = vector.load %arg3[%c0_5, %c0_6, %c0_7] : memref<4x32x8xf32, #tpu.memory_space<vmem>>, vector<1x32x8xf32>
    %6 = vector.shape_cast %5 : vector<1x32x8xf32> to vector<32x8xf32>
    %cst_8 = arith.constant dense<0.000000e+00> : vector<8x8xf32>
    %7 = tpu.matmul %1, %6, %cst_8 {dimension_numbers = #tpu.dot_dimension_numbers<[1], [0], [0], [1], [0, 0, 1, 1], [], []>} : vector<8x32xf32>, vector<32x8xf32>, vector<8x8xf32> -> vector<8x8xf32>
    %c0_9 = arith.constant 0 : index
    %c0_10 = arith.constant 0 : index
    %c0_11 = arith.constant 0 : index
    %8 = vector.load %arg4[%c0_9, %c0_10, %c0_11] : memref<4x1x8xf32, #tpu.memory_space<vmem>>, vector<1x1x8xf32>
    %9 = vector.shape_cast %8 : vector<1x1x8xf32> to vector<1x8xf32>
    %10 = vector.broadcast %9 : vector<1x8xf32> to vector<8x8xf32>
    %11 = arith.addf %7, %10 : vector<8x8xf32>
    %c0_12 = arith.constant 0 : index
    %c0_13 = arith.constant 0 : index
    %c0_14 = arith.constant 0 : index
    %12 = vector.load %arg5[%c0_12, %c0_13, %c0_14] : memref<4x32x8xf32, #tpu.memory_space<vmem>>, vector<1x32x8xf32>
    %13 = vector.shape_cast %12 : vector<1x32x8xf32> to vector<32x8xf32>
    %cst_15 = arith.constant dense<0.000000e+00> : vector<8x8xf32>
    %14 = tpu.matmul %1, %13, %cst_15 {dimension_numbers = #tpu.dot_dimension_numbers<[1], [0], [0], [1], [0, 0, 1, 1], [], []>} : vector<8x32xf32>, vector<32x8xf32>, vector<8x8xf32> -> vector<8x8xf32>
    %c0_16 = arith.constant 0 : index
    %c0_17 = arith.constant 0 : index
    %c0_18 = arith.constant 0 : index
    %15 = vector.load %arg6[%c0_16, %c0_17, %c0_18] : memref<4x1x8xf32, #tpu.memory_space<vmem>>, vector<1x1x8xf32>
    %16 = vector.shape_cast %15 : vector<1x1x8xf32> to vector<1x8xf32>
    %17 = vector.broadcast %16 : vector<1x8xf32> to vector<8x8xf32>
    %18 = arith.addf %14, %17 : vector<8x8xf32>
    %c0_19 = arith.constant 0 : index
    %c0_20 = arith.constant 0 : index
    %c0_21 = arith.constant 0 : index
    %19 = vector.load %arg7[%c0_19, %c0_20, %c0_21] : memref<4x32x8xf32, #tpu.memory_space<vmem>>, vector<1x32x8xf32>
    %20 = vector.shape_cast %19 : vector<1x32x8xf32> to vector<32x8xf32>
    %cst_22 = arith.constant dense<0.000000e+00> : vector<8x8xf32>
    %21 = tpu.matmul %1, %20, %cst_22 {dimension_numbers = #tpu.dot_dimension_numbers<[1], [0], [0], [1], [0, 0, 1, 1], [], []>} : vector<8x32xf32>, vector<32x8xf32>, vector<8x8xf32> -> vector<8x8xf32>
    %c0_23 = arith.constant 0 : index
    %c0_24 = arith.constant 0 : index
    %c0_25 = arith.constant 0 : index
    %22 = vector.load %arg8[%c0_23, %c0_24, %c0_25] : memref<4x1x8xf32, #tpu.memory_space<vmem>>, vector<1x1x8xf32>
    %23 = vector.shape_cast %22 : vector<1x1x8xf32> to vector<1x8xf32>
    %24 = vector.broadcast %23 : vector<1x8xf32> to vector<8x8xf32>
    %25 = arith.addf %21, %24 : vector<8x8xf32>
    %cst_26 = arith.constant dense<0.000000e+00> : vector<8x8xf32>
    %26 = tpu.matmul %11, %18, %cst_26 {dimension_numbers = #tpu.dot_dimension_numbers<[1], [1], [0], [0], [0, 0, 1, 0], [], []>} : vector<8x8xf32>, vector<8x8xf32>, vector<8x8xf32> -> vector<8x8xf32>
    %cst_27 = arith.constant 0.353553385 : f32
    %27 = vector.broadcast %cst_27 : f32 to vector<8x8xf32>
    %28 = arith.mulf %26, %27 : vector<8x8xf32>
    %29 = arith.addf %28, %3 : vector<8x8xf32>
    %cst_28 = arith.constant dense<0xFF800000> : vector<8xf32>
    %30 = vector.multi_reduction <maximumf>, %29, %cst_28 [1] : vector<8x8xf32> to vector<8xf32>
    %31 = vector.shape_cast %30 : vector<8xf32> to vector<8x1xf32>
    %32 = vector.broadcast %31 : vector<8x1xf32> to vector<8x8xf32>
    %33 = arith.subf %29, %32 : vector<8x8xf32>
    %34 = math.exp %33 : vector<8x8xf32>
    %cst_29 = arith.constant dense<0.000000e+00> : vector<8xf32>
    %35 = vector.multi_reduction <add>, %34, %cst_29 [1] : vector<8x8xf32> to vector<8xf32>
    %36 = vector.shape_cast %35 : vector<8xf32> to vector<8x1xf32>
    %37 = vector.broadcast %36 : vector<8x1xf32> to vector<8x8xf32>
    %38 = arith.divf %34, %37 : vector<8x8xf32>
    %cst_30 = arith.constant dense<0.000000e+00> : vector<8x8xf32>
    %39 = tpu.matmul %38, %25, %cst_30 {dimension_numbers = #tpu.dot_dimension_numbers<[1], [0], [0], [1], [0, 0, 1, 1], [], []>} : vector<8x8xf32>, vector<8x8xf32>, vector<8x8xf32> -> vector<8x8xf32>
    %c0_31 = arith.constant 0 : index
    %c0_32 = arith.constant 0 : index
    %c0_33 = arith.constant 0 : index
    %40 = vector.load %arg9[%c0_31, %c0_32, %c0_33] : memref<4x8x32xf32, #tpu.memory_space<vmem>>, vector<1x8x32xf32>
    %41 = vector.shape_cast %40 : vector<1x8x32xf32> to vector<8x32xf32>
    %cst_34 = arith.constant dense<0.000000e+00> : vector<8x32xf32>
    %42 = tpu.matmul %39, %41, %cst_34 {dimension_numbers = #tpu.dot_dimension_numbers<[1], [0], [0], [1], [0, 0, 1, 1], [], []>} : vector<8x8xf32>, vector<8x32xf32>, vector<8x32xf32> -> vector<8x32xf32>
    %43 = arith.addf %4, %42 : vector<8x32xf32>
    %c1 = arith.constant 1 : index
    %c0_35 = arith.constant 0 : index
    %c0_36 = arith.constant 0 : index
    %44 = vector.load %arg3[%c1, %c0_35, %c0_36] : memref<4x32x8xf32, #tpu.memory_space<vmem>>, vector<1x32x8xf32>
    %45 = vector.shape_cast %44 : vector<1x32x8xf32> to vector<32x8xf32>
    %cst_37 = arith.constant dense<0.000000e+00> : vector<8x8xf32>
    %46 = tpu.matmul %1, %45, %cst_37 {dimension_numbers = #tpu.dot_dimension_numbers<[1], [0], [0], [1], [0, 0, 1, 1], [], []>} : vector<8x32xf32>, vector<32x8xf32>, vector<8x8xf32> -> vector<8x8xf32>
    %c1_38 = arith.constant 1 : index
    %c0_39 = arith.constant 0 : index
    %c0_40 = arith.constant 0 : index
    %47 = vector.load %arg4[%c1_38, %c0_39, %c0_40] : memref<4x1x8xf32, #tpu.memory_space<vmem>>, vector<1x1x8xf32>
    %48 = vector.shape_cast %47 : vector<1x1x8xf32> to vector<1x8xf32>
    %49 = vector.broadcast %48 : vector<1x8xf32> to vector<8x8xf32>
    %50 = arith.addf %46, %49 : vector<8x8xf32>
    %c1_41 = arith.constant 1 : index
    %c0_42 = arith.constant 0 : index
    %c0_43 = arith.constant 0 : index
    %51 = vector.load %arg5[%c1_41, %c0_42, %c0_43] : memref<4x32x8xf32, #tpu.memory_space<vmem>>, vector<1x32x8xf32>
    %52 = vector.shape_cast %51 : vector<1x32x8xf32> to vector<32x8xf32>
    %cst_44 = arith.constant dense<0.000000e+00> : vector<8x8xf32>
    %53 = tpu.matmul %1, %52, %cst_44 {dimension_numbers = #tpu.dot_dimension_numbers<[1], [0], [0], [1], [0, 0, 1, 1], [], []>} : vector<8x32xf32>, vector<32x8xf32>, vector<8x8xf32> -> vector<8x8xf32>
    %c1_45 = arith.constant 1 : index
    %c0_46 = arith.constant 0 : index
    %c0_47 = arith.constant 0 : index
    %54 = vector.load %arg6[%c1_45, %c0_46, %c0_47] : memref<4x1x8xf32, #tpu.memory_space<vmem>>, vector<1x1x8xf32>
    %55 = vector.shape_cast %54 : vector<1x1x8xf32> to vector<1x8xf32>
    %56 = vector.broadcast %55 : vector<1x8xf32> to vector<8x8xf32>
    %57 = arith.addf %53, %56 : vector<8x8xf32>
    %c1_48 = arith.constant 1 : index
    %c0_49 = arith.constant 0 : index
    %c0_50 = arith.constant 0 : index
    %58 = vector.load %arg7[%c1_48, %c0_49, %c0_50] : memref<4x32x8xf32, #tpu.memory_space<vmem>>, vector<1x32x8xf32>
    %59 = vector.shape_cast %58 : vector<1x32x8xf32> to vector<32x8xf32>
    %cst_51 = arith.constant dense<0.000000e+00> : vector<8x8xf32>
    %60 = tpu.matmul %1, %59, %cst_51 {dimension_numbers = #tpu.dot_dimension_numbers<[1], [0], [0], [1], [0, 0, 1, 1], [], []>} : vector<8x32xf32>, vector<32x8xf32>, vector<8x8xf32> -> vector<8x8xf32>
    %c1_52 = arith.constant 1 : index
    %c0_53 = arith.constant 0 : index
    %c0_54 = arith.constant 0 : index
    %61 = vector.load %arg8[%c1_52, %c0_53, %c0_54] : memref<4x1x8xf32, #tpu.memory_space<vmem>>, vector<1x1x8xf32>
    %62 = vector.shape_cast %61 : vector<1x1x8xf32> to vector<1x8xf32>
    %63 = vector.broadcast %62 : vector<1x8xf32> to vector<8x8xf32>
    %64 = arith.addf %60, %63 : vector<8x8xf32>
    %cst_55 = arith.constant dense<0.000000e+00> : vector<8x8xf32>
    %65 = tpu.matmul %50, %57, %cst_55 {dimension_numbers = #tpu.dot_dimension_numbers<[1], [1], [0], [0], [0, 0, 1, 0], [], []>} : vector<8x8xf32>, vector<8x8xf32>, vector<8x8xf32> -> vector<8x8xf32>
    %cst_56 = arith.constant 0.353553385 : f32
    %66 = vector.broadcast %cst_56 : f32 to vector<8x8xf32>
    %67 = arith.mulf %65, %66 : vector<8x8xf32>
    %68 = arith.addf %67, %3 : vector<8x8xf32>
    %cst_57 = arith.constant dense<0xFF800000> : vector<8xf32>
    %69 = vector.multi_reduction <maximumf>, %68, %cst_57 [1] : vector<8x8xf32> to vector<8xf32>
    %70 = vector.shape_cast %69 : vector<8xf32> to vector<8x1xf32>
    %71 = vector.broadcast %70 : vector<8x1xf32> to vector<8x8xf32>
    %72 = arith.subf %68, %71 : vector<8x8xf32>
    %73 = math.exp %72 : vector<8x8xf32>
    %cst_58 = arith.constant dense<0.000000e+00> : vector<8xf32>
    %74 = vector.multi_reduction <add>, %73, %cst_58 [1] : vector<8x8xf32> to vector<8xf32>
    %75 = vector.shape_cast %74 : vector<8xf32> to vector<8x1xf32>
    %76 = vector.broadcast %75 : vector<8x1xf32> to vector<8x8xf32>
    %77 = arith.divf %73, %76 : vector<8x8xf32>
    %cst_59 = arith.constant dense<0.000000e+00> : vector<8x8xf32>
    %78 = tpu.matmul %77, %64, %cst_59 {dimension_numbers = #tpu.dot_dimension_numbers<[1], [0], [0], [1], [0, 0, 1, 1], [], []>} : vector<8x8xf32>, vector<8x8xf32>, vector<8x8xf32> -> vector<8x8xf32>
    %c1_60 = arith.constant 1 : index
    %c0_61 = arith.constant 0 : index
    %c0_62 = arith.constant 0 : index
    %79 = vector.load %arg9[%c1_60, %c0_61, %c0_62] : memref<4x8x32xf32, #tpu.memory_space<vmem>>, vector<1x8x32xf32>
    %80 = vector.shape_cast %79 : vector<1x8x32xf32> to vector<8x32xf32>
    %cst_63 = arith.constant dense<0.000000e+00> : vector<8x32xf32>
    %81 = tpu.matmul %78, %80, %cst_63 {dimension_numbers = #tpu.dot_dimension_numbers<[1], [0], [0], [1], [0, 0, 1, 1], [], []>} : vector<8x8xf32>, vector<8x32xf32>, vector<8x32xf32> -> vector<8x32xf32>
    %82 = arith.addf %43, %81 : vector<8x32xf32>
    %c2 = arith.constant 2 : index
    %c0_64 = arith.constant 0 : index
    %c0_65 = arith.constant 0 : index
    %83 = vector.load %arg3[%c2, %c0_64, %c0_65] : memref<4x32x8xf32, #tpu.memory_space<vmem>>, vector<1x32x8xf32>
    %84 = vector.shape_cast %83 : vector<1x32x8xf32> to vector<32x8xf32>
    %cst_66 = arith.constant dense<0.000000e+00> : vector<8x8xf32>
    %85 = tpu.matmul %1, %84, %cst_66 {dimension_numbers = #tpu.dot_dimension_numbers<[1], [0], [0], [1], [0, 0, 1, 1], [], []>} : vector<8x32xf32>, vector<32x8xf32>, vector<8x8xf32> -> vector<8x8xf32>
    %c2_67 = arith.constant 2 : index
    %c0_68 = arith.constant 0 : index
    %c0_69 = arith.constant 0 : index
    %86 = vector.load %arg4[%c2_67, %c0_68, %c0_69] : memref<4x1x8xf32, #tpu.memory_space<vmem>>, vector<1x1x8xf32>
    %87 = vector.shape_cast %86 : vector<1x1x8xf32> to vector<1x8xf32>
    %88 = vector.broadcast %87 : vector<1x8xf32> to vector<8x8xf32>
    %89 = arith.addf %85, %88 : vector<8x8xf32>
    %c2_70 = arith.constant 2 : index
    %c0_71 = arith.constant 0 : index
    %c0_72 = arith.constant 0 : index
    %90 = vector.load %arg5[%c2_70, %c0_71, %c0_72] : memref<4x32x8xf32, #tpu.memory_space<vmem>>, vector<1x32x8xf32>
    %91 = vector.shape_cast %90 : vector<1x32x8xf32> to vector<32x8xf32>
    %cst_73 = arith.constant dense<0.000000e+00> : vector<8x8xf32>
    %92 = tpu.matmul %1, %91, %cst_73 {dimension_numbers = #tpu.dot_dimension_numbers<[1], [0], [0], [1], [0, 0, 1, 1], [], []>} : vector<8x32xf32>, vector<32x8xf32>, vector<8x8xf32> -> vector<8x8xf32>
    %c2_74 = arith.constant 2 : index
    %c0_75 = arith.constant 0 : index
    %c0_76 = arith.constant 0 : index
    %93 = vector.load %arg6[%c2_74, %c0_75, %c0_76] : memref<4x1x8xf32, #tpu.memory_space<vmem>>, vector<1x1x8xf32>
    %94 = vector.shape_cast %93 : vector<1x1x8xf32> to vector<1x8xf32>
    %95 = vector.broadcast %94 : vector<1x8xf32> to vector<8x8xf32>
    %96 = arith.addf %92, %95 : vector<8x8xf32>
    %c2_77 = arith.constant 2 : index
    %c0_78 = arith.constant 0 : index
    %c0_79 = arith.constant 0 : index
    %97 = vector.load %arg7[%c2_77, %c0_78, %c0_79] : memref<4x32x8xf32, #tpu.memory_space<vmem>>, vector<1x32x8xf32>
    %98 = vector.shape_cast %97 : vector<1x32x8xf32> to vector<32x8xf32>
    %cst_80 = arith.constant dense<0.000000e+00> : vector<8x8xf32>
    %99 = tpu.matmul %1, %98, %cst_80 {dimension_numbers = #tpu.dot_dimension_numbers<[1], [0], [0], [1], [0, 0, 1, 1], [], []>} : vector<8x32xf32>, vector<32x8xf32>, vector<8x8xf32> -> vector<8x8xf32>
    %c2_81 = arith.constant 2 : index
    %c0_82 = arith.constant 0 : index
    %c0_83 = arith.constant 0 : index
    %100 = vector.load %arg8[%c2_81, %c0_82, %c0_83] : memref<4x1x8xf32, #tpu.memory_space<vmem>>, vector<1x1x8xf32>
    %101 = vector.shape_cast %100 : vector<1x1x8xf32> to vector<1x8xf32>
    %102 = vector.broadcast %101 : vector<1x8xf32> to vector<8x8xf32>
    %103 = arith.addf %99, %102 : vector<8x8xf32>
    %cst_84 = arith.constant dense<0.000000e+00> : vector<8x8xf32>
    %104 = tpu.matmul %89, %96, %cst_84 {dimension_numbers = #tpu.dot_dimension_numbers<[1], [1], [0], [0], [0, 0, 1, 0], [], []>} : vector<8x8xf32>, vector<8x8xf32>, vector<8x8xf32> -> vector<8x8xf32>
    %cst_85 = arith.constant 0.353553385 : f32
    %105 = vector.broadcast %cst_85 : f32 to vector<8x8xf32>
    %106 = arith.mulf %104, %105 : vector<8x8xf32>
    %107 = arith.addf %106, %3 : vector<8x8xf32>
    %cst_86 = arith.constant dense<0xFF800000> : vector<8xf32>
    %108 = vector.multi_reduction <maximumf>, %107, %cst_86 [1] : vector<8x8xf32> to vector<8xf32>
    %109 = vector.shape_cast %108 : vector<8xf32> to vector<8x1xf32>
    %110 = vector.broadcast %109 : vector<8x1xf32> to vector<8x8xf32>
    %111 = arith.subf %107, %110 : vector<8x8xf32>
    %112 = math.exp %111 : vector<8x8xf32>
    %cst_87 = arith.constant dense<0.000000e+00> : vector<8xf32>
    %113 = vector.multi_reduction <add>, %112, %cst_87 [1] : vector<8x8xf32> to vector<8xf32>
    %114 = vector.shape_cast %113 : vector<8xf32> to vector<8x1xf32>
    %115 = vector.broadcast %114 : vector<8x1xf32> to vector<8x8xf32>
    %116 = arith.divf %112, %115 : vector<8x8xf32>
    %cst_88 = arith.constant dense<0.000000e+00> : vector<8x8xf32>
    %117 = tpu.matmul %116, %103, %cst_88 {dimension_numbers = #tpu.dot_dimension_numbers<[1], [0], [0], [1], [0, 0, 1, 1], [], []>} : vector<8x8xf32>, vector<8x8xf32>, vector<8x8xf32> -> vector<8x8xf32>
    %c2_89 = arith.constant 2 : index
    %c0_90 = arith.constant 0 : index
    %c0_91 = arith.constant 0 : index
    %118 = vector.load %arg9[%c2_89, %c0_90, %c0_91] : memref<4x8x32xf32, #tpu.memory_space<vmem>>, vector<1x8x32xf32>
    %119 = vector.shape_cast %118 : vector<1x8x32xf32> to vector<8x32xf32>
    %cst_92 = arith.constant dense<0.000000e+00> : vector<8x32xf32>
    %120 = tpu.matmul %117, %119, %cst_92 {dimension_numbers = #tpu.dot_dimension_numbers<[1], [0], [0], [1], [0, 0, 1, 1], [], []>} : vector<8x8xf32>, vector<8x32xf32>, vector<8x32xf32> -> vector<8x32xf32>
    %121 = arith.addf %82, %120 : vector<8x32xf32>
    %c3 = arith.constant 3 : index
    %c0_93 = arith.constant 0 : index
    %c0_94 = arith.constant 0 : index
    %122 = vector.load %arg3[%c3, %c0_93, %c0_94] : memref<4x32x8xf32, #tpu.memory_space<vmem>>, vector<1x32x8xf32>
    %123 = vector.shape_cast %122 : vector<1x32x8xf32> to vector<32x8xf32>
    %cst_95 = arith.constant dense<0.000000e+00> : vector<8x8xf32>
    %124 = tpu.matmul %1, %123, %cst_95 {dimension_numbers = #tpu.dot_dimension_numbers<[1], [0], [0], [1], [0, 0, 1, 1], [], []>} : vector<8x32xf32>, vector<32x8xf32>, vector<8x8xf32> -> vector<8x8xf32>
    %c3_96 = arith.constant 3 : index
    %c0_97 = arith.constant 0 : index
    %c0_98 = arith.constant 0 : index
    %125 = vector.load %arg4[%c3_96, %c0_97, %c0_98] : memref<4x1x8xf32, #tpu.memory_space<vmem>>, vector<1x1x8xf32>
    %126 = vector.shape_cast %125 : vector<1x1x8xf32> to vector<1x8xf32>
    %127 = vector.broadcast %126 : vector<1x8xf32> to vector<8x8xf32>
    %128 = arith.addf %124, %127 : vector<8x8xf32>
    %c3_99 = arith.constant 3 : index
    %c0_100 = arith.constant 0 : index
    %c0_101 = arith.constant 0 : index
    %129 = vector.load %arg5[%c3_99, %c0_100, %c0_101] : memref<4x32x8xf32, #tpu.memory_space<vmem>>, vector<1x32x8xf32>
    %130 = vector.shape_cast %129 : vector<1x32x8xf32> to vector<32x8xf32>
    %cst_102 = arith.constant dense<0.000000e+00> : vector<8x8xf32>
    %131 = tpu.matmul %1, %130, %cst_102 {dimension_numbers = #tpu.dot_dimension_numbers<[1], [0], [0], [1], [0, 0, 1, 1], [], []>} : vector<8x32xf32>, vector<32x8xf32>, vector<8x8xf32> -> vector<8x8xf32>
    %c3_103 = arith.constant 3 : index
    %c0_104 = arith.constant 0 : index
    %c0_105 = arith.constant 0 : index
    %132 = vector.load %arg6[%c3_103, %c0_104, %c0_105] : memref<4x1x8xf32, #tpu.memory_space<vmem>>, vector<1x1x8xf32>
    %133 = vector.shape_cast %132 : vector<1x1x8xf32> to vector<1x8xf32>
    %134 = vector.broadcast %133 : vector<1x8xf32> to vector<8x8xf32>
    %135 = arith.addf %131, %134 : vector<8x8xf32>
    %c3_106 = arith.constant 3 : index
    %c0_107 = arith.constant 0 : index
    %c0_108 = arith.constant 0 : index
    %136 = vector.load %arg7[%c3_106, %c0_107, %c0_108] : memref<4x32x8xf32, #tpu.memory_space<vmem>>, vector<1x32x8xf32>
    %137 = vector.shape_cast %136 : vector<1x32x8xf32> to vector<32x8xf32>
    %cst_109 = arith.constant dense<0.000000e+00> : vector<8x8xf32>
    %138 = tpu.matmul %1, %137, %cst_109 {dimension_numbers = #tpu.dot_dimension_numbers<[1], [0], [0], [1], [0, 0, 1, 1], [], []>} : vector<8x32xf32>, vector<32x8xf32>, vector<8x8xf32> -> vector<8x8xf32>
    %c3_110 = arith.constant 3 : index
    %c0_111 = arith.constant 0 : index
    %c0_112 = arith.constant 0 : index
    %139 = vector.load %arg8[%c3_110, %c0_111, %c0_112] : memref<4x1x8xf32, #tpu.memory_space<vmem>>, vector<1x1x8xf32>
    %140 = vector.shape_cast %139 : vector<1x1x8xf32> to vector<1x8xf32>
    %141 = vector.broadcast %140 : vector<1x8xf32> to vector<8x8xf32>
    %142 = arith.addf %138, %141 : vector<8x8xf32>
    %cst_113 = arith.constant dense<0.000000e+00> : vector<8x8xf32>
    %143 = tpu.matmul %128, %135, %cst_113 {dimension_numbers = #tpu.dot_dimension_numbers<[1], [1], [0], [0], [0, 0, 1, 0], [], []>} : vector<8x8xf32>, vector<8x8xf32>, vector<8x8xf32> -> vector<8x8xf32>
    %cst_114 = arith.constant 0.353553385 : f32
    %144 = vector.broadcast %cst_114 : f32 to vector<8x8xf32>
    %145 = arith.mulf %143, %144 : vector<8x8xf32>
    %146 = arith.addf %145, %3 : vector<8x8xf32>
    %cst_115 = arith.constant dense<0xFF800000> : vector<8xf32>
    %147 = vector.multi_reduction <maximumf>, %146, %cst_115 [1] : vector<8x8xf32> to vector<8xf32>
    %148 = vector.shape_cast %147 : vector<8xf32> to vector<8x1xf32>
    %149 = vector.broadcast %148 : vector<8x1xf32> to vector<8x8xf32>
    %150 = arith.subf %146, %149 : vector<8x8xf32>
    %151 = math.exp %150 : vector<8x8xf32>
    %cst_116 = arith.constant dense<0.000000e+00> : vector<8xf32>
    %152 = vector.multi_reduction <add>, %151, %cst_116 [1] : vector<8x8xf32> to vector<8xf32>
    %153 = vector.shape_cast %152 : vector<8xf32> to vector<8x1xf32>
    %154 = vector.broadcast %153 : vector<8x1xf32> to vector<8x8xf32>
    %155 = arith.divf %151, %154 : vector<8x8xf32>
    %cst_117 = arith.constant dense<0.000000e+00> : vector<8x8xf32>
    %156 = tpu.matmul %155, %142, %cst_117 {dimension_numbers = #tpu.dot_dimension_numbers<[1], [0], [0], [1], [0, 0, 1, 1], [], []>} : vector<8x8xf32>, vector<8x8xf32>, vector<8x8xf32> -> vector<8x8xf32>
    %c3_118 = arith.constant 3 : index
    %c0_119 = arith.constant 0 : index
    %c0_120 = arith.constant 0 : index
    %157 = vector.load %arg9[%c3_118, %c0_119, %c0_120] : memref<4x8x32xf32, #tpu.memory_space<vmem>>, vector<1x8x32xf32>
    %158 = vector.shape_cast %157 : vector<1x8x32xf32> to vector<8x32xf32>
    %cst_121 = arith.constant dense<0.000000e+00> : vector<8x32xf32>
    %159 = tpu.matmul %156, %158, %cst_121 {dimension_numbers = #tpu.dot_dimension_numbers<[1], [0], [0], [1], [0, 0, 1, 1], [], []>} : vector<8x8xf32>, vector<8x32xf32>, vector<8x32xf32> -> vector<8x32xf32>
    %160 = arith.addf %121, %159 : vector<8x32xf32>
    %c0_122 = arith.constant 0 : index
    %c0_123 = arith.constant 0 : index
    %161 = vector.load %arg10[%c0_122, %c0_123] : memref<1x32xf32, #tpu.memory_space<vmem>>, vector<1x32xf32>
    %162 = vector.broadcast %161 : vector<1x32xf32> to vector<8x32xf32>
    %163 = arith.addf %160, %162 : vector<8x32xf32>
    %164 = arith.addf %1, %163 : vector<8x32xf32>
    %c0_124 = arith.constant 0 : index
    %c0_125 = arith.constant 0 : index
    %165 = vector.load %arg11[%c0_124, %c0_125] : memref<1x32xf32, #tpu.memory_space<vmem>>, vector<1x32xf32>
    %c0_126 = arith.constant 0 : index
    %c0_127 = arith.constant 0 : index
    %166 = vector.load %arg12[%c0_126, %c0_127] : memref<1x32xf32, #tpu.memory_space<vmem>>, vector<1x32xf32>
    %cst_128 = arith.constant dense<0.000000e+00> : vector<8xf32>
    %167 = vector.multi_reduction <add>, %164, %cst_128 [1] : vector<8x32xf32> to vector<8xf32>
    %168 = vector.shape_cast %167 : vector<8xf32> to vector<8x1xf32>
    %cst_129 = arith.constant 3.200000e+01 : f32
    %169 = vector.broadcast %cst_129 : f32 to vector<8x1xf32>
    %170 = arith.divf %168, %169 : vector<8x1xf32>
    %171 = vector.broadcast %170 : vector<8x1xf32> to vector<8x32xf32>
    %172 = arith.subf %164, %171 : vector<8x32xf32>
    %173 = arith.mulf %172, %172 : vector<8x32xf32>
    %cst_130 = arith.constant dense<0.000000e+00> : vector<8xf32>
    %174 = vector.multi_reduction <add>, %173, %cst_130 [1] : vector<8x32xf32> to vector<8xf32>
    %175 = vector.shape_cast %174 : vector<8xf32> to vector<8x1xf32>
    %cst_131 = arith.constant 3.200000e+01 : f32
    %176 = vector.broadcast %cst_131 : f32 to vector<8x1xf32>
    %177 = arith.divf %175, %176 : vector<8x1xf32>
    %178 = vector.broadcast %170 : vector<8x1xf32> to vector<8x32xf32>
    %179 = arith.subf %164, %178 : vector<8x32xf32>
    %cst_132 = arith.constant 9.99999974E-6 : f32
    %180 = vector.broadcast %cst_132 : f32 to vector<8x1xf32>
    %181 = arith.addf %177, %180 : vector<8x1xf32>
    %182 = math.rsqrt %181 : vector<8x1xf32>
    %183 = vector.broadcast %182 : vector<8x1xf32> to vector<8x32xf32>
    %184 = arith.mulf %179, %183 : vector<8x32xf32>
    %185 = vector.broadcast %165 : vector<1x32xf32> to vector<8x32xf32>
    %186 = arith.mulf %184, %185 : vector<8x32xf32>
    %187 = vector.broadcast %166 : vector<1x32xf32> to vector<8x32xf32>
    %188 = arith.addf %186, %187 : vector<8x32xf32>
    %c0_133 = arith.constant 0 : index
    %c0_134 = arith.constant 0 : index
    %189 = vector.load %arg13[%c0_133, %c0_134] : memref<32x64xf32, #tpu.memory_space<vmem>>, vector<32x64xf32>
    %c0_135 = arith.constant 0 : index
    %c0_136 = arith.constant 0 : index
    %190 = vector.load %arg14[%c0_135, %c0_136] : memref<1x64xf32, #tpu.memory_space<vmem>>, vector<1x64xf32>
    %c0_137 = arith.constant 0 : index
    %c0_138 = arith.constant 0 : index
    %191 = vector.load %arg15[%c0_137, %c0_138] : memref<64x32xf32, #tpu.memory_space<vmem>>, vector<64x32xf32>
    %c0_139 = arith.constant 0 : index
    %c0_140 = arith.constant 0 : index
    %192 = vector.load %arg16[%c0_139, %c0_140] : memref<1x32xf32, #tpu.memory_space<vmem>>, vector<1x32xf32>
    %cst_141 = arith.constant dense<0.000000e+00> : vector<8x64xf32>
    %193 = tpu.matmul %188, %189, %cst_141 {dimension_numbers = #tpu.dot_dimension_numbers<[1], [0], [0], [1], [0, 0, 1, 1], [], []>} : vector<8x32xf32>, vector<32x64xf32>, vector<8x64xf32> -> vector<8x64xf32>
    %194 = vector.broadcast %190 : vector<1x64xf32> to vector<8x64xf32>
    %195 = arith.addf %193, %194 : vector<8x64xf32>
    %cst_142 = arith.constant 0.000000e+00 : f32
    %196 = vector.broadcast %cst_142 : f32 to vector<8x64xf32>
    %197 = arith.maximumf %195, %196 : vector<8x64xf32>
    %cst_143 = arith.constant dense<0.000000e+00> : vector<8x32xf32>
    %198 = tpu.matmul %197, %191, %cst_143 {dimension_numbers = #tpu.dot_dimension_numbers<[1], [0], [0], [1], [0, 0, 1, 1], [], []>} : vector<8x64xf32>, vector<64x32xf32>, vector<8x32xf32> -> vector<8x32xf32>
    %199 = vector.broadcast %192 : vector<1x32xf32> to vector<8x32xf32>
    %200 = arith.addf %198, %199 : vector<8x32xf32>
    %201 = arith.addf %188, %200 : vector<8x32xf32>
    %c0_144 = arith.constant 0 : index
    %c0_145 = arith.constant 0 : index
    %202 = vector.load %arg17[%c0_144, %c0_145] : memref<1x32xf32, #tpu.memory_space<vmem>>, vector<1x32xf32>
    %c0_146 = arith.constant 0 : index
    %c0_147 = arith.constant 0 : index
    %203 = vector.load %arg18[%c0_146, %c0_147] : memref<1x32xf32, #tpu.memory_space<vmem>>, vector<1x32xf32>
    %cst_148 = arith.constant dense<0.000000e+00> : vector<8xf32>
    %204 = vector.multi_reduction <add>, %201, %cst_148 [1] : vector<8x32xf32> to vector<8xf32>
    %205 = vector.shape_cast %204 : vector<8xf32> to vector<8x1xf32>
    %cst_149 = arith.constant 3.200000e+01 : f32
    %206 = vector.broadcast %cst_149 : f32 to vector<8x1xf32>
    %207 = arith.divf %205, %206 : vector<8x1xf32>
    %208 = vector.broadcast %207 : vector<8x1xf32> to vector<8x32xf32>
    %209 = arith.subf %201, %208 : vector<8x32xf32>
    %210 = arith.mulf %209, %209 : vector<8x32xf32>
    %cst_150 = arith.constant dense<0.000000e+00> : vector<8xf32>
    %211 = vector.multi_reduction <add>, %210, %cst_150 [1] : vector<8x32xf32> to vector<8xf32>
    %212 = vector.shape_cast %211 : vector<8xf32> to vector<8x1xf32>
    %cst_151 = arith.constant 3.200000e+01 : f32
    %213 = vector.broadcast %cst_151 : f32 to vector<8x1xf32>
    %214 = arith.divf %212, %213 : vector<8x1xf32>
    %215 = vector.broadcast %207 : vector<8x1xf32> to vector<8x32xf32>
    %216 = arith.subf %201, %215 : vector<8x32xf32>
    %cst_152 = arith.constant 9.99999974E-6 : f32
    %217 = vector.broadcast %cst_152 : f32 to vector<8x1xf32>
    %218 = arith.addf %214, %217 : vector<8x1xf32>
    %219 = math.rsqrt %218 : vector<8x1xf32>
    %220 = vector.broadcast %219 : vector<8x1xf32> to vector<8x32xf32>
    %221 = arith.mulf %216, %220 : vector<8x32xf32>
    %222 = vector.broadcast %202 : vector<1x32xf32> to vector<8x32xf32>
    %223 = arith.mulf %221, %222 : vector<8x32xf32>
    %224 = vector.broadcast %203 : vector<1x32xf32> to vector<8x32xf32>
    %225 = arith.addf %223, %224 : vector<8x32xf32>
    %c0_153 = arith.constant 0 : index
    %c0_154 = arith.constant 0 : index
    %c0_155 = arith.constant 0 : index
    %226 = vector.load %arg19[%c0_153, %c0_154, %c0_155] : memref<1x8x32xf32, #tpu.memory_space<vmem>>, vector<1x8x32xf32>
    %227 = vector.shape_cast %226 : vector<1x8x32xf32> to vector<8x32xf32>
    %228 = vector.shape_cast %225 : vector<8x32xf32> to vector<1x8x32xf32>
    tpu.vector_store %arg19[%c0_153, %c0_154, %c0_155], %228 {strides = array<i32>} : memref<1x8x32xf32, #tpu.memory_space<vmem>>, vector<1x8x32xf32>,
    return
  }
  func.func @transform_0(%arg0: i32) -> (i32, i32, i32) {
    %c0_i32 = arith.constant 0 : i32
    %c0_i32_0 = arith.constant 0 : i32
    %c0_i32_1 = arith.constant 0 : i32
    return %arg0, %c0_i32, %c0_i32_0 : i32, i32, i32
  }
  func.func @transform_1(%arg0: i32) -> (i32, i32, i32) {
    %c0_i32 = arith.constant 0 : i32
    %c0_i32_0 = arith.constant 0 : i32
    %c0_i32_1 = arith.constant 0 : i32
    return %arg0, %c0_i32, %c0_i32_0 : i32, i32, i32
  }
  func.func @transform_2(%arg0: i32) -> (i32, i32, i32) {
    %c0_i32 = arith.constant 0 : i32
    %c0_i32_0 = arith.constant 0 : i32
    %c0_i32_1 = arith.constant 0 : i32
    %c0_i32_2 = arith.constant 0 : i32
    return %c0_i32, %c0_i32_0, %c0_i32_1 : i32, i32, i32
  }
  func.func @transform_3(%arg0: i32) -> (i32, i32, i32) {
    %c0_i32 = arith.constant 0 : i32
    %c0_i32_0 = arith.constant 0 : i32
    %c0_i32_1 = arith.constant 0 : i32
    %c0_i32_2 = arith.constant 0 : i32
    return %c0_i32, %c0_i32_0, %c0_i32_1 : i32, i32, i32
  }
  func.func @transform_4(%arg0: i32) -> (i32, i32, i32) {
    %c0_i32 = arith.constant 0 : i32
    %c0_i32_0 = arith.constant 0 : i32
    %c0_i32_1 = arith.constant 0 : i32
    %c0_i32_2 = arith.constant 0 : i32
    return %c0_i32, %c0_i32_0, %c0_i32_1 : i32, i32, i32
  }
  func.func @transform_5(%arg0: i32) -> (i32, i32, i32) {
    %c0_i32 = arith.constant 0 : i32
    %c0_i32_0 = arith.constant 0 : i32
    %c0_i32_1 = arith.constant 0 : i32
    %c0_i32_2 = arith.constant 0 : i32
    return %c0_i32, %c0_i32_0, %c0_i32_1 : i32, i32, i32
  }
  func.func @transform_6(%arg0: i32) -> (i32, i32, i32) {
    %c0_i32 = arith.constant 0 : i32
    %c0_i32_0 = arith.constant 0 : i32
    %c0_i32_1 = arith.constant 0 : i32
    %c0_i32_2 = arith.constant 0 : i32
    return %c0_i32, %c0_i32_0, %c0_i32_1 : i32, i32, i32
  }
  func.func @transform_7(%arg0: i32) -> (i32, i32, i32) {
    %c0_i32 = arith.constant 0 : i32
    %c0_i32_0 = arith.constant 0 : i32
    %c0_i32_1 = arith.constant 0 : i32
    %c0_i32_2 = arith.constant 0 : i32
    return %c0_i32, %c0_i32_0, %c0_i32_1 : i32, i32, i32
  }
  func.func @transform_8(%arg0: i32) -> (i32, i32, i32) {
    %c0_i32 = arith.constant 0 : i32
    %c0_i32_0 = arith.constant 0 : i32
    %c0_i32_1 = arith.constant 0 : i32
    %c0_i32_2 = arith.constant 0 : i32
    return %c0_i32, %c0_i32_0, %c0_i32_1 : i32, i32, i32
  }
  func.func @transform_9(%arg0: i32) -> (i32, i32) {
    %c0_i32 = arith.constant 0 : i32
    %c0_i32_0 = arith.constant 0 : i32
    %c0_i32_1 = arith.constant 0 : i32
    return %c0_i32, %c0_i32_0 : i32, i32
  }
  func.func @transform_10(%arg0: i32) -> (i32, i32) {
    %c0_i32 = arith.constant 0 : i32
    %c0_i32_0 = arith.constant 0 : i32
    %c0_i32_1 = arith.constant 0 : i32
    return %c0_i32, %c0_i32_0 : i32, i32
  }
  func.func @transform_11(%arg0: i32) -> (i32, i32) {
    %c0_i32 = arith.constant 0 : i32
    %c0_i32_0 = arith.constant 0 : i32
    %c0_i32_1 = arith.constant 0 : i32
    return %c0_i32, %c0_i32_0 : i32, i32
  }
  func.func @transform_12(%arg0: i32) -> (i32, i32) {
    %c0_i32 = arith.constant 0 : i32
    %c0_i32_0 = arith.constant 0 : i32
    %c0_i32_1 = arith.constant 0 : i32
    return %c0_i32, %c0_i32_0 : i32, i32
  }
  func.func @transform_13(%arg0: i32) -> (i32, i32) {
    %c0_i32 = arith.constant 0 : i32
    %c0_i32_0 = arith.constant 0 : i32
    %c0_i32_1 = arith.constant 0 : i32
    return %c0_i32, %c0_i32_0 : i32, i32
  }
  func.func @transform_14(%arg0: i32) -> (i32, i32) {
    %c0_i32 = arith.constant 0 : i32
    %c0_i32_0 = arith.constant 0 : i32
    %c0_i32_1 = arith.constant 0 : i32
    return %c0_i32, %c0_i32_0 : i32, i32
  }
  func.func @transform_15(%arg0: i32) -> (i32, i32) {
    %c0_i32 = arith.constant 0 : i32
    %c0_i32_0 = arith.constant 0 : i32
    %c0_i32_1 = arith.constant 0 : i32
    return %c0_i32, %c0_i32_0 : i32, i32
  }
  func.func @transform_16(%arg0: i32) -> (i32, i32) {
    %c0_i32 = arith.constant 0 : i32
    %c0_i32_0 = arith.constant 0 : i32
    %c0_i32_1 = arith.constant 0 : i32
    return %c0_i32, %c0_i32_0 : i32, i32
  }
  func.func @transform_17(%arg0: i32) -> (i32, i32) {
    %c0_i32 = arith.constant 0 : i32
    %c0_i32_0 = arith.constant 0 : i32
    %c0_i32_1 = arith.constant 0 : i32
    return %c0_i32, %c0_i32_0 : i32, i32
  }
  func.func @transform_18(%arg0: i32) -> (i32, i32, i32) {
    %c0_i32 = arith.constant 0 : i32
    %c0_i32_0 = arith.constant 0 : i32
    %c0_i32_1 = arith.constant 0 : i32
    return %arg0, %c0_i32, %c0_i32_0 : i32, i32, i32
  }
}

module attributes {stable_mosaic.version = 11 : i64} {
  func.func @_decoder_layer_kernel(%arg0: i32, %arg1: memref<1x8x32xf32, #tpu.memory_space<vmem>>, %arg2: memref<1x8x32xf32, #tpu.memory_space<vmem>>, %arg3: memref<1x8x8xf32, #tpu.memory_space<vmem>>, %arg4: memref<1x8x8xf32, #tpu.memory_space<vmem>>, %arg5: memref<4x32x8xf32, #tpu.memory_space<vmem>>, %arg6: memref<4x1x8xf32, #tpu.memory_space<vmem>>, %arg7: memref<4x32x8xf32, #tpu.memory_space<vmem>>, %arg8: memref<4x1x8xf32, #tpu.memory_space<vmem>>, %arg9: memref<4x32x8xf32, #tpu.memory_space<vmem>>, %arg10: memref<4x1x8xf32, #tpu.memory_space<vmem>>, %arg11: memref<4x8x32xf32, #tpu.memory_space<vmem>>, %arg12: memref<1x32xf32, #tpu.memory_space<vmem>>, %arg13: memref<1x32xf32, #tpu.memory_space<vmem>>, %arg14: memref<1x32xf32, #tpu.memory_space<vmem>>, %arg15: memref<4x32x8xf32, #tpu.memory_space<vmem>>, %arg16: memref<4x1x8xf32, #tpu.memory_space<vmem>>, %arg17: memref<4x32x8xf32, #tpu.memory_space<vmem>>, %arg18: memref<4x1x8xf32, #tpu.memory_space<vmem>>, %arg19: memref<4x32x8xf32, #tpu.memory_space<vmem>>, %arg20: memref<4x1x8xf32, #tpu.memory_space<vmem>>, %arg21: memref<4x8x32xf32, #tpu.memory_space<vmem>>, %arg22: memref<1x32xf32, #tpu.memory_space<vmem>>, %arg23: memref<1x32xf32, #tpu.memory_space<vmem>>, %arg24: memref<1x32xf32, #tpu.memory_space<vmem>>, %arg25: memref<32x64xf32, #tpu.memory_space<vmem>>, %arg26: memref<1x64xf32, #tpu.memory_space<vmem>>, %arg27: memref<64x32xf32, #tpu.memory_space<vmem>>, %arg28: memref<1x32xf32, #tpu.memory_space<vmem>>, %arg29: memref<1x32xf32, #tpu.memory_space<vmem>>, %arg30: memref<1x32xf32, #tpu.memory_space<vmem>>, %arg31: memref<1x8x32xf32, #tpu.memory_space<vmem>>) attributes {dimension_semantics = [#tpu.dimension_semantics<parallel>], iteration_bounds = array<i64: 2>, scalar_prefetch = 0 : i64, scratch_operands = 0 : i64, tpu.core_type = #tpu.core_type<tc>, window_params = [{transform_indices = @transform_0, window_bounds = array<i64: 1, 8, 32>}, {transform_indices = @transform_1, window_bounds = array<i64: 1, 8, 32>}, {transform_indices = @transform_2, window_bounds = array<i64: 1, 8, 8>}, {transform_indices = @transform_3, window_bounds = array<i64: 1, 8, 8>}, {pipeline_mode = #tpu.pipeline_mode<synchronous>, transform_indices = @transform_4, window_bounds = array<i64: 4, 32, 8>}, {pipeline_mode = #tpu.pipeline_mode<synchronous>, transform_indices = @transform_5, window_bounds = array<i64: 4, 1, 8>}, {pipeline_mode = #tpu.pipeline_mode<synchronous>, transform_indices = @transform_6, window_bounds = array<i64: 4, 32, 8>}, {pipeline_mode = #tpu.pipeline_mode<synchronous>, transform_indices = @transform_7, window_bounds = array<i64: 4, 1, 8>}, {pipeline_mode = #tpu.pipeline_mode<synchronous>, transform_indices = @transform_8, window_bounds = array<i64: 4, 32, 8>}, {pipeline_mode = #tpu.pipeline_mode<synchronous>, transform_indices = @transform_9, window_bounds = array<i64: 4, 1, 8>}, {pipeline_mode = #tpu.pipeline_mode<synchronous>, transform_indices = @transform_10, window_bounds = array<i64: 4, 8, 32>}, {pipeline_mode = #tpu.pipeline_mode<synchronous>, transform_indices = @transform_11, window_bounds = array<i64: 1, 32>}, {pipeline_mode = #tpu.pipeline_mode<synchronous>, transform_indices = @transform_12, window_bounds = array<i64: 1, 32>}, {pipeline_mode = #tpu.pipeline_mode<synchronous>, transform_indices = @transform_13, window_bounds = array<i64: 1, 32>}, {pipeline_mode = #tpu.pipeline_mode<synchronous>, transform_indices = @transform_14, window_bounds = array<i64: 4, 32, 8>}, {pipeline_mode = #tpu.pipeline_mode<synchronous>, transform_indices = @transform_15, window_bounds = array<i64: 4, 1, 8>}, {pipeline_mode = #tpu.pipeline_mode<synchronous>, transform_indices = @transform_16, window_bounds = array<i64: 4, 32, 8>}, {pipeline_mode = #tpu.pipeline_mode<synchronous>, transform_indices = @transform_17, window_bounds = array<i64: 4, 1, 8>}, {pipeline_mode = #tpu.pipeline_mode<synchronous>, transform_indices = @transform_18, window_bounds = array<i64: 4, 32, 8>}, {pipeline_mode = #tpu.pipeline_mode<synchronous>, transform_indices = @transform_19, window_bounds = array<i64: 4, 1, 8>}, {pipeline_mode = #tpu.pipeline_mode<synchronous>, transform_indices = @transform_20, window_bounds = array<i64: 4, 8, 32>}, {pipeline_mode = #tpu.pipeline_mode<synchronous>, transform_indices = @transform_21, window_bounds = array<i64: 1, 32>}, {pipeline_mode = #tpu.pipeline_mode<synchronous>, transform_indices = @transform_22, window_bounds = array<i64: 1, 32>}, {pipeline_mode = #tpu.pipeline_mode<synchronous>, transform_indices = @transform_23, window_bounds = array<i64: 1, 32>}, {pipeline_mode = #tpu.pipeline_mode<synchronous>, transform_indices = @transform_24, window_bounds = array<i64: 32, 64>}, {pipeline_mode = #tpu.pipeline_mode<synchronous>, transform_indices = @transform_25, window_bounds = array<i64: 1, 64>}, {pipeline_mode = #tpu.pipeline_mode<synchronous>, transform_indices = @transform_26, window_bounds = array<i64: 64, 32>}, {pipeline_mode = #tpu.pipeline_mode<synchronous>, transform_indices = @transform_27, window_bounds = array<i64: 1, 32>}, {pipeline_mode = #tpu.pipeline_mode<synchronous>, transform_indices = @transform_28, window_bounds = array<i64: 1, 32>}, {pipeline_mode = #tpu.pipeline_mode<synchronous>, transform_indices = @transform_29, window_bounds = array<i64: 1, 32>}, {transform_indices = @transform_30, window_bounds = array<i64: 1, 8, 32>}]} {
    %c0 = arith.constant 0 : index
    %c0_0 = arith.constant 0 : index
    %c0_1 = arith.constant 0 : index
    %0 = vector.load %arg1[%c0, %c0_0, %c0_1] : memref<1x8x32xf32, #tpu.memory_space<vmem>>, vector<1x8x32xf32>
    %1 = vector.shape_cast %0 : vector<1x8x32xf32> to vector<8x32xf32>
    %c0_2 = arith.constant 0 : index
    %c0_3 = arith.constant 0 : index
    %c0_4 = arith.constant 0 : index
    %2 = vector.load %arg2[%c0_2, %c0_3, %c0_4] : memref<1x8x32xf32, #tpu.memory_space<vmem>>, vector<1x8x32xf32>
    %3 = vector.shape_cast %2 : vector<1x8x32xf32> to vector<8x32xf32>
    %c0_5 = arith.constant 0 : index
    %c0_6 = arith.constant 0 : index
    %c0_7 = arith.constant 0 : index
    %4 = vector.load %arg3[%c0_5, %c0_6, %c0_7] : memref<1x8x8xf32, #tpu.memory_space<vmem>>, vector<1x8x8xf32>
    %5 = vector.shape_cast %4 : vector<1x8x8xf32> to vector<8x8xf32>
    %cst = arith.constant 0.000000e+00 : f32
    %6 = vector.broadcast %cst : f32 to vector<8x32xf32>
    %c0_8 = arith.constant 0 : index
    %c0_9 = arith.constant 0 : index
    %c0_10 = arith.constant 0 : index
    %7 = vector.load %arg5[%c0_8, %c0_9, %c0_10] : memref<4x32x8xf32, #tpu.memory_space<vmem>>, vector<1x32x8xf32>
    %8 = vector.shape_cast %7 : vector<1x32x8xf32> to vector<32x8xf32>
    %cst_11 = arith.constant dense<0.000000e+00> : vector<8x8xf32>
    %9 = tpu.matmul %1, %8, %cst_11 {dimension_numbers = #tpu.dot_dimension_numbers<[1], [0], [0], [1], [0, 0, 1, 1], [], []>} : vector<8x32xf32>, vector<32x8xf32>, vector<8x8xf32> -> vector<8x8xf32>
    %c0_12 = arith.constant 0 : index
    %c0_13 = arith.constant 0 : index
    %c0_14 = arith.constant 0 : index
    %10 = vector.load %arg6[%c0_12, %c0_13, %c0_14] : memref<4x1x8xf32, #tpu.memory_space<vmem>>, vector<1x1x8xf32>
    %11 = vector.shape_cast %10 : vector<1x1x8xf32> to vector<1x8xf32>
    %12 = vector.broadcast %11 : vector<1x8xf32> to vector<8x8xf32>
    %13 = arith.addf %9, %12 : vector<8x8xf32>
    %c0_15 = arith.constant 0 : index
    %c0_16 = arith.constant 0 : index
    %c0_17 = arith.constant 0 : index
    %14 = vector.load %arg7[%c0_15, %c0_16, %c0_17] : memref<4x32x8xf32, #tpu.memory_space<vmem>>, vector<1x32x8xf32>
    %15 = vector.shape_cast %14 : vector<1x32x8xf32> to vector<32x8xf32>
    %cst_18 = arith.constant dense<0.000000e+00> : vector<8x8xf32>
    %16 = tpu.matmul %1, %15, %cst_18 {dimension_numbers = #tpu.dot_dimension_numbers<[1], [0], [0], [1], [0, 0, 1, 1], [], []>} : vector<8x32xf32>, vector<32x8xf32>, vector<8x8xf32> -> vector<8x8xf32>
    %c0_19 = arith.constant 0 : index
    %c0_20 = arith.constant 0 : index
    %c0_21 = arith.constant 0 : index
    %17 = vector.load %arg8[%c0_19, %c0_20, %c0_21] : memref<4x1x8xf32, #tpu.memory_space<vmem>>, vector<1x1x8xf32>
    %18 = vector.shape_cast %17 : vector<1x1x8xf32> to vector<1x8xf32>
    %19 = vector.broadcast %18 : vector<1x8xf32> to vector<8x8xf32>
    %20 = arith.addf %16, %19 : vector<8x8xf32>
    %c0_22 = arith.constant 0 : index
    %c0_23 = arith.constant 0 : index
    %c0_24 = arith.constant 0 : index
    %21 = vector.load %arg9[%c0_22, %c0_23, %c0_24] : memref<4x32x8xf32, #tpu.memory_space<vmem>>, vector<1x32x8xf32>
    %22 = vector.shape_cast %21 : vector<1x32x8xf32> to vector<32x8xf32>
    %cst_25 = arith.constant dense<0.000000e+00> : vector<8x8xf32>
    %23 = tpu.matmul %1, %22, %cst_25 {dimension_numbers = #tpu.dot_dimension_numbers<[1], [0], [0], [1], [0, 0, 1, 1], [], []>} : vector<8x32xf32>, vector<32x8xf32>, vector<8x8xf32> -> vector<8x8xf32>
    %c0_26 = arith.constant 0 : index
    %c0_27 = arith.constant 0 : index
    %c0_28 = arith.constant 0 : index
    %24 = vector.load %arg10[%c0_26, %c0_27, %c0_28] : memref<4x1x8xf32, #tpu.memory_space<vmem>>, vector<1x1x8xf32>
    %25 = vector.shape_cast %24 : vector<1x1x8xf32> to vector<1x8xf32>
    %26 = vector.broadcast %25 : vector<1x8xf32> to vector<8x8xf32>
    %27 = arith.addf %23, %26 : vector<8x8xf32>
    %cst_29 = arith.constant dense<0.000000e+00> : vector<8x8xf32>
    %28 = tpu.matmul %13, %20, %cst_29 {dimension_numbers = #tpu.dot_dimension_numbers<[1], [1], [0], [0], [0, 0, 1, 0], [], []>} : vector<8x8xf32>, vector<8x8xf32>, vector<8x8xf32> -> vector<8x8xf32>
    %cst_30 = arith.constant 0.353553385 : f32
    %29 = vector.broadcast %cst_30 : f32 to vector<8x8xf32>
    %30 = arith.mulf %28, %29 : vector<8x8xf32>
    %31 = arith.addf %30, %5 : vector<8x8xf32>
    %cst_31 = arith.constant dense<0xFF800000> : vector<8xf32>
    %32 = vector.multi_reduction <maximumf>, %31, %cst_31 [1] : vector<8x8xf32> to vector<8xf32>
    %33 = vector.shape_cast %32 : vector<8xf32> to vector<8x1xf32>
    %34 = vector.broadcast %33 : vector<8x1xf32> to vector<8x8xf32>
    %35 = arith.subf %31, %34 : vector<8x8xf32>
    %36 = math.exp %35 : vector<8x8xf32>
    %cst_32 = arith.constant dense<0.000000e+00> : vector<8xf32>
    %37 = vector.multi_reduction <add>, %36, %cst_32 [1] : vector<8x8xf32> to vector<8xf32>
    %38 = vector.shape_cast %37 : vector<8xf32> to vector<8x1xf32>
    %39 = vector.broadcast %38 : vector<8x1xf32> to vector<8x8xf32>
    %40 = arith.divf %36, %39 : vector<8x8xf32>
    %cst_33 = arith.constant dense<0.000000e+00> : vector<8x8xf32>
    %41 = tpu.matmul %40, %27, %cst_33 {dimension_numbers = #tpu.dot_dimension_numbers<[1], [0], [0], [1], [0, 0, 1, 1], [], []>} : vector<8x8xf32>, vector<8x8xf32>, vector<8x8xf32> -> vector<8x8xf32>
    %c0_34 = arith.constant 0 : index
    %c0_35 = arith.constant 0 : index
    %c0_36 = arith.constant 0 : index
    %42 = vector.load %arg11[%c0_34, %c0_35, %c0_36] : memref<4x8x32xf32, #tpu.memory_space<vmem>>, vector<1x8x32xf32>
    %43 = vector.shape_cast %42 : vector<1x8x32xf32> to vector<8x32xf32>
    %cst_37 = arith.constant dense<0.000000e+00> : vector<8x32xf32>
    %44 = tpu.matmul %41, %43, %cst_37 {dimension_numbers = #tpu.dot_dimension_numbers<[1], [0], [0], [1], [0, 0, 1, 1], [], []>} : vector<8x8xf32>, vector<8x32xf32>, vector<8x32xf32> -> vector<8x32xf32>
    %45 = arith.addf %6, %44 : vector<8x32xf32>
    %c1 = arith.constant 1 : index
    %c0_38 = arith.constant 0 : index
    %c0_39 = arith.constant 0 : index
    %46 = vector.load %arg5[%c1, %c0_38, %c0_39] : memref<4x32x8xf32, #tpu.memory_space<vmem>>, vector<1x32x8xf32>
    %47 = vector.shape_cast %46 : vector<1x32x8xf32> to vector<32x8xf32>
    %cst_40 = arith.constant dense<0.000000e+00> : vector<8x8xf32>
    %48 = tpu.matmul %1, %47, %cst_40 {dimension_numbers = #tpu.dot_dimension_numbers<[1], [0], [0], [1], [0, 0, 1, 1], [], []>} : vector<8x32xf32>, vector<32x8xf32>, vector<8x8xf32> -> vector<8x8xf32>
    %c1_41 = arith.constant 1 : index
    %c0_42 = arith.constant 0 : index
    %c0_43 = arith.constant 0 : index
    %49 = vector.load %arg6[%c1_41, %c0_42, %c0_43] : memref<4x1x8xf32, #tpu.memory_space<vmem>>, vector<1x1x8xf32>
    %50 = vector.shape_cast %49 : vector<1x1x8xf32> to vector<1x8xf32>
    %51 = vector.broadcast %50 : vector<1x8xf32> to vector<8x8xf32>
    %52 = arith.addf %48, %51 : vector<8x8xf32>
    %c1_44 = arith.constant 1 : index
    %c0_45 = arith.constant 0 : index
    %c0_46 = arith.constant 0 : index
    %53 = vector.load %arg7[%c1_44, %c0_45, %c0_46] : memref<4x32x8xf32, #tpu.memory_space<vmem>>, vector<1x32x8xf32>
    %54 = vector.shape_cast %53 : vector<1x32x8xf32> to vector<32x8xf32>
    %cst_47 = arith.constant dense<0.000000e+00> : vector<8x8xf32>
    %55 = tpu.matmul %1, %54, %cst_47 {dimension_numbers = #tpu.dot_dimension_numbers<[1], [0], [0], [1], [0, 0, 1, 1], [], []>} : vector<8x32xf32>, vector<32x8xf32>, vector<8x8xf32> -> vector<8x8xf32>
    %c1_48 = arith.constant 1 : index
    %c0_49 = arith.constant 0 : index
    %c0_50 = arith.constant 0 : index
    %56 = vector.load %arg8[%c1_48, %c0_49, %c0_50] : memref<4x1x8xf32, #tpu.memory_space<vmem>>, vector<1x1x8xf32>
    %57 = vector.shape_cast %56 : vector<1x1x8xf32> to vector<1x8xf32>
    %58 = vector.broadcast %57 : vector<1x8xf32> to vector<8x8xf32>
    %59 = arith.addf %55, %58 : vector<8x8xf32>
    %c1_51 = arith.constant 1 : index
    %c0_52 = arith.constant 0 : index
    %c0_53 = arith.constant 0 : index
    %60 = vector.load %arg9[%c1_51, %c0_52, %c0_53] : memref<4x32x8xf32, #tpu.memory_space<vmem>>, vector<1x32x8xf32>
    %61 = vector.shape_cast %60 : vector<1x32x8xf32> to vector<32x8xf32>
    %cst_54 = arith.constant dense<0.000000e+00> : vector<8x8xf32>
    %62 = tpu.matmul %1, %61, %cst_54 {dimension_numbers = #tpu.dot_dimension_numbers<[1], [0], [0], [1], [0, 0, 1, 1], [], []>} : vector<8x32xf32>, vector<32x8xf32>, vector<8x8xf32> -> vector<8x8xf32>
    %c1_55 = arith.constant 1 : index
    %c0_56 = arith.constant 0 : index
    %c0_57 = arith.constant 0 : index
    %63 = vector.load %arg10[%c1_55, %c0_56, %c0_57] : memref<4x1x8xf32, #tpu.memory_space<vmem>>, vector<1x1x8xf32>
    %64 = vector.shape_cast %63 : vector<1x1x8xf32> to vector<1x8xf32>
    %65 = vector.broadcast %64 : vector<1x8xf32> to vector<8x8xf32>
    %66 = arith.addf %62, %65 : vector<8x8xf32>
    %cst_58 = arith.constant dense<0.000000e+00> : vector<8x8xf32>
    %67 = tpu.matmul %52, %59, %cst_58 {dimension_numbers = #tpu.dot_dimension_numbers<[1], [1], [0], [0], [0, 0, 1, 0], [], []>} : vector<8x8xf32>, vector<8x8xf32>, vector<8x8xf32> -> vector<8x8xf32>
    %cst_59 = arith.constant 0.353553385 : f32
    %68 = vector.broadcast %cst_59 : f32 to vector<8x8xf32>
    %69 = arith.mulf %67, %68 : vector<8x8xf32>
    %70 = arith.addf %69, %5 : vector<8x8xf32>
    %cst_60 = arith.constant dense<0xFF800000> : vector<8xf32>
    %71 = vector.multi_reduction <maximumf>, %70, %cst_60 [1] : vector<8x8xf32> to vector<8xf32>
    %72 = vector.shape_cast %71 : vector<8xf32> to vector<8x1xf32>
    %73 = vector.broadcast %72 : vector<8x1xf32> to vector<8x8xf32>
    %74 = arith.subf %70, %73 : vector<8x8xf32>
    %75 = math.exp %74 : vector<8x8xf32>
    %cst_61 = arith.constant dense<0.000000e+00> : vector<8xf32>
    %76 = vector.multi_reduction <add>, %75, %cst_61 [1] : vector<8x8xf32> to vector<8xf32>
    %77 = vector.shape_cast %76 : vector<8xf32> to vector<8x1xf32>
    %78 = vector.broadcast %77 : vector<8x1xf32> to vector<8x8xf32>
    %79 = arith.divf %75, %78 : vector<8x8xf32>
    %cst_62 = arith.constant dense<0.000000e+00> : vector<8x8xf32>
    %80 = tpu.matmul %79, %66, %cst_62 {dimension_numbers = #tpu.dot_dimension_numbers<[1], [0], [0], [1], [0, 0, 1, 1], [], []>} : vector<8x8xf32>, vector<8x8xf32>, vector<8x8xf32> -> vector<8x8xf32>
    %c1_63 = arith.constant 1 : index
    %c0_64 = arith.constant 0 : index
    %c0_65 = arith.constant 0 : index
    %81 = vector.load %arg11[%c1_63, %c0_64, %c0_65] : memref<4x8x32xf32, #tpu.memory_space<vmem>>, vector<1x8x32xf32>
    %82 = vector.shape_cast %81 : vector<1x8x32xf32> to vector<8x32xf32>
    %cst_66 = arith.constant dense<0.000000e+00> : vector<8x32xf32>
    %83 = tpu.matmul %80, %82, %cst_66 {dimension_numbers = #tpu.dot_dimension_numbers<[1], [0], [0], [1], [0, 0, 1, 1], [], []>} : vector<8x8xf32>, vector<8x32xf32>, vector<8x32xf32> -> vector<8x32xf32>
    %84 = arith.addf %45, %83 : vector<8x32xf32>
    %c2 = arith.constant 2 : index
    %c0_67 = arith.constant 0 : index
    %c0_68 = arith.constant 0 : index
    %85 = vector.load %arg5[%c2, %c0_67, %c0_68] : memref<4x32x8xf32, #tpu.memory_space<vmem>>, vector<1x32x8xf32>
    %86 = vector.shape_cast %85 : vector<1x32x8xf32> to vector<32x8xf32>
    %cst_69 = arith.constant dense<0.000000e+00> : vector<8x8xf32>
    %87 = tpu.matmul %1, %86, %cst_69 {dimension_numbers = #tpu.dot_dimension_numbers<[1], [0], [0], [1], [0, 0, 1, 1], [], []>} : vector<8x32xf32>, vector<32x8xf32>, vector<8x8xf32> -> vector<8x8xf32>
    %c2_70 = arith.constant 2 : index
    %c0_71 = arith.constant 0 : index
    %c0_72 = arith.constant 0 : index
    %88 = vector.load %arg6[%c2_70, %c0_71, %c0_72] : memref<4x1x8xf32, #tpu.memory_space<vmem>>, vector<1x1x8xf32>
    %89 = vector.shape_cast %88 : vector<1x1x8xf32> to vector<1x8xf32>
    %90 = vector.broadcast %89 : vector<1x8xf32> to vector<8x8xf32>
    %91 = arith.addf %87, %90 : vector<8x8xf32>
    %c2_73 = arith.constant 2 : index
    %c0_74 = arith.constant 0 : index
    %c0_75 = arith.constant 0 : index
    %92 = vector.load %arg7[%c2_73, %c0_74, %c0_75] : memref<4x32x8xf32, #tpu.memory_space<vmem>>, vector<1x32x8xf32>
    %93 = vector.shape_cast %92 : vector<1x32x8xf32> to vector<32x8xf32>
    %cst_76 = arith.constant dense<0.000000e+00> : vector<8x8xf32>
    %94 = tpu.matmul %1, %93, %cst_76 {dimension_numbers = #tpu.dot_dimension_numbers<[1], [0], [0], [1], [0, 0, 1, 1], [], []>} : vector<8x32xf32>, vector<32x8xf32>, vector<8x8xf32> -> vector<8x8xf32>
    %c2_77 = arith.constant 2 : index
    %c0_78 = arith.constant 0 : index
    %c0_79 = arith.constant 0 : index
    %95 = vector.load %arg8[%c2_77, %c0_78, %c0_79] : memref<4x1x8xf32, #tpu.memory_space<vmem>>, vector<1x1x8xf32>
    %96 = vector.shape_cast %95 : vector<1x1x8xf32> to vector<1x8xf32>
    %97 = vector.broadcast %96 : vector<1x8xf32> to vector<8x8xf32>
    %98 = arith.addf %94, %97 : vector<8x8xf32>
    %c2_80 = arith.constant 2 : index
    %c0_81 = arith.constant 0 : index
    %c0_82 = arith.constant 0 : index
    %99 = vector.load %arg9[%c2_80, %c0_81, %c0_82] : memref<4x32x8xf32, #tpu.memory_space<vmem>>, vector<1x32x8xf32>
    %100 = vector.shape_cast %99 : vector<1x32x8xf32> to vector<32x8xf32>
    %cst_83 = arith.constant dense<0.000000e+00> : vector<8x8xf32>
    %101 = tpu.matmul %1, %100, %cst_83 {dimension_numbers = #tpu.dot_dimension_numbers<[1], [0], [0], [1], [0, 0, 1, 1], [], []>} : vector<8x32xf32>, vector<32x8xf32>, vector<8x8xf32> -> vector<8x8xf32>
    %c2_84 = arith.constant 2 : index
    %c0_85 = arith.constant 0 : index
    %c0_86 = arith.constant 0 : index
    %102 = vector.load %arg10[%c2_84, %c0_85, %c0_86] : memref<4x1x8xf32, #tpu.memory_space<vmem>>, vector<1x1x8xf32>
    %103 = vector.shape_cast %102 : vector<1x1x8xf32> to vector<1x8xf32>
    %104 = vector.broadcast %103 : vector<1x8xf32> to vector<8x8xf32>
    %105 = arith.addf %101, %104 : vector<8x8xf32>
    %cst_87 = arith.constant dense<0.000000e+00> : vector<8x8xf32>
    %106 = tpu.matmul %91, %98, %cst_87 {dimension_numbers = #tpu.dot_dimension_numbers<[1], [1], [0], [0], [0, 0, 1, 0], [], []>} : vector<8x8xf32>, vector<8x8xf32>, vector<8x8xf32> -> vector<8x8xf32>
    %cst_88 = arith.constant 0.353553385 : f32
    %107 = vector.broadcast %cst_88 : f32 to vector<8x8xf32>
    %108 = arith.mulf %106, %107 : vector<8x8xf32>
    %109 = arith.addf %108, %5 : vector<8x8xf32>
    %cst_89 = arith.constant dense<0xFF800000> : vector<8xf32>
    %110 = vector.multi_reduction <maximumf>, %109, %cst_89 [1] : vector<8x8xf32> to vector<8xf32>
    %111 = vector.shape_cast %110 : vector<8xf32> to vector<8x1xf32>
    %112 = vector.broadcast %111 : vector<8x1xf32> to vector<8x8xf32>
    %113 = arith.subf %109, %112 : vector<8x8xf32>
    %114 = math.exp %113 : vector<8x8xf32>
    %cst_90 = arith.constant dense<0.000000e+00> : vector<8xf32>
    %115 = vector.multi_reduction <add>, %114, %cst_90 [1] : vector<8x8xf32> to vector<8xf32>
    %116 = vector.shape_cast %115 : vector<8xf32> to vector<8x1xf32>
    %117 = vector.broadcast %116 : vector<8x1xf32> to vector<8x8xf32>
    %118 = arith.divf %114, %117 : vector<8x8xf32>
    %cst_91 = arith.constant dense<0.000000e+00> : vector<8x8xf32>
    %119 = tpu.matmul %118, %105, %cst_91 {dimension_numbers = #tpu.dot_dimension_numbers<[1], [0], [0], [1], [0, 0, 1, 1], [], []>} : vector<8x8xf32>, vector<8x8xf32>, vector<8x8xf32> -> vector<8x8xf32>
    %c2_92 = arith.constant 2 : index
    %c0_93 = arith.constant 0 : index
    %c0_94 = arith.constant 0 : index
    %120 = vector.load %arg11[%c2_92, %c0_93, %c0_94] : memref<4x8x32xf32, #tpu.memory_space<vmem>>, vector<1x8x32xf32>
    %121 = vector.shape_cast %120 : vector<1x8x32xf32> to vector<8x32xf32>
    %cst_95 = arith.constant dense<0.000000e+00> : vector<8x32xf32>
    %122 = tpu.matmul %119, %121, %cst_95 {dimension_numbers = #tpu.dot_dimension_numbers<[1], [0], [0], [1], [0, 0, 1, 1], [], []>} : vector<8x8xf32>, vector<8x32xf32>, vector<8x32xf32> -> vector<8x32xf32>
    %123 = arith.addf %84, %122 : vector<8x32xf32>
    %c3 = arith.constant 3 : index
    %c0_96 = arith.constant 0 : index
    %c0_97 = arith.constant 0 : index
    %124 = vector.load %arg5[%c3, %c0_96, %c0_97] : memref<4x32x8xf32, #tpu.memory_space<vmem>>, vector<1x32x8xf32>
    %125 = vector.shape_cast %124 : vector<1x32x8xf32> to vector<32x8xf32>
    %cst_98 = arith.constant dense<0.000000e+00> : vector<8x8xf32>
    %126 = tpu.matmul %1, %125, %cst_98 {dimension_numbers = #tpu.dot_dimension_numbers<[1], [0], [0], [1], [0, 0, 1, 1], [], []>} : vector<8x32xf32>, vector<32x8xf32>, vector<8x8xf32> -> vector<8x8xf32>
    %c3_99 = arith.constant 3 : index
    %c0_100 = arith.constant 0 : index
    %c0_101 = arith.constant 0 : index
    %127 = vector.load %arg6[%c3_99, %c0_100, %c0_101] : memref<4x1x8xf32, #tpu.memory_space<vmem>>, vector<1x1x8xf32>
    %128 = vector.shape_cast %127 : vector<1x1x8xf32> to vector<1x8xf32>
    %129 = vector.broadcast %128 : vector<1x8xf32> to vector<8x8xf32>
    %130 = arith.addf %126, %129 : vector<8x8xf32>
    %c3_102 = arith.constant 3 : index
    %c0_103 = arith.constant 0 : index
    %c0_104 = arith.constant 0 : index
    %131 = vector.load %arg7[%c3_102, %c0_103, %c0_104] : memref<4x32x8xf32, #tpu.memory_space<vmem>>, vector<1x32x8xf32>
    %132 = vector.shape_cast %131 : vector<1x32x8xf32> to vector<32x8xf32>
    %cst_105 = arith.constant dense<0.000000e+00> : vector<8x8xf32>
    %133 = tpu.matmul %1, %132, %cst_105 {dimension_numbers = #tpu.dot_dimension_numbers<[1], [0], [0], [1], [0, 0, 1, 1], [], []>} : vector<8x32xf32>, vector<32x8xf32>, vector<8x8xf32> -> vector<8x8xf32>
    %c3_106 = arith.constant 3 : index
    %c0_107 = arith.constant 0 : index
    %c0_108 = arith.constant 0 : index
    %134 = vector.load %arg8[%c3_106, %c0_107, %c0_108] : memref<4x1x8xf32, #tpu.memory_space<vmem>>, vector<1x1x8xf32>
    %135 = vector.shape_cast %134 : vector<1x1x8xf32> to vector<1x8xf32>
    %136 = vector.broadcast %135 : vector<1x8xf32> to vector<8x8xf32>
    %137 = arith.addf %133, %136 : vector<8x8xf32>
    %c3_109 = arith.constant 3 : index
    %c0_110 = arith.constant 0 : index
    %c0_111 = arith.constant 0 : index
    %138 = vector.load %arg9[%c3_109, %c0_110, %c0_111] : memref<4x32x8xf32, #tpu.memory_space<vmem>>, vector<1x32x8xf32>
    %139 = vector.shape_cast %138 : vector<1x32x8xf32> to vector<32x8xf32>
    %cst_112 = arith.constant dense<0.000000e+00> : vector<8x8xf32>
    %140 = tpu.matmul %1, %139, %cst_112 {dimension_numbers = #tpu.dot_dimension_numbers<[1], [0], [0], [1], [0, 0, 1, 1], [], []>} : vector<8x32xf32>, vector<32x8xf32>, vector<8x8xf32> -> vector<8x8xf32>
    %c3_113 = arith.constant 3 : index
    %c0_114 = arith.constant 0 : index
    %c0_115 = arith.constant 0 : index
    %141 = vector.load %arg10[%c3_113, %c0_114, %c0_115] : memref<4x1x8xf32, #tpu.memory_space<vmem>>, vector<1x1x8xf32>
    %142 = vector.shape_cast %141 : vector<1x1x8xf32> to vector<1x8xf32>
    %143 = vector.broadcast %142 : vector<1x8xf32> to vector<8x8xf32>
    %144 = arith.addf %140, %143 : vector<8x8xf32>
    %cst_116 = arith.constant dense<0.000000e+00> : vector<8x8xf32>
    %145 = tpu.matmul %130, %137, %cst_116 {dimension_numbers = #tpu.dot_dimension_numbers<[1], [1], [0], [0], [0, 0, 1, 0], [], []>} : vector<8x8xf32>, vector<8x8xf32>, vector<8x8xf32> -> vector<8x8xf32>
    %cst_117 = arith.constant 0.353553385 : f32
    %146 = vector.broadcast %cst_117 : f32 to vector<8x8xf32>
    %147 = arith.mulf %145, %146 : vector<8x8xf32>
    %148 = arith.addf %147, %5 : vector<8x8xf32>
    %cst_118 = arith.constant dense<0xFF800000> : vector<8xf32>
    %149 = vector.multi_reduction <maximumf>, %148, %cst_118 [1] : vector<8x8xf32> to vector<8xf32>
    %150 = vector.shape_cast %149 : vector<8xf32> to vector<8x1xf32>
    %151 = vector.broadcast %150 : vector<8x1xf32> to vector<8x8xf32>
    %152 = arith.subf %148, %151 : vector<8x8xf32>
    %153 = math.exp %152 : vector<8x8xf32>
    %cst_119 = arith.constant dense<0.000000e+00> : vector<8xf32>
    %154 = vector.multi_reduction <add>, %153, %cst_119 [1] : vector<8x8xf32> to vector<8xf32>
    %155 = vector.shape_cast %154 : vector<8xf32> to vector<8x1xf32>
    %156 = vector.broadcast %155 : vector<8x1xf32> to vector<8x8xf32>
    %157 = arith.divf %153, %156 : vector<8x8xf32>
    %cst_120 = arith.constant dense<0.000000e+00> : vector<8x8xf32>
    %158 = tpu.matmul %157, %144, %cst_120 {dimension_numbers = #tpu.dot_dimension_numbers<[1], [0], [0], [1], [0, 0, 1, 1], [], []>} : vector<8x8xf32>, vector<8x8xf32>, vector<8x8xf32> -> vector<8x8xf32>
    %c3_121 = arith.constant 3 : index
    %c0_122 = arith.constant 0 : index
    %c0_123 = arith.constant 0 : index
    %159 = vector.load %arg11[%c3_121, %c0_122, %c0_123] : memref<4x8x32xf32, #tpu.memory_space<vmem>>, vector<1x8x32xf32>
    %160 = vector.shape_cast %159 : vector<1x8x32xf32> to vector<8x32xf32>
    %cst_124 = arith.constant dense<0.000000e+00> : vector<8x32xf32>
    %161 = tpu.matmul %158, %160, %cst_124 {dimension_numbers = #tpu.dot_dimension_numbers<[1], [0], [0], [1], [0, 0, 1, 1], [], []>} : vector<8x8xf32>, vector<8x32xf32>, vector<8x32xf32> -> vector<8x32xf32>
    %162 = arith.addf %123, %161 : vector<8x32xf32>
    %c0_125 = arith.constant 0 : index
    %c0_126 = arith.constant 0 : index
    %163 = vector.load %arg12[%c0_125, %c0_126] : memref<1x32xf32, #tpu.memory_space<vmem>>, vector<1x32xf32>
    %164 = vector.broadcast %163 : vector<1x32xf32> to vector<8x32xf32>
    %165 = arith.addf %162, %164 : vector<8x32xf32>
    %166 = arith.addf %1, %165 : vector<8x32xf32>
    %c0_127 = arith.constant 0 : index
    %c0_128 = arith.constant 0 : index
    %167 = vector.load %arg13[%c0_127, %c0_128] : memref<1x32xf32, #tpu.memory_space<vmem>>, vector<1x32xf32>
    %c0_129 = arith.constant 0 : index
    %c0_130 = arith.constant 0 : index
    %168 = vector.load %arg14[%c0_129, %c0_130] : memref<1x32xf32, #tpu.memory_space<vmem>>, vector<1x32xf32>
    %cst_131 = arith.constant dense<0.000000e+00> : vector<8xf32>
    %169 = vector.multi_reduction <add>, %166, %cst_131 [1] : vector<8x32xf32> to vector<8xf32>
    %170 = vector.shape_cast %169 : vector<8xf32> to vector<8x1xf32>
    %cst_132 = arith.constant 3.200000e+01 : f32
    %171 = vector.broadcast %cst_132 : f32 to vector<8x1xf32>
    %172 = arith.divf %170, %171 : vector<8x1xf32>
    %173 = vector.broadcast %172 : vector<8x1xf32> to vector<8x32xf32>
    %174 = arith.subf %166, %173 : vector<8x32xf32>
    %175 = arith.mulf %174, %174 : vector<8x32xf32>
    %cst_133 = arith.constant dense<0.000000e+00> : vector<8xf32>
    %176 = vector.multi_reduction <add>, %175, %cst_133 [1] : vector<8x32xf32> to vector<8xf32>
    %177 = vector.shape_cast %176 : vector<8xf32> to vector<8x1xf32>
    %cst_134 = arith.constant 3.200000e+01 : f32
    %178 = vector.broadcast %cst_134 : f32 to vector<8x1xf32>
    %179 = arith.divf %177, %178 : vector<8x1xf32>
    %180 = vector.broadcast %172 : vector<8x1xf32> to vector<8x32xf32>
    %181 = arith.subf %166, %180 : vector<8x32xf32>
    %cst_135 = arith.constant 9.99999974E-6 : f32
    %182 = vector.broadcast %cst_135 : f32 to vector<8x1xf32>
    %183 = arith.addf %179, %182 : vector<8x1xf32>
    %184 = math.rsqrt %183 : vector<8x1xf32>
    %185 = vector.broadcast %184 : vector<8x1xf32> to vector<8x32xf32>
    %186 = arith.mulf %181, %185 : vector<8x32xf32>
    %187 = vector.broadcast %167 : vector<1x32xf32> to vector<8x32xf32>
    %188 = arith.mulf %186, %187 : vector<8x32xf32>
    %189 = vector.broadcast %168 : vector<1x32xf32> to vector<8x32xf32>
    %190 = arith.addf %188, %189 : vector<8x32xf32>
    %c0_136 = arith.constant 0 : index
    %c0_137 = arith.constant 0 : index
    %c0_138 = arith.constant 0 : index
    %191 = vector.load %arg4[%c0_136, %c0_137, %c0_138] : memref<1x8x8xf32, #tpu.memory_space<vmem>>, vector<1x8x8xf32>
    %192 = vector.shape_cast %191 : vector<1x8x8xf32> to vector<8x8xf32>
    %cst_139 = arith.constant 0.000000e+00 : f32
    %193 = vector.broadcast %cst_139 : f32 to vector<8x32xf32>
    %c0_140 = arith.constant 0 : index
    %c0_141 = arith.constant 0 : index
    %c0_142 = arith.constant 0 : index
    %194 = vector.load %arg15[%c0_140, %c0_141, %c0_142] : memref<4x32x8xf32, #tpu.memory_space<vmem>>, vector<1x32x8xf32>
    %195 = vector.shape_cast %194 : vector<1x32x8xf32> to vector<32x8xf32>
    %cst_143 = arith.constant dense<0.000000e+00> : vector<8x8xf32>
    %196 = tpu.matmul %190, %195, %cst_143 {dimension_numbers = #tpu.dot_dimension_numbers<[1], [0], [0], [1], [0, 0, 1, 1], [], []>} : vector<8x32xf32>, vector<32x8xf32>, vector<8x8xf32> -> vector<8x8xf32>
    %c0_144 = arith.constant 0 : index
    %c0_145 = arith.constant 0 : index
    %c0_146 = arith.constant 0 : index
    %197 = vector.load %arg16[%c0_144, %c0_145, %c0_146] : memref<4x1x8xf32, #tpu.memory_space<vmem>>, vector<1x1x8xf32>
    %198 = vector.shape_cast %197 : vector<1x1x8xf32> to vector<1x8xf32>
    %199 = vector.broadcast %198 : vector<1x8xf32> to vector<8x8xf32>
    %200 = arith.addf %196, %199 : vector<8x8xf32>
    %c0_147 = arith.constant 0 : index
    %c0_148 = arith.constant 0 : index
    %c0_149 = arith.constant 0 : index
    %201 = vector.load %arg17[%c0_147, %c0_148, %c0_149] : memref<4x32x8xf32, #tpu.memory_space<vmem>>, vector<1x32x8xf32>
    %202 = vector.shape_cast %201 : vector<1x32x8xf32> to vector<32x8xf32>
    %cst_150 = arith.constant dense<0.000000e+00> : vector<8x8xf32>
    %203 = tpu.matmul %3, %202, %cst_150 {dimension_numbers = #tpu.dot_dimension_numbers<[1], [0], [0], [1], [0, 0, 1, 1], [], []>} : vector<8x32xf32>, vector<32x8xf32>, vector<8x8xf32> -> vector<8x8xf32>
    %c0_151 = arith.constant 0 : index
    %c0_152 = arith.constant 0 : index
    %c0_153 = arith.constant 0 : index
    %204 = vector.load %arg18[%c0_151, %c0_152, %c0_153] : memref<4x1x8xf32, #tpu.memory_space<vmem>>, vector<1x1x8xf32>
    %205 = vector.shape_cast %204 : vector<1x1x8xf32> to vector<1x8xf32>
    %206 = vector.broadcast %205 : vector<1x8xf32> to vector<8x8xf32>
    %207 = arith.addf %203, %206 : vector<8x8xf32>
    %c0_154 = arith.constant 0 : index
    %c0_155 = arith.constant 0 : index
    %c0_156 = arith.constant 0 : index
    %208 = vector.load %arg19[%c0_154, %c0_155, %c0_156] : memref<4x32x8xf32, #tpu.memory_space<vmem>>, vector<1x32x8xf32>
    %209 = vector.shape_cast %208 : vector<1x32x8xf32> to vector<32x8xf32>
    %cst_157 = arith.constant dense<0.000000e+00> : vector<8x8xf32>
    %210 = tpu.matmul %3, %209, %cst_157 {dimension_numbers = #tpu.dot_dimension_numbers<[1], [0], [0], [1], [0, 0, 1, 1], [], []>} : vector<8x32xf32>, vector<32x8xf32>, vector<8x8xf32> -> vector<8x8xf32>
    %c0_158 = arith.constant 0 : index
    %c0_159 = arith.constant 0 : index
    %c0_160 = arith.constant 0 : index
    %211 = vector.load %arg20[%c0_158, %c0_159, %c0_160] : memref<4x1x8xf32, #tpu.memory_space<vmem>>, vector<1x1x8xf32>
    %212 = vector.shape_cast %211 : vector<1x1x8xf32> to vector<1x8xf32>
    %213 = vector.broadcast %212 : vector<1x8xf32> to vector<8x8xf32>
    %214 = arith.addf %210, %213 : vector<8x8xf32>
    %cst_161 = arith.constant dense<0.000000e+00> : vector<8x8xf32>
    %215 = tpu.matmul %200, %207, %cst_161 {dimension_numbers = #tpu.dot_dimension_numbers<[1], [1], [0], [0], [0, 0, 1, 0], [], []>} : vector<8x8xf32>, vector<8x8xf32>, vector<8x8xf32> -> vector<8x8xf32>
    %cst_162 = arith.constant 0.353553385 : f32
    %216 = vector.broadcast %cst_162 : f32 to vector<8x8xf32>
    %217 = arith.mulf %215, %216 : vector<8x8xf32>
    %218 = arith.addf %217, %192 : vector<8x8xf32>
    %cst_163 = arith.constant dense<0xFF800000> : vector<8xf32>
    %219 = vector.multi_reduction <maximumf>, %218, %cst_163 [1] : vector<8x8xf32> to vector<8xf32>
    %220 = vector.shape_cast %219 : vector<8xf32> to vector<8x1xf32>
    %221 = vector.broadcast %220 : vector<8x1xf32> to vector<8x8xf32>
    %222 = arith.subf %218, %221 : vector<8x8xf32>
    %223 = math.exp %222 : vector<8x8xf32>
    %cst_164 = arith.constant dense<0.000000e+00> : vector<8xf32>
    %224 = vector.multi_reduction <add>, %223, %cst_164 [1] : vector<8x8xf32> to vector<8xf32>
    %225 = vector.shape_cast %224 : vector<8xf32> to vector<8x1xf32>
    %226 = vector.broadcast %225 : vector<8x1xf32> to vector<8x8xf32>
    %227 = arith.divf %223, %226 : vector<8x8xf32>
    %cst_165 = arith.constant dense<0.000000e+00> : vector<8x8xf32>
    %228 = tpu.matmul %227, %214, %cst_165 {dimension_numbers = #tpu.dot_dimension_numbers<[1], [0], [0], [1], [0, 0, 1, 1], [], []>} : vector<8x8xf32>, vector<8x8xf32>, vector<8x8xf32> -> vector<8x8xf32>
    %c0_166 = arith.constant 0 : index
    %c0_167 = arith.constant 0 : index
    %c0_168 = arith.constant 0 : index
    %229 = vector.load %arg21[%c0_166, %c0_167, %c0_168] : memref<4x8x32xf32, #tpu.memory_space<vmem>>, vector<1x8x32xf32>
    %230 = vector.shape_cast %229 : vector<1x8x32xf32> to vector<8x32xf32>
    %cst_169 = arith.constant dense<0.000000e+00> : vector<8x32xf32>
    %231 = tpu.matmul %228, %230, %cst_169 {dimension_numbers = #tpu.dot_dimension_numbers<[1], [0], [0], [1], [0, 0, 1, 1], [], []>} : vector<8x8xf32>, vector<8x32xf32>, vector<8x32xf32> -> vector<8x32xf32>
    %232 = arith.addf %193, %231 : vector<8x32xf32>
    %c1_170 = arith.constant 1 : index
    %c0_171 = arith.constant 0 : index
    %c0_172 = arith.constant 0 : index
    %233 = vector.load %arg15[%c1_170, %c0_171, %c0_172] : memref<4x32x8xf32, #tpu.memory_space<vmem>>, vector<1x32x8xf32>
    %234 = vector.shape_cast %233 : vector<1x32x8xf32> to vector<32x8xf32>
    %cst_173 = arith.constant dense<0.000000e+00> : vector<8x8xf32>
    %235 = tpu.matmul %190, %234, %cst_173 {dimension_numbers = #tpu.dot_dimension_numbers<[1], [0], [0], [1], [0, 0, 1, 1], [], []>} : vector<8x32xf32>, vector<32x8xf32>, vector<8x8xf32> -> vector<8x8xf32>
    %c1_174 = arith.constant 1 : index
    %c0_175 = arith.constant 0 : index
    %c0_176 = arith.constant 0 : index
    %236 = vector.load %arg16[%c1_174, %c0_175, %c0_176] : memref<4x1x8xf32, #tpu.memory_space<vmem>>, vector<1x1x8xf32>
    %237 = vector.shape_cast %236 : vector<1x1x8xf32> to vector<1x8xf32>
    %238 = vector.broadcast %237 : vector<1x8xf32> to vector<8x8xf32>
    %239 = arith.addf %235, %238 : vector<8x8xf32>
    %c1_177 = arith.constant 1 : index
    %c0_178 = arith.constant 0 : index
    %c0_179 = arith.constant 0 : index
    %240 = vector.load %arg17[%c1_177, %c0_178, %c0_179] : memref<4x32x8xf32, #tpu.memory_space<vmem>>, vector<1x32x8xf32>
    %241 = vector.shape_cast %240 : vector<1x32x8xf32> to vector<32x8xf32>
    %cst_180 = arith.constant dense<0.000000e+00> : vector<8x8xf32>
    %242 = tpu.matmul %3, %241, %cst_180 {dimension_numbers = #tpu.dot_dimension_numbers<[1], [0], [0], [1], [0, 0, 1, 1], [], []>} : vector<8x32xf32>, vector<32x8xf32>, vector<8x8xf32> -> vector<8x8xf32>
    %c1_181 = arith.constant 1 : index
    %c0_182 = arith.constant 0 : index
    %c0_183 = arith.constant 0 : index
    %243 = vector.load %arg18[%c1_181, %c0_182, %c0_183] : memref<4x1x8xf32, #tpu.memory_space<vmem>>, vector<1x1x8xf32>
    %244 = vector.shape_cast %243 : vector<1x1x8xf32> to vector<1x8xf32>
    %245 = vector.broadcast %244 : vector<1x8xf32> to vector<8x8xf32>
    %246 = arith.addf %242, %245 : vector<8x8xf32>
    %c1_184 = arith.constant 1 : index
    %c0_185 = arith.constant 0 : index
    %c0_186 = arith.constant 0 : index
    %247 = vector.load %arg19[%c1_184, %c0_185, %c0_186] : memref<4x32x8xf32, #tpu.memory_space<vmem>>, vector<1x32x8xf32>
    %248 = vector.shape_cast %247 : vector<1x32x8xf32> to vector<32x8xf32>
    %cst_187 = arith.constant dense<0.000000e+00> : vector<8x8xf32>
    %249 = tpu.matmul %3, %248, %cst_187 {dimension_numbers = #tpu.dot_dimension_numbers<[1], [0], [0], [1], [0, 0, 1, 1], [], []>} : vector<8x32xf32>, vector<32x8xf32>, vector<8x8xf32> -> vector<8x8xf32>
    %c1_188 = arith.constant 1 : index
    %c0_189 = arith.constant 0 : index
    %c0_190 = arith.constant 0 : index
    %250 = vector.load %arg20[%c1_188, %c0_189, %c0_190] : memref<4x1x8xf32, #tpu.memory_space<vmem>>, vector<1x1x8xf32>
    %251 = vector.shape_cast %250 : vector<1x1x8xf32> to vector<1x8xf32>
    %252 = vector.broadcast %251 : vector<1x8xf32> to vector<8x8xf32>
    %253 = arith.addf %249, %252 : vector<8x8xf32>
    %cst_191 = arith.constant dense<0.000000e+00> : vector<8x8xf32>
    %254 = tpu.matmul %239, %246, %cst_191 {dimension_numbers = #tpu.dot_dimension_numbers<[1], [1], [0], [0], [0, 0, 1, 0], [], []>} : vector<8x8xf32>, vector<8x8xf32>, vector<8x8xf32> -> vector<8x8xf32>
    %cst_192 = arith.constant 0.353553385 : f32
    %255 = vector.broadcast %cst_192 : f32 to vector<8x8xf32>
    %256 = arith.mulf %254, %255 : vector<8x8xf32>
    %257 = arith.addf %256, %192 : vector<8x8xf32>
    %cst_193 = arith.constant dense<0xFF800000> : vector<8xf32>
    %258 = vector.multi_reduction <maximumf>, %257, %cst_193 [1] : vector<8x8xf32> to vector<8xf32>
    %259 = vector.shape_cast %258 : vector<8xf32> to vector<8x1xf32>
    %260 = vector.broadcast %259 : vector<8x1xf32> to vector<8x8xf32>
    %261 = arith.subf %257, %260 : vector<8x8xf32>
    %262 = math.exp %261 : vector<8x8xf32>
    %cst_194 = arith.constant dense<0.000000e+00> : vector<8xf32>
    %263 = vector.multi_reduction <add>, %262, %cst_194 [1] : vector<8x8xf32> to vector<8xf32>
    %264 = vector.shape_cast %263 : vector<8xf32> to vector<8x1xf32>
    %265 = vector.broadcast %264 : vector<8x1xf32> to vector<8x8xf32>
    %266 = arith.divf %262, %265 : vector<8x8xf32>
    %cst_195 = arith.constant dense<0.000000e+00> : vector<8x8xf32>
    %267 = tpu.matmul %266, %253, %cst_195 {dimension_numbers = #tpu.dot_dimension_numbers<[1], [0], [0], [1], [0, 0, 1, 1], [], []>} : vector<8x8xf32>, vector<8x8xf32>, vector<8x8xf32> -> vector<8x8xf32>
    %c1_196 = arith.constant 1 : index
    %c0_197 = arith.constant 0 : index
    %c0_198 = arith.constant 0 : index
    %268 = vector.load %arg21[%c1_196, %c0_197, %c0_198] : memref<4x8x32xf32, #tpu.memory_space<vmem>>, vector<1x8x32xf32>
    %269 = vector.shape_cast %268 : vector<1x8x32xf32> to vector<8x32xf32>
    %cst_199 = arith.constant dense<0.000000e+00> : vector<8x32xf32>
    %270 = tpu.matmul %267, %269, %cst_199 {dimension_numbers = #tpu.dot_dimension_numbers<[1], [0], [0], [1], [0, 0, 1, 1], [], []>} : vector<8x8xf32>, vector<8x32xf32>, vector<8x32xf32> -> vector<8x32xf32>
    %271 = arith.addf %232, %270 : vector<8x32xf32>
    %c2_200 = arith.constant 2 : index
    %c0_201 = arith.constant 0 : index
    %c0_202 = arith.constant 0 : index
    %272 = vector.load %arg15[%c2_200, %c0_201, %c0_202] : memref<4x32x8xf32, #tpu.memory_space<vmem>>, vector<1x32x8xf32>
    %273 = vector.shape_cast %272 : vector<1x32x8xf32> to vector<32x8xf32>
    %cst_203 = arith.constant dense<0.000000e+00> : vector<8x8xf32>
    %274 = tpu.matmul %190, %273, %cst_203 {dimension_numbers = #tpu.dot_dimension_numbers<[1], [0], [0], [1], [0, 0, 1, 1], [], []>} : vector<8x32xf32>, vector<32x8xf32>, vector<8x8xf32> -> vector<8x8xf32>
    %c2_204 = arith.constant 2 : index
    %c0_205 = arith.constant 0 : index
    %c0_206 = arith.constant 0 : index
    %275 = vector.load %arg16[%c2_204, %c0_205, %c0_206] : memref<4x1x8xf32, #tpu.memory_space<vmem>>, vector<1x1x8xf32>
    %276 = vector.shape_cast %275 : vector<1x1x8xf32> to vector<1x8xf32>
    %277 = vector.broadcast %276 : vector<1x8xf32> to vector<8x8xf32>
    %278 = arith.addf %274, %277 : vector<8x8xf32>
    %c2_207 = arith.constant 2 : index
    %c0_208 = arith.constant 0 : index
    %c0_209 = arith.constant 0 : index
    %279 = vector.load %arg17[%c2_207, %c0_208, %c0_209] : memref<4x32x8xf32, #tpu.memory_space<vmem>>, vector<1x32x8xf32>
    %280 = vector.shape_cast %279 : vector<1x32x8xf32> to vector<32x8xf32>
    %cst_210 = arith.constant dense<0.000000e+00> : vector<8x8xf32>
    %281 = tpu.matmul %3, %280, %cst_210 {dimension_numbers = #tpu.dot_dimension_numbers<[1], [0], [0], [1], [0, 0, 1, 1], [], []>} : vector<8x32xf32>, vector<32x8xf32>, vector<8x8xf32> -> vector<8x8xf32>
    %c2_211 = arith.constant 2 : index
    %c0_212 = arith.constant 0 : index
    %c0_213 = arith.constant 0 : index
    %282 = vector.load %arg18[%c2_211, %c0_212, %c0_213] : memref<4x1x8xf32, #tpu.memory_space<vmem>>, vector<1x1x8xf32>
    %283 = vector.shape_cast %282 : vector<1x1x8xf32> to vector<1x8xf32>
    %284 = vector.broadcast %283 : vector<1x8xf32> to vector<8x8xf32>
    %285 = arith.addf %281, %284 : vector<8x8xf32>
    %c2_214 = arith.constant 2 : index
    %c0_215 = arith.constant 0 : index
    %c0_216 = arith.constant 0 : index
    %286 = vector.load %arg19[%c2_214, %c0_215, %c0_216] : memref<4x32x8xf32, #tpu.memory_space<vmem>>, vector<1x32x8xf32>
    %287 = vector.shape_cast %286 : vector<1x32x8xf32> to vector<32x8xf32>
    %cst_217 = arith.constant dense<0.000000e+00> : vector<8x8xf32>
    %288 = tpu.matmul %3, %287, %cst_217 {dimension_numbers = #tpu.dot_dimension_numbers<[1], [0], [0], [1], [0, 0, 1, 1], [], []>} : vector<8x32xf32>, vector<32x8xf32>, vector<8x8xf32> -> vector<8x8xf32>
    %c2_218 = arith.constant 2 : index
    %c0_219 = arith.constant 0 : index
    %c0_220 = arith.constant 0 : index
    %289 = vector.load %arg20[%c2_218, %c0_219, %c0_220] : memref<4x1x8xf32, #tpu.memory_space<vmem>>, vector<1x1x8xf32>
    %290 = vector.shape_cast %289 : vector<1x1x8xf32> to vector<1x8xf32>
    %291 = vector.broadcast %290 : vector<1x8xf32> to vector<8x8xf32>
    %292 = arith.addf %288, %291 : vector<8x8xf32>
    %cst_221 = arith.constant dense<0.000000e+00> : vector<8x8xf32>
    %293 = tpu.matmul %278, %285, %cst_221 {dimension_numbers = #tpu.dot_dimension_numbers<[1], [1], [0], [0], [0, 0, 1, 0], [], []>} : vector<8x8xf32>, vector<8x8xf32>, vector<8x8xf32> -> vector<8x8xf32>
    %cst_222 = arith.constant 0.353553385 : f32
    %294 = vector.broadcast %cst_222 : f32 to vector<8x8xf32>
    %295 = arith.mulf %293, %294 : vector<8x8xf32>
    %296 = arith.addf %295, %192 : vector<8x8xf32>
    %cst_223 = arith.constant dense<0xFF800000> : vector<8xf32>
    %297 = vector.multi_reduction <maximumf>, %296, %cst_223 [1] : vector<8x8xf32> to vector<8xf32>
    %298 = vector.shape_cast %297 : vector<8xf32> to vector<8x1xf32>
    %299 = vector.broadcast %298 : vector<8x1xf32> to vector<8x8xf32>
    %300 = arith.subf %296, %299 : vector<8x8xf32>
    %301 = math.exp %300 : vector<8x8xf32>
    %cst_224 = arith.constant dense<0.000000e+00> : vector<8xf32>
    %302 = vector.multi_reduction <add>, %301, %cst_224 [1] : vector<8x8xf32> to vector<8xf32>
    %303 = vector.shape_cast %302 : vector<8xf32> to vector<8x1xf32>
    %304 = vector.broadcast %303 : vector<8x1xf32> to vector<8x8xf32>
    %305 = arith.divf %301, %304 : vector<8x8xf32>
    %cst_225 = arith.constant dense<0.000000e+00> : vector<8x8xf32>
    %306 = tpu.matmul %305, %292, %cst_225 {dimension_numbers = #tpu.dot_dimension_numbers<[1], [0], [0], [1], [0, 0, 1, 1], [], []>} : vector<8x8xf32>, vector<8x8xf32>, vector<8x8xf32> -> vector<8x8xf32>
    %c2_226 = arith.constant 2 : index
    %c0_227 = arith.constant 0 : index
    %c0_228 = arith.constant 0 : index
    %307 = vector.load %arg21[%c2_226, %c0_227, %c0_228] : memref<4x8x32xf32, #tpu.memory_space<vmem>>, vector<1x8x32xf32>
    %308 = vector.shape_cast %307 : vector<1x8x32xf32> to vector<8x32xf32>
    %cst_229 = arith.constant dense<0.000000e+00> : vector<8x32xf32>
    %309 = tpu.matmul %306, %308, %cst_229 {dimension_numbers = #tpu.dot_dimension_numbers<[1], [0], [0], [1], [0, 0, 1, 1], [], []>} : vector<8x8xf32>, vector<8x32xf32>, vector<8x32xf32> -> vector<8x32xf32>
    %310 = arith.addf %271, %309 : vector<8x32xf32>
    %c3_230 = arith.constant 3 : index
    %c0_231 = arith.constant 0 : index
    %c0_232 = arith.constant 0 : index
    %311 = vector.load %arg15[%c3_230, %c0_231, %c0_232] : memref<4x32x8xf32, #tpu.memory_space<vmem>>, vector<1x32x8xf32>
    %312 = vector.shape_cast %311 : vector<1x32x8xf32> to vector<32x8xf32>
    %cst_233 = arith.constant dense<0.000000e+00> : vector<8x8xf32>
    %313 = tpu.matmul %190, %312, %cst_233 {dimension_numbers = #tpu.dot_dimension_numbers<[1], [0], [0], [1], [0, 0, 1, 1], [], []>} : vector<8x32xf32>, vector<32x8xf32>, vector<8x8xf32> -> vector<8x8xf32>
    %c3_234 = arith.constant 3 : index
    %c0_235 = arith.constant 0 : index
    %c0_236 = arith.constant 0 : index
    %314 = vector.load %arg16[%c3_234, %c0_235, %c0_236] : memref<4x1x8xf32, #tpu.memory_space<vmem>>, vector<1x1x8xf32>
    %315 = vector.shape_cast %314 : vector<1x1x8xf32> to vector<1x8xf32>
    %316 = vector.broadcast %315 : vector<1x8xf32> to vector<8x8xf32>
    %317 = arith.addf %313, %316 : vector<8x8xf32>
    %c3_237 = arith.constant 3 : index
    %c0_238 = arith.constant 0 : index
    %c0_239 = arith.constant 0 : index
    %318 = vector.load %arg17[%c3_237, %c0_238, %c0_239] : memref<4x32x8xf32, #tpu.memory_space<vmem>>, vector<1x32x8xf32>
    %319 = vector.shape_cast %318 : vector<1x32x8xf32> to vector<32x8xf32>
    %cst_240 = arith.constant dense<0.000000e+00> : vector<8x8xf32>
    %320 = tpu.matmul %3, %319, %cst_240 {dimension_numbers = #tpu.dot_dimension_numbers<[1], [0], [0], [1], [0, 0, 1, 1], [], []>} : vector<8x32xf32>, vector<32x8xf32>, vector<8x8xf32> -> vector<8x8xf32>
    %c3_241 = arith.constant 3 : index
    %c0_242 = arith.constant 0 : index
    %c0_243 = arith.constant 0 : index
    %321 = vector.load %arg18[%c3_241, %c0_242, %c0_243] : memref<4x1x8xf32, #tpu.memory_space<vmem>>, vector<1x1x8xf32>
    %322 = vector.shape_cast %321 : vector<1x1x8xf32> to vector<1x8xf32>
    %323 = vector.broadcast %322 : vector<1x8xf32> to vector<8x8xf32>
    %324 = arith.addf %320, %323 : vector<8x8xf32>
    %c3_244 = arith.constant 3 : index
    %c0_245 = arith.constant 0 : index
    %c0_246 = arith.constant 0 : index
    %325 = vector.load %arg19[%c3_244, %c0_245, %c0_246] : memref<4x32x8xf32, #tpu.memory_space<vmem>>, vector<1x32x8xf32>
    %326 = vector.shape_cast %325 : vector<1x32x8xf32> to vector<32x8xf32>
    %cst_247 = arith.constant dense<0.000000e+00> : vector<8x8xf32>
    %327 = tpu.matmul %3, %326, %cst_247 {dimension_numbers = #tpu.dot_dimension_numbers<[1], [0], [0], [1], [0, 0, 1, 1], [], []>} : vector<8x32xf32>, vector<32x8xf32>, vector<8x8xf32> -> vector<8x8xf32>
    %c3_248 = arith.constant 3 : index
    %c0_249 = arith.constant 0 : index
    %c0_250 = arith.constant 0 : index
    %328 = vector.load %arg20[%c3_248, %c0_249, %c0_250] : memref<4x1x8xf32, #tpu.memory_space<vmem>>, vector<1x1x8xf32>
    %329 = vector.shape_cast %328 : vector<1x1x8xf32> to vector<1x8xf32>
    %330 = vector.broadcast %329 : vector<1x8xf32> to vector<8x8xf32>
    %331 = arith.addf %327, %330 : vector<8x8xf32>
    %cst_251 = arith.constant dense<0.000000e+00> : vector<8x8xf32>
    %332 = tpu.matmul %317, %324, %cst_251 {dimension_numbers = #tpu.dot_dimension_numbers<[1], [1], [0], [0], [0, 0, 1, 0], [], []>} : vector<8x8xf32>, vector<8x8xf32>, vector<8x8xf32> -> vector<8x8xf32>
    %cst_252 = arith.constant 0.353553385 : f32
    %333 = vector.broadcast %cst_252 : f32 to vector<8x8xf32>
    %334 = arith.mulf %332, %333 : vector<8x8xf32>
    %335 = arith.addf %334, %192 : vector<8x8xf32>
    %cst_253 = arith.constant dense<0xFF800000> : vector<8xf32>
    %336 = vector.multi_reduction <maximumf>, %335, %cst_253 [1] : vector<8x8xf32> to vector<8xf32>
    %337 = vector.shape_cast %336 : vector<8xf32> to vector<8x1xf32>
    %338 = vector.broadcast %337 : vector<8x1xf32> to vector<8x8xf32>
    %339 = arith.subf %335, %338 : vector<8x8xf32>
    %340 = math.exp %339 : vector<8x8xf32>
    %cst_254 = arith.constant dense<0.000000e+00> : vector<8xf32>
    %341 = vector.multi_reduction <add>, %340, %cst_254 [1] : vector<8x8xf32> to vector<8xf32>
    %342 = vector.shape_cast %341 : vector<8xf32> to vector<8x1xf32>
    %343 = vector.broadcast %342 : vector<8x1xf32> to vector<8x8xf32>
    %344 = arith.divf %340, %343 : vector<8x8xf32>
    %cst_255 = arith.constant dense<0.000000e+00> : vector<8x8xf32>
    %345 = tpu.matmul %344, %331, %cst_255 {dimension_numbers = #tpu.dot_dimension_numbers<[1], [0], [0], [1], [0, 0, 1, 1], [], []>} : vector<8x8xf32>, vector<8x8xf32>, vector<8x8xf32> -> vector<8x8xf32>
    %c3_256 = arith.constant 3 : index
    %c0_257 = arith.constant 0 : index
    %c0_258 = arith.constant 0 : index
    %346 = vector.load %arg21[%c3_256, %c0_257, %c0_258] : memref<4x8x32xf32, #tpu.memory_space<vmem>>, vector<1x8x32xf32>
    %347 = vector.shape_cast %346 : vector<1x8x32xf32> to vector<8x32xf32>
    %cst_259 = arith.constant dense<0.000000e+00> : vector<8x32xf32>
    %348 = tpu.matmul %345, %347, %cst_259 {dimension_numbers = #tpu.dot_dimension_numbers<[1], [0], [0], [1], [0, 0, 1, 1], [], []>} : vector<8x8xf32>, vector<8x32xf32>, vector<8x32xf32> -> vector<8x32xf32>
    %349 = arith.addf %310, %348 : vector<8x32xf32>
    %c0_260 = arith.constant 0 : index
    %c0_261 = arith.constant 0 : index
    %350 = vector.load %arg22[%c0_260, %c0_261] : memref<1x32xf32, #tpu.memory_space<vmem>>, vector<1x32xf32>
    %351 = vector.broadcast %350 : vector<1x32xf32> to vector<8x32xf32>
    %352 = arith.addf %349, %351 : vector<8x32xf32>
    %353 = arith.addf %190, %352 : vector<8x32xf32>
    %c0_262 = arith.constant 0 : index
    %c0_263 = arith.constant 0 : index
    %354 = vector.load %arg23[%c0_262, %c0_263] : memref<1x32xf32, #tpu.memory_space<vmem>>, vector<1x32xf32>
    %c0_264 = arith.constant 0 : index
    %c0_265 = arith.constant 0 : index
    %355 = vector.load %arg24[%c0_264, %c0_265] : memref<1x32xf32, #tpu.memory_space<vmem>>, vector<1x32xf32>
    %cst_266 = arith.constant dense<0.000000e+00> : vector<8xf32>
    %356 = vector.multi_reduction <add>, %353, %cst_266 [1] : vector<8x32xf32> to vector<8xf32>
    %357 = vector.shape_cast %356 : vector<8xf32> to vector<8x1xf32>
    %cst_267 = arith.constant 3.200000e+01 : f32
    %358 = vector.broadcast %cst_267 : f32 to vector<8x1xf32>
    %359 = arith.divf %357, %358 : vector<8x1xf32>
    %360 = vector.broadcast %359 : vector<8x1xf32> to vector<8x32xf32>
    %361 = arith.subf %353, %360 : vector<8x32xf32>
    %362 = arith.mulf %361, %361 : vector<8x32xf32>
    %cst_268 = arith.constant dense<0.000000e+00> : vector<8xf32>
    %363 = vector.multi_reduction <add>, %362, %cst_268 [1] : vector<8x32xf32> to vector<8xf32>
    %364 = vector.shape_cast %363 : vector<8xf32> to vector<8x1xf32>
    %cst_269 = arith.constant 3.200000e+01 : f32
    %365 = vector.broadcast %cst_269 : f32 to vector<8x1xf32>
    %366 = arith.divf %364, %365 : vector<8x1xf32>
    %367 = vector.broadcast %359 : vector<8x1xf32> to vector<8x32xf32>
    %368 = arith.subf %353, %367 : vector<8x32xf32>
    %cst_270 = arith.constant 9.99999974E-6 : f32
    %369 = vector.broadcast %cst_270 : f32 to vector<8x1xf32>
    %370 = arith.addf %366, %369 : vector<8x1xf32>
    %371 = math.rsqrt %370 : vector<8x1xf32>
    %372 = vector.broadcast %371 : vector<8x1xf32> to vector<8x32xf32>
    %373 = arith.mulf %368, %372 : vector<8x32xf32>
    %374 = vector.broadcast %354 : vector<1x32xf32> to vector<8x32xf32>
    %375 = arith.mulf %373, %374 : vector<8x32xf32>
    %376 = vector.broadcast %355 : vector<1x32xf32> to vector<8x32xf32>
    %377 = arith.addf %375, %376 : vector<8x32xf32>
    %c0_271 = arith.constant 0 : index
    %c0_272 = arith.constant 0 : index
    %378 = vector.load %arg25[%c0_271, %c0_272] : memref<32x64xf32, #tpu.memory_space<vmem>>, vector<32x64xf32>
    %c0_273 = arith.constant 0 : index
    %c0_274 = arith.constant 0 : index
    %379 = vector.load %arg26[%c0_273, %c0_274] : memref<1x64xf32, #tpu.memory_space<vmem>>, vector<1x64xf32>
    %c0_275 = arith.constant 0 : index
    %c0_276 = arith.constant 0 : index
    %380 = vector.load %arg27[%c0_275, %c0_276] : memref<64x32xf32, #tpu.memory_space<vmem>>, vector<64x32xf32>
    %c0_277 = arith.constant 0 : index
    %c0_278 = arith.constant 0 : index
    %381 = vector.load %arg28[%c0_277, %c0_278] : memref<1x32xf32, #tpu.memory_space<vmem>>, vector<1x32xf32>
    %cst_279 = arith.constant dense<0.000000e+00> : vector<8x64xf32>
    %382 = tpu.matmul %377, %378, %cst_279 {dimension_numbers = #tpu.dot_dimension_numbers<[1], [0], [0], [1], [0, 0, 1, 1], [], []>} : vector<8x32xf32>, vector<32x64xf32>, vector<8x64xf32> -> vector<8x64xf32>
    %383 = vector.broadcast %379 : vector<1x64xf32> to vector<8x64xf32>
    %384 = arith.addf %382, %383 : vector<8x64xf32>
    %cst_280 = arith.constant 0.000000e+00 : f32
    %385 = vector.broadcast %cst_280 : f32 to vector<8x64xf32>
    %386 = arith.maximumf %384, %385 : vector<8x64xf32>
    %cst_281 = arith.constant dense<0.000000e+00> : vector<8x32xf32>
    %387 = tpu.matmul %386, %380, %cst_281 {dimension_numbers = #tpu.dot_dimension_numbers<[1], [0], [0], [1], [0, 0, 1, 1], [], []>} : vector<8x64xf32>, vector<64x32xf32>, vector<8x32xf32> -> vector<8x32xf32>
    %388 = vector.broadcast %381 : vector<1x32xf32> to vector<8x32xf32>
    %389 = arith.addf %387, %388 : vector<8x32xf32>
    %390 = arith.addf %377, %389 : vector<8x32xf32>
    %c0_282 = arith.constant 0 : index
    %c0_283 = arith.constant 0 : index
    %391 = vector.load %arg29[%c0_282, %c0_283] : memref<1x32xf32, #tpu.memory_space<vmem>>, vector<1x32xf32>
    %c0_284 = arith.constant 0 : index
    %c0_285 = arith.constant 0 : index
    %392 = vector.load %arg30[%c0_284, %c0_285] : memref<1x32xf32, #tpu.memory_space<vmem>>, vector<1x32xf32>
    %cst_286 = arith.constant dense<0.000000e+00> : vector<8xf32>
    %393 = vector.multi_reduction <add>, %390, %cst_286 [1] : vector<8x32xf32> to vector<8xf32>
    %394 = vector.shape_cast %393 : vector<8xf32> to vector<8x1xf32>
    %cst_287 = arith.constant 3.200000e+01 : f32
    %395 = vector.broadcast %cst_287 : f32 to vector<8x1xf32>
    %396 = arith.divf %394, %395 : vector<8x1xf32>
    %397 = vector.broadcast %396 : vector<8x1xf32> to vector<8x32xf32>
    %398 = arith.subf %390, %397 : vector<8x32xf32>
    %399 = arith.mulf %398, %398 : vector<8x32xf32>
    %cst_288 = arith.constant dense<0.000000e+00> : vector<8xf32>
    %400 = vector.multi_reduction <add>, %399, %cst_288 [1] : vector<8x32xf32> to vector<8xf32>
    %401 = vector.shape_cast %400 : vector<8xf32> to vector<8x1xf32>
    %cst_289 = arith.constant 3.200000e+01 : f32
    %402 = vector.broadcast %cst_289 : f32 to vector<8x1xf32>
    %403 = arith.divf %401, %402 : vector<8x1xf32>
    %404 = vector.broadcast %396 : vector<8x1xf32> to vector<8x32xf32>
    %405 = arith.subf %390, %404 : vector<8x32xf32>
    %cst_290 = arith.constant 9.99999974E-6 : f32
    %406 = vector.broadcast %cst_290 : f32 to vector<8x1xf32>
    %407 = arith.addf %403, %406 : vector<8x1xf32>
    %408 = math.rsqrt %407 : vector<8x1xf32>
    %409 = vector.broadcast %408 : vector<8x1xf32> to vector<8x32xf32>
    %410 = arith.mulf %405, %409 : vector<8x32xf32>
    %411 = vector.broadcast %391 : vector<1x32xf32> to vector<8x32xf32>
    %412 = arith.mulf %410, %411 : vector<8x32xf32>
    %413 = vector.broadcast %392 : vector<1x32xf32> to vector<8x32xf32>
    %414 = arith.addf %412, %413 : vector<8x32xf32>
    %c0_291 = arith.constant 0 : index
    %c0_292 = arith.constant 0 : index
    %c0_293 = arith.constant 0 : index
    %415 = vector.load %arg31[%c0_291, %c0_292, %c0_293] : memref<1x8x32xf32, #tpu.memory_space<vmem>>, vector<1x8x32xf32>
    %416 = vector.shape_cast %415 : vector<1x8x32xf32> to vector<8x32xf32>
    %417 = vector.shape_cast %414 : vector<8x32xf32> to vector<1x8x32xf32>
    tpu.vector_store %arg31[%c0_291, %c0_292, %c0_293], %417 {strides = array<i32>} : memref<1x8x32xf32, #tpu.memory_space<vmem>>, vector<1x8x32xf32>,
    return
  }
  func.func @transform_0(%arg0: i32) -> (i32, i32, i32) {
    %c0_i32 = arith.constant 0 : i32
    %c0_i32_0 = arith.constant 0 : i32
    %c0_i32_1 = arith.constant 0 : i32
    return %arg0, %c0_i32, %c0_i32_0 : i32, i32, i32
  }
  func.func @transform_1(%arg0: i32) -> (i32, i32, i32) {
    %c0_i32 = arith.constant 0 : i32
    %c0_i32_0 = arith.constant 0 : i32
    %c0_i32_1 = arith.constant 0 : i32
    return %arg0, %c0_i32, %c0_i32_0 : i32, i32, i32
  }
  func.func @transform_2(%arg0: i32) -> (i32, i32, i32) {
    %c0_i32 = arith.constant 0 : i32
    %c0_i32_0 = arith.constant 0 : i32
    %c0_i32_1 = arith.constant 0 : i32
    return %arg0, %c0_i32, %c0_i32_0 : i32, i32, i32
  }
  func.func @transform_3(%arg0: i32) -> (i32, i32, i32) {
    %c0_i32 = arith.constant 0 : i32
    %c0_i32_0 = arith.constant 0 : i32
    %c0_i32_1 = arith.constant 0 : i32
    return %arg0, %c0_i32, %c0_i32_0 : i32, i32, i32
  }
  func.func @transform_4(%arg0: i32) -> (i32, i32, i32) {
    %c0_i32 = arith.constant 0 : i32
    %c0_i32_0 = arith.constant 0 : i32
    %c0_i32_1 = arith.constant 0 : i32
    %c0_i32_2 = arith.constant 0 : i32
    return %c0_i32, %c0_i32_0, %c0_i32_1 : i32, i32, i32
  }
  func.func @transform_5(%arg0: i32) -> (i32, i32, i32) {
    %c0_i32 = arith.constant 0 : i32
    %c0_i32_0 = arith.constant 0 : i32
    %c0_i32_1 = arith.constant 0 : i32
    %c0_i32_2 = arith.constant 0 : i32
    return %c0_i32, %c0_i32_0, %c0_i32_1 : i32, i32, i32
  }
  func.func @transform_6(%arg0: i32) -> (i32, i32, i32) {
    %c0_i32 = arith.constant 0 : i32
    %c0_i32_0 = arith.constant 0 : i32
    %c0_i32_1 = arith.constant 0 : i32
    %c0_i32_2 = arith.constant 0 : i32
    return %c0_i32, %c0_i32_0, %c0_i32_1 : i32, i32, i32
  }
  func.func @transform_7(%arg0: i32) -> (i32, i32, i32) {
    %c0_i32 = arith.constant 0 : i32
    %c0_i32_0 = arith.constant 0 : i32
    %c0_i32_1 = arith.constant 0 : i32
    %c0_i32_2 = arith.constant 0 : i32
    return %c0_i32, %c0_i32_0, %c0_i32_1 : i32, i32, i32
  }
  func.func @transform_8(%arg0: i32) -> (i32, i32, i32) {
    %c0_i32 = arith.constant 0 : i32
    %c0_i32_0 = arith.constant 0 : i32
    %c0_i32_1 = arith.constant 0 : i32
    %c0_i32_2 = arith.constant 0 : i32
    return %c0_i32, %c0_i32_0, %c0_i32_1 : i32, i32, i32
  }
  func.func @transform_9(%arg0: i32) -> (i32, i32, i32) {
    %c0_i32 = arith.constant 0 : i32
    %c0_i32_0 = arith.constant 0 : i32
    %c0_i32_1 = arith.constant 0 : i32
    %c0_i32_2 = arith.constant 0 : i32
    return %c0_i32, %c0_i32_0, %c0_i32_1 : i32, i32, i32
  }
  func.func @transform_10(%arg0: i32) -> (i32, i32, i32) {
    %c0_i32 = arith.constant 0 : i32
    %c0_i32_0 = arith.constant 0 : i32
    %c0_i32_1 = arith.constant 0 : i32
    %c0_i32_2 = arith.constant 0 : i32
    return %c0_i32, %c0_i32_0, %c0_i32_1 : i32, i32, i32
  }
  func.func @transform_11(%arg0: i32) -> (i32, i32) {
    %c0_i32 = arith.constant 0 : i32
    %c0_i32_0 = arith.constant 0 : i32
    %c0_i32_1 = arith.constant 0 : i32
    return %c0_i32, %c0_i32_0 : i32, i32
  }
  func.func @transform_12(%arg0: i32) -> (i32, i32) {
    %c0_i32 = arith.constant 0 : i32
    %c0_i32_0 = arith.constant 0 : i32
    %c0_i32_1 = arith.constant 0 : i32
    return %c0_i32, %c0_i32_0 : i32, i32
  }
  func.func @transform_13(%arg0: i32) -> (i32, i32) {
    %c0_i32 = arith.constant 0 : i32
    %c0_i32_0 = arith.constant 0 : i32
    %c0_i32_1 = arith.constant 0 : i32
    return %c0_i32, %c0_i32_0 : i32, i32
  }
  func.func @transform_14(%arg0: i32) -> (i32, i32, i32) {
    %c0_i32 = arith.constant 0 : i32
    %c0_i32_0 = arith.constant 0 : i32
    %c0_i32_1 = arith.constant 0 : i32
    %c0_i32_2 = arith.constant 0 : i32
    return %c0_i32, %c0_i32_0, %c0_i32_1 : i32, i32, i32
  }
  func.func @transform_15(%arg0: i32) -> (i32, i32, i32) {
    %c0_i32 = arith.constant 0 : i32
    %c0_i32_0 = arith.constant 0 : i32
    %c0_i32_1 = arith.constant 0 : i32
    %c0_i32_2 = arith.constant 0 : i32
    return %c0_i32, %c0_i32_0, %c0_i32_1 : i32, i32, i32
  }
  func.func @transform_16(%arg0: i32) -> (i32, i32, i32) {
    %c0_i32 = arith.constant 0 : i32
    %c0_i32_0 = arith.constant 0 : i32
    %c0_i32_1 = arith.constant 0 : i32
    %c0_i32_2 = arith.constant 0 : i32
    return %c0_i32, %c0_i32_0, %c0_i32_1 : i32, i32, i32
  }
  func.func @transform_17(%arg0: i32) -> (i32, i32, i32) {
    %c0_i32 = arith.constant 0 : i32
    %c0_i32_0 = arith.constant 0 : i32
    %c0_i32_1 = arith.constant 0 : i32
    %c0_i32_2 = arith.constant 0 : i32
    return %c0_i32, %c0_i32_0, %c0_i32_1 : i32, i32, i32
  }
  func.func @transform_18(%arg0: i32) -> (i32, i32, i32) {
    %c0_i32 = arith.constant 0 : i32
    %c0_i32_0 = arith.constant 0 : i32
    %c0_i32_1 = arith.constant 0 : i32
    %c0_i32_2 = arith.constant 0 : i32
    return %c0_i32, %c0_i32_0, %c0_i32_1 : i32, i32, i32
  }
  func.func @transform_19(%arg0: i32) -> (i32, i32, i32) {
    %c0_i32 = arith.constant 0 : i32
    %c0_i32_0 = arith.constant 0 : i32
    %c0_i32_1 = arith.constant 0 : i32
    %c0_i32_2 = arith.constant 0 : i32
    return %c0_i32, %c0_i32_0, %c0_i32_1 : i32, i32, i32
  }
  func.func @transform_20(%arg0: i32) -> (i32, i32, i32) {
    %c0_i32 = arith.constant 0 : i32
    %c0_i32_0 = arith.constant 0 : i32
    %c0_i32_1 = arith.constant 0 : i32
    %c0_i32_2 = arith.constant 0 : i32
    return %c0_i32, %c0_i32_0, %c0_i32_1 : i32, i32, i32
  }
  func.func @transform_21(%arg0: i32) -> (i32, i32) {
    %c0_i32 = arith.constant 0 : i32
    %c0_i32_0 = arith.constant 0 : i32
    %c0_i32_1 = arith.constant 0 : i32
    return %c0_i32, %c0_i32_0 : i32, i32
  }
  func.func @transform_22(%arg0: i32) -> (i32, i32) {
    %c0_i32 = arith.constant 0 : i32
    %c0_i32_0 = arith.constant 0 : i32
    %c0_i32_1 = arith.constant 0 : i32
    return %c0_i32, %c0_i32_0 : i32, i32
  }
  func.func @transform_23(%arg0: i32) -> (i32, i32) {
    %c0_i32 = arith.constant 0 : i32
    %c0_i32_0 = arith.constant 0 : i32
    %c0_i32_1 = arith.constant 0 : i32
    return %c0_i32, %c0_i32_0 : i32, i32
  }
  func.func @transform_24(%arg0: i32) -> (i32, i32) {
    %c0_i32 = arith.constant 0 : i32
    %c0_i32_0 = arith.constant 0 : i32
    %c0_i32_1 = arith.constant 0 : i32
    return %c0_i32, %c0_i32_0 : i32, i32
  }
  func.func @transform_25(%arg0: i32) -> (i32, i32) {
    %c0_i32 = arith.constant 0 : i32
    %c0_i32_0 = arith.constant 0 : i32
    %c0_i32_1 = arith.constant 0 : i32
    return %c0_i32, %c0_i32_0 : i32, i32
  }
  func.func @transform_26(%arg0: i32) -> (i32, i32) {
    %c0_i32 = arith.constant 0 : i32
    %c0_i32_0 = arith.constant 0 : i32
    %c0_i32_1 = arith.constant 0 : i32
    return %c0_i32, %c0_i32_0 : i32, i32
  }
  func.func @transform_27(%arg0: i32) -> (i32, i32) {
    %c0_i32 = arith.constant 0 : i32
    %c0_i32_0 = arith.constant 0 : i32
    %c0_i32_1 = arith.constant 0 : i32
    return %c0_i32, %c0_i32_0 : i32, i32
  }
  func.func @transform_28(%arg0: i32) -> (i32, i32) {
    %c0_i32 = arith.constant 0 : i32
    %c0_i32_0 = arith.constant 0 : i32
    %c0_i32_1 = arith.constant 0 : i32
    return %c0_i32, %c0_i32_0 : i32, i32
  }
  func.func @transform_29(%arg0: i32) -> (i32, i32) {
    %c0_i32 = arith.constant 0 : i32
    %c0_i32_0 = arith.constant 0 : i32
    %c0_i32_1 = arith.constant 0 : i32
    return %c0_i32, %c0_i32_0 : i32, i32
  }
  func.func @transform_30(%arg0: i32) -> (i32, i32, i32) {
    %c0_i32 = arith.constant 0 : i32
    %c0_i32_0 = arith.constant 0 : i32
    %c0_i32_1 = arith.constant 0 : i32
    return %arg0, %c0_i32, %c0_i32_0 : i32, i32, i32
  }
}

</mosaic_0001>

<bundles_post_ra>
// kernel: transformer_forward.9
= control target key start
LH: loop header
LB: loop body
LE: loop exit
PB: predicated region body
PF: predicated region fallthrough
CT: control target
= control target key end

     0   :  { %vm28_vm0 = vcmask 261120   ;;  %s239_s0 = inlined_call_operand.vmem [shape: f32[16,32], index: 0, kind: input, shape index: {}]   ;;  %s240_s1 = inlined_call_operand.vmem [shape: f32[32,128], index: 1, kind: input, shape index: {}]   ;;  %s241_s2 = inlined_call_operand.vmem [shape: f32[1,128], index: 2, kind: input, shape index: {}]   ;;  %s242_s3 = inlined_call_operand.hbm [shape: f32[16,128], index: 3, kind: output, shape index: {}]  }
   0x1   :  { %v17_v0 = vld [vmem:[%s240_s1] sm:$0xff]  ;;  %v18_v1 = vld [vmem:[%s240_s1 + $0x8] sm:$0xff]  ;;  %v19_v2 = vld [vmem:[%s240_s1 + $0x10] sm:$0xff] }
   0x2   :  { %v148_v3 = vpack.c.bf16 %v18_v1, %v17_v0  ;;  %v20_v4 = vld [vmem:[%s240_s1 + $0x18] sm:$0xff]  ;;  %v15_v5 = vld [vmem:[%s239_s0] sm:$0xff] }
   0x3   :  { %v152_v6 = vpack.c.bf16 %v20_v4, %v19_v2  ;;  %145 = vmatprep.mubr.msk.f32.mxu0 %vm28_vm0, %v15_v5 }
   0x4   :  { %8 = vsyncpa [#allocation3], 0  ;;  %149 = vmatprep.subr.bf16.mxu0 %v148_v3  ;;  %v16_v7 = vld [vmem:[%s239_s0 + $0x8] sm:$0xff]  ;;  %v128_v8 = vld [vmem:[%s241_s2] ss:$0 sm:$0xff]  ;;  %s183_s1 = smov [#allocation2]  }
   0x5   :  { %151 = vmatpush3.bf16.msra.mxu0 %v148_v3  ;;  %s117_s26 = sshll.u32 %s183_s1, 4  ;;  %s118_s26 = int_to_ptr.vmem [resolvable:$true] %s117_s26 }
   0x6   :  { %153 = vmatprep.subr.bf16.mxu0 %v152_v6  ;;  %s159_s27 = scalar_lea.vmem %s118_s26, 256  ;;  %p164_p1 = scmp.lt.s32.totalorder %s118_s26, %s118_s26 }
   0x7   :  { %p160_p0 = scmp.ne.s32.totalorder %s118_s26, %s159_s27  ;;  %p165_p2 = scmp.lt.s32.totalorder %s159_s27, %s159_s27 }
   0x9   :  { %155 = vmatpush3.bf16.msra.mxu0 %v152_v6  ;;  %p166_p3 = por %p165_p2, %p164_p1 }
   0xb   :  { %p167_p4 = pnand %p166_p3, %p160_p0 }
   0xc   :  { %146 = vmatmul.mubr.msk.f32.vlgmr.msra.gmra.mrb[0].mxu0 %vm28_vm0, %v16_v7 }
  0xdf   :  { %v147_v9 = vpop.f32.mrb[0].mxu0 }
  0xe0   :  { %v107_v10 = vadd.f32 %v147_v9, %v128_v8  ;;  %v101_v11 = vpop.f32.mrb[1].mxu0 }
  0xe1   :  { %v102_v12 = vadd.f32 %v128_v8, %v101_v11 }
  0xe2   :  { %111 = vst [vmem:[#allocation2 + $0x8] sm:$0xff] %v107_v10 }
  0xe3   :  { %110 = vst [vmem:[#allocation2] sm:$0xff] %v102_v12 }
  0xe4   :  { %170 = shalt.err (!%p167_p4)
}
  0xe5   :  { %s171_s2 = scalar_lea.hbm %s242_s3, 256 }
  0xe6   :  { %p172_p5 = scmp.ne.s32.totalorder %s242_s3, %s171_s2  ;;  %p175_p6 = scmp.lt.u32.totalorder %s171_s2, %s242_s3 }
  0xe8   :  { %p177_p7 = pnand %p175_p6, %p172_p5 }
  0xea   :  { %180 = shalt.err (!%p177_p7)
}
  0xeb   :  { %s184_s6 = smov 128   ;;  %s185_s7 = smov 8  }
  0xec   :  { %123 = dma.vmem_to_hbm [thread:$0]  %s118_s26, 256, %s242_s3, [#allocation3], %s184_s6, %s184_s6, %s185_s7  }
  0xed   :  { %181 = dma.done.wait [#allocation3], 256  }
  0xee   :  { %182 = vsyncadd [#allocation3], 4294967040 }
  0xef   :  { %127 = vsyncpa [#allocation3], 1 }

// kernel: transformer_forward.5
= control target key start
LH: loop header
LB: loop body
LE: loop exit
PB: predicated region body
PF: predicated region fallthrough
CT: control target
= control target key end

     0   :  { %s3497_s27 = smov 0   ;;  %s3931_s0 = inlined_call_operand.vmem [shape: f32[2,8,32], index: 0, kind: input, shape index: {}]   ;;  %s3932_s1 = inlined_call_operand.vmem [shape: f32[2,8,8], index: 1, kind: input, shape index: {}]   ;;  %s3933_s2 = inlined_call_operand.vmem [shape: f32[4,32,8], index: 2, kind: input, shape index: {}]   ;;  %s3934_s3 = inlined_call_operand.vmem [shape: f32[4,1,8], index: 3, kind: input, shape index: {}]   ;;  %s3935_s4 = inlined_call_operand.vmem [shape: f32[4,32,8], index: 4, kind: input, shape index: {}]   ;;  %s3936_s5 = inlined_call_operand.vmem [shape: f32[4,1,8], index: 5, kind: input, shape index: {}]   ;;  %s3937_s6 = inlined_call_operand.vmem [shape: f32[4,32,8], index: 6, kind: input, shape index: {}]   ;;  %s3938_s7 = inlined_call_operand.vmem [shape: f32[4,1,8], index: 7, kind: input, shape index: {}]   ;;  %s3939_s8 = inlined_call_operand.vmem [shape: f32[4,8,32], index: 8, kind: input, shape index: {}]   ;;  %s3940_s9 = inlined_call_operand.vmem [shape: f32[1,32], index: 9, kind: input, shape index: {}]   ;;  %s3941_s10 = inlined_call_operand.vmem [shape: f32[1,32], index: 10, kind: input, shape index: {}]   ;;  %s3942_s11 = inlined_call_operand.vmem [shape: f32[1,32], index: 11, kind: input, shape index: {}]   ;;  %s3943_s12 = inlined_call_operand.vmem [shape: f32[32,64], index: 12, kind: input, shape index: {}]   ;;  %s3944_s13 = inlined_call_operand.vmem [shape: f32[1,64], index: 13, kind: input, shape index: {}]   ;;  %s3945_s14 = inlined_call_operand.vmem [shape: f32[64,32], index: 14, kind: input, shape index: {}]   ;;  %s3946_s15 = inlined_call_operand.vmem [shape: f32[1,32], index: 15, kind: input, shape index: {}]   ;;  %s3947_s16 = inlined_call_operand.vmem [shape: f32[1,32], index: 16, kind: input, shape index: {}]   ;;  %s3948_s17 = inlined_call_operand.vmem [shape: f32[1,32], index: 17, kind: input, shape index: {}]   ;;  %s3949_s18 = inlined_call_operand.vmem [shape: f32[2,8,32], index: 18, kind: output, shape index: {}]  }
   0x1   :  { %3951 = sst [smem:[#allocation2_spill]] %s3931_s0 }
   0x2   :  { %3952 = sst [smem:[#allocation3_spill]] %s3932_s1 }
   0x3   :  { %3953 = sst [smem:[#allocation4_spill]] %s3933_s2 }
   0x4 LB: > { %s2843_s28 = sadd.s32 4294967295, %s3397_s27   ;;  %p2847_p0 = scmp.ge.s32.totalorder %s3397_s27, 1  ;;  %s3397_s27 = sphi %s3497_s27, %s28_s27  }
   0x5   : > { %p520_p1 = scmp.lt.s32.totalorder %s3397_s27, 3 }
   0x7   : > { %p521_p2 = pnand %p2847_p0, %p520_p1 }
   0x8   : > { %v675_v0 = vld [vmem:[%s3935_s4] sm:$0xff] (!%p521_p2)  ;;  %v676_v1 = vld [vmem:[%s3935_s4 + $0x8] sm:$0xff] (!%p521_p2)  ;;  %s3954_s21 = sld [smem:[#allocation4_spill]] (!%p521_p2)  ;;  %v3399_v3 = vmov (!%p521_p2), 0.0|0.0   ;;  %v677_v6 = vld [vmem:[%s3935_s4 + $0x10] sm:$0xff] (!%p521_p2)  ;;  %p576_p3 = scmp.lt.s32.totalorder (!%p521_p2), %s2843_s28, 1 }
   0x9   : > { %524 = sbr.rel (%p521_p2) target bundleno = 4943 (0x134f), region = 92  ;;  %3276 = vmatprep.subr.bf16.mxu1 (!%p521_p2), %v3399_v3  ;;  %v3277_v4 = vpack.c.bf16 (!%p521_p2), %v676_v1, %v675_v0  ;;  %3270 = vmatprep.subr.bf16.mxu0 (!%p521_p2), %v3399_v3  ;;  %v678_v7 = vld [vmem:[%s3935_s4 + $0x18] sm:$0xff] (!%p521_p2)  ;;  %vm3400_vm0 = vmmov (!%p521_p2), 0   ;;  %v3401_v11 = vmov (!%p521_p2), 0.0   ;;  %v756_v14 = vld [vmem:[%s3937_s6] sm:$0xff] (!%p521_p2)  ;;  %v757_v15 = vld [vmem:[%s3937_s6 + $0x8] sm:$0xff] (!%p521_p2) }
   0xa   : > { %3067 = vmatprep.mubr.msk.f32.mxu1 (!%p521_p2), %vm3400_vm0, %v3401_v11  ;;  %3056 = vmatprep.mubr.msk.f32.mxu0 (!%p521_p2), %vm3400_vm0, %v3401_v11  ;;  %v3280_v12 = vpack.c.bf16 (!%p521_p2), %v678_v7, %v677_v6  ;;  %s3955_s26 = sld [smem:[#allocation2_spill]] (!%p521_p2)  ;;  %vm601_vm1 = vcmask (!%p521_p2), 261120   ;;  %v3283_v17 = vpack.c.bf16 (!%p521_p2), %v757_v15, %v756_v14  ;;  %v758_v18 = vld [vmem:[%s3937_s6 + $0x10] sm:$0xff] (!%p521_p2)  ;;  %v759_v19 = vld [vmem:[%s3937_s6 + $0x18] sm:$0xff] (!%p521_p2)  ;;  %v2853_v21 = vld [vmem:[%s3936_s5] ss:$0 sm:$0xff] (!%p521_p2) }
   0xb   : > { %3278 = vmatpush3.bf16.msra.mxu1 (!%p521_p2), %v3277_v4  ;;  %v3286_v20 = vpack.c.bf16 (!%p521_p2), %v759_v19, %v758_v18  ;;  %v2851_v22 = vld [vmem:[%s3934_s3] ss:$0 sm:$0xff] (!%p521_p2)  ;;  %vm837_vm2 = vcmask (!%p521_p2), 64512   ;;  %v2868_v52 = vld [vmem:[%s3935_s4 + $0x28] sm:$0xff] (!%p521_p2)  ;;  %v2869_v56 = vld [vmem:[%s3935_s4 + $0x30] sm:$0xff] (!%p521_p2)  ;;  %vm2673_vm3 = vcmask (!%p521_p2), 523264  }
   0xc   : > { %3279 = vmatprep.subr.bf16.mxu1 (!%p521_p2), %v3399_v3  ;;  %v2855_v29 = vld [vmem:[%s3938_s7] ss:$0 sm:$0xff] (!%p521_p2)  ;;  %v2870_v57 = vld [vmem:[%s3935_s4 + $0x38] sm:$0xff] (!%p521_p2)  ;;  %v2872_v63 = vld [vmem:[%s3936_s5 + $0x1] ss:$0 sm:$0xff] (!%p521_p2) }
   0xd   : > { %v2867_v51 = vld [vmem:[%s3935_s4 + $0x20] sm:$0xff] (!%p521_p2)  ;;  %v3298_v58 = vpack.c.bf16 (!%p521_p2), %v2870_v57, %v2869_v56  ;;  %v2875_v7 = vld [vmem:[%s3937_s6 + $0x28] sm:$0xff] (!%p521_p2) }
   0xe   : > { %v590_v2 = vld [vmem:[%s3954_s21] sm:$0xff] (!%p521_p2)  ;;  %v591_v5 = vld [vmem:[%s3954_s21 + $0x8] sm:$0xff] (!%p521_p2)  ;;  %v592_v9 = vld [vmem:[%s3954_s21 + $0x10] sm:$0xff] (!%p521_p2)  ;;  %v3295_v54 = vpack.c.bf16 (!%p521_p2), %v2868_v52, %v2867_v51 }
   0xf   : > { %v3271_v8 = vpack.c.bf16 (!%p521_p2), %v591_v5, %v590_v2  ;;  %v593_v10 = vld [vmem:[%s3954_s21 + $0x18] sm:$0xff] (!%p521_p2)  ;;  %3281 = vmatpush3.bf16.msra.mxu1 (!%p521_p2), %v3280_v12  ;;  %v2860_v44 = vld [vmem:[%s3954_s21 + $0x20] sm:$0xff] (!%p521_p2)  ;;  %v2861_v45 = vld [vmem:[%s3954_s21 + $0x28] sm:$0xff] (!%p521_p2) }
  0x10   : > { %s3958_s28 = smov (!%p576_p3, %s2843_s28), 1  ;;  %v3274_v13 = vpack.c.bf16 %v593_v10, %v592_v9  ;;  %3086 = vmatprep.subr.mxu1 %v3401_v11  ;;  %v3289_v46 = vpack.c.bf16 %v2861_v45, %v2860_v44  ;;  %v2862_v47 = vld [vmem:[%s3954_s21 + $0x30] sm:$0xff]  ;;  %v2863_v48 = vld [vmem:[%s3954_s21 + $0x38] sm:$0xff]  ;;  %v2865_v0 = vld [vmem:[%s3934_s3 + $0x1] ss:$0 sm:$0xff] }
  0x11   : > { %3272 = vmatpush3.bf16.msra.mxu0 %v3271_v8  ;;  %s3537_s1 = sshll.u32 %s3958_s28, 3  ;;  %s3956_s28 = sld [smem:[#allocation3_spill]]  ;;  %v3292_v49 = vpack.c.bf16 %v2863_v48, %v2862_v47  ;;  %v2874_v6 = vld [vmem:[%s3937_s6 + $0x20] sm:$0xff]  ;;  %v2876_v8 = vld [vmem:[%s3937_s6 + $0x30] sm:$0xff]  ;;  %v2877_v10 = vld [vmem:[%s3937_s6 + $0x38] sm:$0xff] }
  0x12   : > { %3273 = vmatprep.subr.bf16.mxu0 %v3399_v3  ;;  %s579_s29 = scalar_lea.vmem %s3955_s26, %s3537_s1  ;;  %v3301_v9 = vpack.c.bf16 %v2875_v7, %v2874_v6  ;;  %v3304_v12 = vpack.c.bf16 %v2877_v10, %v2876_v8  ;;  %v2890_v44 = vld [vmem:[%s3954_s21 + $0x58] sm:$0xff]  ;;  %v2892_v57 = vld [vmem:[%s3934_s3 + $0x2] ss:$0 sm:$0xff]  ;;  %s587_s24 = scalar_lea.vmem %s3949_s18, %s3537_s1 }
  0x13   : > { %v3549_v16 = vld [vmem:[%s579_s29] sm:$0xff] }
  0x14   : > { %3068 = vmatmul.mubr.msk.f32.vlgmr.msra.gmra.mrb[0].mxu1 %vm601_vm1, %v3549_v16 }
  0x15   : > { %3275 = vmatpush3.bf16.msra.mxu0 %v3274_v13  ;;  %3088 = vmatprep.mubr.msk.f32.mxu1 %vm3400_vm0, %v3401_v11 }
  0x16   : > { %3282 = vmatprep.subr.bf16.mxu0 %v3399_v3 }
  0x17   : > { %s583_s30 = scalar_lea.vmem %s3956_s28, %s3537_s1 }
  0x18   : > { %3057 = vmatmul.mubr.msk.f32.vlgmr.msra.gmra.mrb[0].mxu0 %vm601_vm1, %v3549_v16  ;;  %v3592_v34 = vld [vmem:[%s583_s30] sm:$0xff] }
  0x19   : > { %3284 = vmatpush3.bf16.msra.mxu0 %v3283_v17  ;;  %3078 = vmatprep.mubr.msk.f32.mxu0 %vm3400_vm0, %v3401_v11 }
  0x1a   : > { %3285 = vmatprep.subr.bf16.mxu0 %v3399_v3 }
  0x1d   : > { %3287 = vmatpush3.bf16.msra.mxu0 %v3286_v20 }
  0x1e   : > { %3081 = vmatprep.subr.mxu0 %v3401_v11 }
  0x20   : > { %3079 = vmatmul.mubr.msk.f32.vlgmr.msra.gmra.mrb[2].mxu0 %vm601_vm1, %v3549_v16 }
  0x21   : > { %3083 = vmatprep.mubr.msk.f32.mxu0 %vm3400_vm0, %v3401_v11 }
  0xe7   : > { %v752_v23 = vpop.f32.mrb[0].mxu1 }
  0xe8   : > { %v753_v24 = vadd.f32 %v2853_v21, %v752_v23  ;;  %v3069_v25 = vpop.f32.mrb[1].mxu1 }
  0xe9   : > { %v2879_v25 = vld [vmem:[%s3938_s7 + $0x1] ss:$0 sm:$0xff] }
  0xea   : > { %3082 = vmatpush3.xpose.msk.msra.mxu0 %vm837_vm2, %v753_v24 }
  0xeb   : > { %v671_v26 = vpop.f32.mrb[0].mxu0  ;;  %3288 = vmatprep.subr.bf16.mxu0 %v3399_v3 }
  0xec   : > { %v672_v27 = vadd.f32 %v2851_v22, %v671_v26  ;;  %v3058_v28 = vpop.f32.mrb[1].mxu0 }
  0xed   : > { %v2884_v28 = vld [vmem:[%s3939_s8 + $0x8] sm:$0xff] }
  0xee   : > { %3084 = vmatmul.mubr.msk.f32.vlgmr.msra.gmra.mrb[4].mxu0 %vm837_vm2, %v672_v27 }
  0xef   : > { %3099 = vmatprep.mubr.msk.f32.mxu0 %vm3400_vm0, %v3401_v11  ;;  %3290 = vmatpush3.bf16.msra.mxu0 %v3289_v46 }
  0xf0   : > { %3291 = vmatprep.subr.bf16.mxu0 %v3399_v3 }
  0xf3   : > { %v833_v30 = vpop.f32.mrb[2].mxu0  ;;  %3293 = vmatpush3.bf16.msra.mxu0 %v3292_v49 }
  0xf4   : > { %v834_v31 = vadd.f32 %v2855_v29, %v833_v30  ;;  %v3080_v32 = vpop.f32.mrb[3].mxu0  ;;  %3300 = vmatprep.subr.bf16.mxu0 %v3399_v3 }
  0xf5   : > { %v1000_v32 = vld [vmem:[%s3939_s8] sm:$0xff] }
  0xf6   : > { %3087 = vmatpush3.msra.mxu1 %v834_v31  ;;  %3100 = vmatmul.mubr.msk.f32.vlgmr.msra.gmra.mrb[6].mxu0 %vm601_vm1, %v3549_v16 }
  0xf7   : > { %3294 = vmatprep.subr.bf16.mxu1 %v3399_v3  ;;  %3121 = vmatprep.mubr.msk.f32.mxu0 %vm3400_vm0, %v3401_v11 }
  0xf8   : > { %3302 = vmatpush3.bf16.msra.mxu0 %v3301_v9 }
  0xf9   : > { %3303 = vmatprep.subr.bf16.mxu0 %v3399_v3 }
  0xfc   : > { %3305 = vmatpush3.bf16.msra.mxu0 %v3304_v12 }
  0xfd   : > { %3134 = vmatprep.subr.mxu0 %v3401_v11 }
  0xff   : > { %3122 = vmatmul.mubr.msk.f32.vlgmr.msra.gmra.mrb[8].mxu0 %vm601_vm1, %v3549_v16 }
 0x100   : > { %3136 = vmatprep.mubr.msk.f32.mxu0 %vm3400_vm0, %v3401_v11  ;;  %3135 = vmatpush3.msra.mxu0 %v2884_v28  ;;  %v2916_v28 = vld [vmem:[%s3954_s21 + $0x78] sm:$0xff] }
 0x101   : > { %3306 = vmatprep.subr.bf16.mxu0 %v3399_v3 }
 0x1c1   : > { %v910_v33 = vpop.f32.mrb[4].mxu0 }
 0x1c2   : > { %v914_v35 = vmul.f32 0.35355338, %v910_v33  ;;  %v3085_v36 = vpop.f32.mrb[5].mxu0  ;;  %v2894_v33 = vld [vmem:[%s3935_s4 + $0x40] sm:$0xff] }
 0x1c4   : > { %v915_v37 = vadd.f32 %v914_v35, %v3592_v34  ;;  %v2895_v35 = vld [vmem:[%s3935_s4 + $0x48] sm:$0xff] }
 0x1c5   : > { %v3313_v36 = vpack.c.bf16 %v2895_v35, %v2894_v33  ;;  %v2922_v33 = vld [vmem:[%s3935_s4 + $0x70] sm:$0xff]  ;;  %v2923_v35 = vld [vmem:[%s3935_s4 + $0x78] sm:$0xff] }
 0x1c6   : > { %v916_v38 = vsel %vm837_vm2, %v915_v37, -inf }
 0x1c7   : > { %917 = vmax.xlane.f32.xlu0 %v916_v38  ;;  %v2897_v38 = vld [vmem:[%s3935_s4 + $0x58] sm:$0xff] }
 0x1c9   : > { %v1080_v59 = vpop.f32.mrb[6].mxu0 }
 0x1ca   : > { %v3101_v60 = vpop.f32.mrb[7].mxu0  ;;  %v1081_v5 = vadd.f32 %v2865_v0, %v1080_v59 }
 0x1d2   : > { %v1246_v24 = vpop.f32.mrb[8].mxu0 }
 0x1d3   : > { %v3123_v26 = vpop.f32.mrb[9].mxu0  ;;  %v1247_v27 = vadd.f32 %v2879_v25, %v1246_v24  ;;  %v2913_v24 = vld [vmem:[%s3954_s21 + $0x60] sm:$0xff]  ;;  %v2914_v25 = vld [vmem:[%s3954_s21 + $0x68] sm:$0xff] }
 0x1d4   : > { %v3325_v26 = vpack.c.bf16 %v2914_v25, %v2913_v24 }
 0x254   : > { %v918_v39 = vpop.xlane.xlu0 %917 }
 0x255   : > { %v919_v40 = vsub.f32 %v915_v37, %v918_v39  ;;  %v2896_v37 = vld [vmem:[%s3935_s4 + $0x50] sm:$0xff] }
 0x256   : > { %v3316_v39 = vpack.c.bf16 %v2897_v38, %v2896_v37  ;;  %v3334_v38 = vpack.c.bf16 %v2923_v35, %v2922_v33  ;;  %v2581_v35 = vld [vmem:[%s3945_s14 + $0x18] sm:$0xff] }
 0x257   : > { %v920_v41 = vmul.f32 1.442695, %v919_v40  ;;  %v2887_v40 = vld [vmem:[%s3954_s21 + $0x40] sm:$0xff] }
 0x259   : > { %3371 = vpow2.f32 %v920_v41  ;;  %v2888_v41 = vld [vmem:[%s3954_s21 + $0x48] sm:$0xff] }
 0x263   : > { %v3372_v42 = vpop.eup %3371 }
 0x264   : > { %v922_v43 = vsel %vm837_vm2, %v3372_v42, 0.0 }
 0x265   : > { %923 = vadd.xlane.f32.xlu0 %v922_v43  ;;  %v2889_v43 = vld [vmem:[%s3954_s21 + $0x50] sm:$0xff] }
 0x266   : > { %v3310_v47 = vpack.c.bf16 %v2890_v44, %v2889_v43  ;;  %v2925_v44 = vld [vmem:[%s3936_s5 + $0x3] ss:$0 sm:$0xff] }
 0x2f2   : > { %v924_v50 = vpop.xlane.xlu0 %923 }
 0x2f3   : > { %3373 = vrcp.f32 %v924_v50  ;;  %v2899_v50 = vld [vmem:[%s3936_s5 + $0x2] ss:$0 sm:$0xff] }
 0x2fd   : > { %v3374_v53 = vpop.eup %3373 }
 0x2fe   : > { %v926_v55 = vmul.f32 %v3374_v53, %v3372_v42  ;;  %v3307_v42 = vpack.c.bf16 %v2888_v41, %v2887_v40 }
 0x300   : > { %3089 = vmatmul.mubr.msk.f32.vlgmr.msra.gmra.mrb[2].mxu1 %vm837_vm2, %v926_v55 }
 0x301   : > { %3296 = vmatpush3.bf16.msra.mxu1 %v3295_v54  ;;  %3110 = vmatprep.mubr.msk.f32.mxu1 %vm3400_vm0, %v3401_v11 }
 0x302   : > { %3297 = vmatprep.subr.bf16.mxu1 %v3399_v3 }
 0x305   : > { %3299 = vmatpush3.bf16.msra.mxu1 %v3298_v58 }
 0x306   : > { %3124 = vmatprep.subr.mxu1 %v3401_v11 }
 0x308   : > { %3111 = vmatmul.mubr.msk.f32.vlgmr.msra.gmra.mrb[4].mxu1 %vm601_vm1, %v3549_v16 }
 0x309   : > { %3126 = vmatprep.mubr.msk.f32.mxu1 %vm3400_vm0, %v3401_v11 }
 0x3d3   : > { %v996_v61 = vpop.f32.mrb[2].mxu1 }
 0x3d4   : > { %v3090_v62 = vpop.f32.mrb[3].mxu1 }
 0x3d5   : > { %v2902_v62 = vld [vmem:[%s3937_s6 + $0x48] sm:$0xff] }
 0x3db   : > { %v1163_v1 = vpop.f32.mrb[4].mxu1 }
 0x3dc   : > { %v1164_v2 = vadd.f32 %v2872_v63, %v1163_v1  ;;  %v3112_v4 = vpop.f32.mrb[5].mxu1  ;;  %v2903_v63 = vld [vmem:[%s3937_s6 + $0x50] sm:$0xff]  ;;  %v2904_v1 = vld [vmem:[%s3937_s6 + $0x58] sm:$0xff] }
 0x3de   : > { %3125 = vmatpush3.xpose.msk.msra.mxu1 %vm837_vm2, %v1164_v2  ;;  %v3322_v2 = vpack.c.bf16 %v2904_v1, %v2903_v63 }
 0x3df   : > { %3129 = vmatprep.subr.mxu1 %v3401_v11 }
 0x3e1   : > { %3127 = vmatmul.mubr.msk.f32.vlgmr.msra.gmra.mrb[6].mxu1 %vm837_vm2, %v1081_v5 }
 0x3e2   : > { %3131 = vmatprep.mubr.msk.f32.mxu1 %vm3400_vm0, %v3401_v11  ;;  %3130 = vmatpush3.msra.mxu1 %v1247_v27  ;;  %v2915_v27 = vld [vmem:[%s3954_s21 + $0x70] sm:$0xff] }
 0x3e3   : > { %3139 = vmatprep.subr.mxu1 %v3401_v11 }
 0x4b4   : > { %v1322_v13 = vpop.f32.mrb[6].mxu1 }
 0x4b5   : > { %v1326_v14 = vmul.f32 0.35355338, %v1322_v13  ;;  %v3128_v15 = vpop.f32.mrb[7].mxu1 }
 0x4b7   : > { %v1327_v17 = vadd.f32 %v1326_v14, %v3592_v34 }
 0x4b9   : > { %v1328_v18 = vsel %vm837_vm2, %v1327_v17, -inf }
 0x4ba   : > { %1329 = vmax.xlane.f32.xlu1 %v1328_v18 }
 0x547   : > { %v1330_v19 = vpop.xlane.xlu1 %1329 }
 0x548   : > { %v1331_v20 = vsub.f32 %v1327_v17, %v1330_v19  ;;  %v2906_v17 = vld [vmem:[%s3938_s7 + $0x2] ss:$0 sm:$0xff] }
 0x54a   : > { %v1332_v21 = vmul.f32 1.442695, %v1331_v20  ;;  %v2911_v20 = vld [vmem:[%s3939_s8 + $0x10] sm:$0xff] }
 0x54c   : > { %3375 = vpow2.f32 %v1332_v21 }
 0x556   : > { %v3376_v22 = vpop.eup %3375 }
 0x557   : > { %v1334_v23 = vsel %vm837_vm2, %v3376_v22, 0.0 }
 0x558   : > { %1335 = vadd.xlane.f32.xlu1 %v1334_v23 }
 0x5e5   : > { %v1336_v29 = vpop.xlane.xlu1 %1335 }
 0x5e6   : > { %3377 = vrcp.f32 %v1336_v29  ;;  %v3328_v29 = vpack.c.bf16 %v2916_v28, %v2915_v27  ;;  %v2576_v28 = vld [vmem:[%s3943_s12 + $0x18] sm:$0xff] }
 0x5f0   : > { %v3378_v30 = vpop.eup %3377 }
 0x5f1   : > { %v1338_v31 = vmul.f32 %v3378_v30, %v3376_v22  ;;  %v2920_v30 = vld [vmem:[%s3935_s4 + $0x60] sm:$0xff] }
 0x5f3   : > { %3132 = vmatmul.mubr.msk.f32.vlgmr.msra.gmra.mrb[8].mxu1 %vm837_vm2, %v1338_v31  ;;  %v2921_v31 = vld [vmem:[%s3935_s4 + $0x68] sm:$0xff] }
 0x5f4   : > { %3140 = vmatpush3.msra.mxu1 %v1000_v32  ;;  %3141 = vmatprep.mubr.msk.f32.mxu1 %vm3400_vm0, %v3401_v11  ;;  %v3331_v32 = vpack.c.bf16 %v2921_v31, %v2920_v30  ;;  %v2578_v30 = vld [vmem:[%s3945_s14] sm:$0xff]  ;;  %v2579_v31 = vld [vmem:[%s3945_s14 + $0x8] sm:$0xff] }
 0x5f5   : > { %3312 = vmatprep.subr.bf16.mxu1 %v3399_v3  ;;  %v3349_v33 = vpack.c.bf16 %v2579_v31, %v2578_v30 }
 0x5f7   : > { %3142 = vmatmul.mubr.msk.f32.vlgmr.msra.gmra.mrb[10].mxu1 %vm837_vm2, %v996_v61  ;;  %v2901_v61 = vld [vmem:[%s3937_s6 + $0x40] sm:$0xff] }
 0x5f8   : > { %3314 = vmatpush3.bf16.msra.mxu1 %v3313_v36  ;;  %3163 = vmatprep.mubr.msk.f32.mxu1 %vm3400_vm0, %v3401_v11  ;;  %v3319_v0 = vpack.c.bf16 %v2902_v62, %v2901_v61 }
 0x5f9   : > { %3315 = vmatprep.subr.bf16.mxu1 %v3399_v3 }
 0x5fc   : > { %3317 = vmatpush3.bf16.msra.mxu1 %v3316_v39 }
 0x5fd   : > { %3177 = vmatprep.subr.mxu1 %v3401_v11 }
 0x5ff   : > { %3164 = vmatmul.mubr.msk.f32.vlgmr.msra.gmra.mrb[12].mxu1 %vm601_vm1, %v3549_v16 }
 0x600   : > { %3179 = vmatprep.mubr.msk.f32.mxu1 %vm3400_vm0, %v3401_v11 }
 0x6c6   : > { %v1408_v45 = vpop.f32.mrb[8].mxu1 }
 0x6c7   : > { %v3133_v46 = vpop.f32.mrb[9].mxu1  ;;  %3137 = vmatmul.mubr.msk.f32.vlgmr.msra.gmra.mrb[10].mxu0 %vm837_vm2, %v1408_v45  ;;  %v2918_v45 = vld [vmem:[%s3934_s3 + $0x3] ss:$0 sm:$0xff] }
 0x6c8   : > { %3308 = vmatpush3.bf16.msra.mxu0 %v3307_v42  ;;  %3152 = vmatprep.mubr.msk.f32.mxu0 %vm3400_vm0, %v3401_v11 }
 0x6c9   : > { %3309 = vmatprep.subr.bf16.mxu0 %v3399_v3 }
 0x6ca   : > { %v1556_v48 = vpop.f32.mrb[10].mxu1 }
 0x6cb   : > { %v3143_v49 = vpop.f32.mrb[11].mxu1 }
 0x6cc   : > { %3311 = vmatpush3.bf16.msra.mxu0 %v3310_v47 }
 0x6cd   : > { %3318 = vmatprep.subr.bf16.mxu0 %v3399_v3 }
 0x6cf   : > { %3153 = vmatmul.mubr.msk.f32.vlgmr.msra.gmra.mrb[12].mxu0 %vm601_vm1, %v3549_v16 }
 0x6d0   : > { %3174 = vmatprep.mubr.msk.f32.mxu0 %vm3400_vm0, %v3401_v11  ;;  %3320 = vmatpush3.bf16.msra.mxu0 %v3319_v0 }
 0x6d1   : > { %3321 = vmatprep.subr.bf16.mxu0 %v3399_v3 }
 0x6d2   : > { %v1722_v51 = vpop.f32.mrb[12].mxu1 }
 0x6d3   : > { %v1723_v52 = vadd.f32 %v2899_v50, %v1722_v51  ;;  %v3165_v53 = vpop.f32.mrb[13].mxu1  ;;  %v2927_v50 = vld [vmem:[%s3937_s6 + $0x60] sm:$0xff]  ;;  %v2928_v51 = vld [vmem:[%s3937_s6 + $0x68] sm:$0xff] }
 0x6d4   : > { %3323 = vmatpush3.bf16.msra.mxu0 %v3322_v2  ;;  %v3337_v53 = vpack.c.bf16 %v2928_v51, %v2927_v50  ;;  %v2942_v51 = vld [vmem:[%s3944_s13] ss:$0 sm:$0xff] }
 0x6d5   : > { %3178 = vmatpush3.xpose.msk.msra.mxu1 %vm837_vm2, %v1723_v52  ;;  %3187 = vmatprep.subr.mxu0 %v3401_v11  ;;  %v2929_v52 = vld [vmem:[%s3937_s6 + $0x70] sm:$0xff] }
 0x6d6   : > { %3182 = vmatprep.subr.mxu1 %v3401_v11 }
 0x6d7   : > { %3175 = vmatmul.mubr.msk.f32.vlgmr.msra.gmra.mrb[14].mxu0 %vm601_vm1, %v3549_v16 }
 0x6d8   : > { %3189 = vmatprep.mubr.msk.f32.mxu0 %vm3400_vm0, %v3401_v11  ;;  %3188 = vmatpush3.msra.mxu0 %v2911_v20 }
 0x6d9   : > { %3330 = vmatprep.subr.bf16.mxu0 %v3399_v3 }
 0x79a   : > { %v1483_v54 = vpop.f32.mrb[10].mxu0 }
 0x79b   : > { %v3730_v55 = vadd.f32 %v1556_v48, %v1483_v54  ;;  %v3138_v56 = vpop.f32.mrb[11].mxu0  ;;  %v2930_v54 = vld [vmem:[%s3937_s6 + $0x78] sm:$0xff] }
 0x7a2   : > { %v1639_v58 = vpop.f32.mrb[12].mxu0 }
 0x7a3   : > { %v1640_v59 = vadd.f32 %v2892_v57, %v1639_v58  ;;  %v3154_v60 = vpop.f32.mrb[13].mxu0 }
 0x7a5   : > { %3180 = vmatmul.mubr.msk.f32.vlgmr.msra.gmra.mrb[14].mxu1 %vm837_vm2, %v1640_v59 }
 0x7a6   : > { %3184 = vmatprep.mubr.msk.f32.mxu1 %vm3400_vm0, %v3401_v11 }
 0x7aa   : > { %v1805_v15 = vpop.f32.mrb[14].mxu0 }
 0x7ab   : > { %v3176_v18 = vpop.f32.mrb[15].mxu0  ;;  %v1806_v19 = vadd.f32 %v2906_v17, %v1805_v15 }
 0x7ad   : > { %3183 = vmatpush3.msra.mxu1 %v1806_v19 }
 0x7ae   : > { %3324 = vmatprep.subr.bf16.mxu1 %v3399_v3 }
 0x878   : > { %v1881_v4 = vpop.f32.mrb[14].mxu1 }
 0x879   : > { %v1885_v5 = vmul.f32 0.35355338, %v1881_v4  ;;  %v3181_v6 = vpop.f32.mrb[15].mxu1  ;;  %v2932_v4 = vld [vmem:[%s3938_s7 + $0x3] ss:$0 sm:$0xff] }
 0x87b   : > { %v1886_v7 = vadd.f32 %v1885_v5, %v3592_v34 }
 0x87d   : > { %v1887_v8 = vsel %vm837_vm2, %v1886_v7, -inf }
 0x87e   : > { %1888 = vmax.xlane.f32.xlu0 %v1887_v8 }
 0x90b   : > { %v1889_v9 = vpop.xlane.xlu0 %1888 }
 0x90c   : > { %v1890_v10 = vsub.f32 %v1886_v7, %v1889_v9 }
 0x90e   : > { %v1891_v12 = vmul.f32 1.442695, %v1890_v10 }
 0x910   : > { %3379 = vpow2.f32 %v1891_v12 }
 0x91a   : > { %v3380_v13 = vpop.eup %3379 }
 0x91b   : > { %v1893_v14 = vsel %vm837_vm2, %v3380_v13, 0.0 }
 0x91c   : > { %1894 = vadd.xlane.f32.xlu1 %v1893_v14  ;;  %v2939_v14 = vld [vmem:[%s3940_s9] ss:$0 sm:$0xff] }
 0x9a9   : > { %v1895_v21 = vpop.xlane.xlu1 %1894 }
 0x9aa   : > { %3381 = vrcp.f32 %v1895_v21 }
 0x9b4   : > { %v3382_v22 = vpop.eup %3381 }
 0x9b5   : > { %v1897_v23 = vmul.f32 %v3382_v22, %v3380_v13 }
 0x9b7   : > { %3185 = vmatmul.mubr.msk.f32.vlgmr.msra.gmra.mrb[16].mxu1 %vm837_vm2, %v1897_v23 }
 0x9b8   : > { %3200 = vmatprep.mubr.msk.f32.mxu1 %vm3400_vm0, %v3401_v11  ;;  %3326 = vmatpush3.bf16.msra.mxu1 %v3325_v26  ;;  %v2574_v26 = vld [vmem:[%s3943_s12 + $0x8] sm:$0xff] }
 0x9b9   : > { %3327 = vmatprep.subr.bf16.mxu1 %v3399_v3 }
 0x9bc   : > { %3329 = vmatpush3.bf16.msra.mxu1 %v3328_v29 }
 0x9bd   : > { %3336 = vmatprep.subr.bf16.mxu1 %v3399_v3 }
 0x9bf   : > { %3201 = vmatmul.mubr.msk.f32.vlgmr.msra.gmra.mrb[18].mxu1 %vm601_vm1, %v3549_v16 }
 0x9c0   : > { %3222 = vmatprep.mubr.msk.f32.mxu1 %vm3400_vm0, %v3401_v11  ;;  %3338 = vmatpush3.bf16.msra.mxu1 %v3337_v53 }
 0x9c1   : > { %3339 = vmatprep.subr.bf16.mxu1 %v3399_v3 }
 0xa8a   : > { %v1967_v36 = vpop.f32.mrb[16].mxu1 }
 0xa8b   : > { %v3186_v37 = vpop.f32.mrb[17].mxu1  ;;  %3190 = vmatmul.mubr.msk.f32.vlgmr.msra.gmra.mrb[16].mxu0 %vm837_vm2, %v1967_v36 }
 0xa8c   : > { %3332 = vmatpush3.bf16.msra.mxu0 %v3331_v32  ;;  %3211 = vmatprep.mubr.msk.f32.mxu0 %vm3400_vm0, %v3401_v11  ;;  %v2580_v32 = vld [vmem:[%s3945_s14 + $0x10] sm:$0xff]  ;;  %v2582_v37 = vld [vmem:[%s3945_s14 + $0x20] sm:$0xff] }
 0xa8d   : > { %3333 = vmatprep.subr.bf16.mxu0 %v3399_v3  ;;  %v3352_v36 = vpack.c.bf16 %v2581_v35, %v2580_v32 }
 0xa90   : > { %3335 = vmatpush3.bf16.msra.mxu0 %v3334_v38  ;;  %v2583_v38 = vld [vmem:[%s3945_s14 + $0x28] sm:$0xff] }
 0xa91   : > { %3225 = vmatprep.subr.mxu0 %v3401_v11 }
 0xa92   : > { %v2126_v39 = vpop.f32.mrb[18].mxu1 }
 0xa93   : > { %3212 = vmatmul.mubr.msk.f32.vlgmr.msra.gmra.mrb[18].mxu0 %vm601_vm1, %v3549_v16  ;;  %v3202_v40 = vpop.f32.mrb[19].mxu1  ;;  %v2127_v49 = vadd.f32 %v2918_v45, %v2126_v39  ;;  %v3355_v39 = vpack.c.bf16 %v2583_v38, %v2582_v37 }
 0xa94   : > { %3227 = vmatprep.mubr.msk.f32.mxu0 %vm3400_vm0, %v3401_v11 }
 0xb5e   : > { %v2042_v41 = vpop.f32.mrb[16].mxu0 }
 0xb5f   : > { %v2046_v42 = vadd.f32 %v2042_v41, %v3730_v55  ;;  %v3191_v43 = vpop.f32.mrb[17].mxu0  ;;  %v3340_v55 = vpack.c.bf16 %v2930_v54, %v2929_v52 }
 0xb61   : > { %3341 = vmatpush3.bf16.msra.mxu1 %v3340_v55 }
 0xb62   : > { %3235 = vmatprep.subr.mxu1 %v3401_v11 }
 0xb64   : > { %3223 = vmatmul.mubr.msk.f32.vlgmr.msra.gmra.mrb[20].mxu1 %vm601_vm1, %v3549_v16 }
 0xb65   : > { %3237 = vmatprep.mubr.msk.f32.mxu1 %vm3400_vm0, %v3401_v11 }
 0xb66   : > { %v2209_v46 = vpop.f32.mrb[18].mxu0 }
 0xb67   : > { %v2210_v47 = vadd.f32 %v2925_v44, %v2209_v46  ;;  %v3213_v48 = vpop.f32.mrb[19].mxu0  ;;  %v2940_v44 = vld [vmem:[%s3941_s10] ss:$0 sm:$0xff] }
 0xb68   : > { %v2941_v46 = vld [vmem:[%s3942_s11] ss:$0 sm:$0xff] }
 0xb69   : > { %3226 = vmatpush3.xpose.msk.msra.mxu0 %vm837_vm2, %v2210_v47 }
 0xb6a   : > { %3230 = vmatprep.subr.mxu0 %v3401_v11 }
 0xb6c   : > { %3228 = vmatmul.mubr.msk.f32.vlgmr.msra.gmra.mrb[20].mxu0 %vm837_vm2, %v2127_v49  ;;  %v2585_v49 = vld [vmem:[%s3945_s14 + $0x38] sm:$0xff] }
 0xb6d   : > { %3232 = vmatprep.mubr.msk.f32.mxu0 %vm3400_vm0, %v3401_v11 }
 0xc37   : > { %v2292_v2 = vpop.f32.mrb[20].mxu1 }
 0xc38   : > { %v3224_v5 = vpop.f32.mrb[21].mxu1  ;;  %v2293_v6 = vadd.f32 %v2932_v4, %v2292_v2 }
 0xc3a   : > { %3231 = vmatpush3.msra.mxu0 %v2293_v6 }
 0xc3b   : > { %3342 = vmatprep.subr.bf16.mxu0 %v3399_v3 }
 0xc3f   : > { %v2368_v56 = vpop.f32.mrb[20].mxu0 }
 0xc40   : > { %v2372_v57 = vmul.f32 0.35355338, %v2368_v56  ;;  %v3229_v58 = vpop.f32.mrb[21].mxu0  ;;  %v2944_v56 = vld [vmem:[%s3946_s15] ss:$0 sm:$0xff] }
 0xc42   : > { %v2373_v59 = vadd.f32 %v2372_v57, %v3592_v34  ;;  %v2937_v34 = vld [vmem:[%s3939_s8 + $0x18] sm:$0xff] }
 0xc43   : > { %3236 = vmatpush3.msra.mxu1 %v2937_v34 }
 0xc44   : > { %v2374_v60 = vsel %vm837_vm2, %v2373_v59, -inf  ;;  %3348 = vmatprep.subr.bf16.mxu1 %v3399_v3 }
 0xc45   : > { %2375 = vmax.xlane.f32.xlu0 %v2374_v60 }
 0xcd2   : > { %v2376_v61 = vpop.xlane.xlu0 %2375 }
 0xcd3   : > { %v2377_v62 = vsub.f32 %v2373_v59, %v2376_v61 }
 0xcd5   : > { %v2378_v63 = vmul.f32 1.442695, %v2377_v62 }
 0xcd7   : > { %3383 = vpow2.f32 %v2378_v63 }
 0xce1   : > { %v3384_v0 = vpop.eup %3383 }
 0xce2   : > { %v2380_v1 = vsel %vm837_vm2, %v3384_v0, 0.0 }
 0xce3   : > { %2381 = vadd.xlane.f32.xlu1 %v2380_v1 }
 0xd70   : > { %v2382_v7 = vpop.xlane.xlu1 %2381 }
 0xd71   : > { %3385 = vrcp.f32 %v2382_v7  ;;  %v2946_v7 = vld [vmem:[%s3947_s16] ss:$0 sm:$0xff] }
 0xd7b   : > { %v3386_v8 = vpop.eup %3385 }
 0xd7c   : > { %v2384_v9 = vmul.f32 %v3386_v8, %v3384_v0 }
 0xd7e   : > { %3233 = vmatmul.mubr.msk.f32.vlgmr.msra.gmra.mrb[22].mxu0 %vm837_vm2, %v2384_v9  ;;  %v2947_v9 = vld [vmem:[%s3948_s17] ss:$0 sm:$0xff] }
 0xd7f   : > { %3248 = vmatprep.mubr.msk.f32.mxu0 %vm3400_vm0, %v3401_v11 }
 0xe51   : > { %v2454_v10 = vpop.f32.mrb[22].mxu0 }
 0xe52   : > { %v3234_v12 = vpop.f32.mrb[23].mxu0  ;;  %3238 = vmatmul.mubr.msk.f32.vlgmr.msra.gmra.mrb[22].mxu1 %vm837_vm2, %v2454_v10 }
 0xe53   : > { %3267 = vmatprep.mubr.msk.f32.mxu1 %vm3400_vm0, %v3401_v11  ;;  %v2573_v11 = vld [vmem:[%s3943_s12] sm:$0xff]  ;;  %3350 = vmatpush3.bf16.msra.mxu1 %v3349_v33 }
 0xe54   : > { %v3343_v27 = vpack.c.bf16 %v2574_v26, %v2573_v11  ;;  %3351 = vmatprep.subr.bf16.mxu1 %v3399_v3 }
 0xe56   : > { %3344 = vmatpush3.bf16.msra.mxu0 %v3343_v27 }
 0xe57   : > { %3345 = vmatprep.subr.bf16.mxu0 %v3399_v3  ;;  %3353 = vmatpush3.bf16.msra.mxu1 %v3352_v36 }
 0xe58   : > { %3354 = vmatprep.subr.bf16.mxu1 %v3399_v3 }
 0xe5b   : > { %3356 = vmatpush3.bf16.msra.mxu1 %v3355_v39 }
 0xe5c   : > { %3357 = vmatprep.subr.bf16.mxu1 %v3399_v3  ;;  %v2584_v3 = vld [vmem:[%s3945_s14 + $0x30] sm:$0xff] }
 0xe5d   : > { %v3358_v50 = vpack.c.bf16 %v2585_v49, %v2584_v3 }
 0xe5f   : > { %3359 = vmatpush3.bf16.msra.mxu1 %v3358_v50 }
 0xf25   : > { %v2529_v13 = vpop.f32.mrb[22].mxu1 }
 0xf26   : > { %v2533_v15 = vadd.f32 %v2529_v13, %v2046_v42  ;;  %v3239_v17 = vpop.f32.mrb[23].mxu1 }
 0xf28   : > { %v2541_v18 = vadd.f32 %v2939_v14, %v2533_v15 }
 0xf2a   : > { %v2542_v19 = vadd.f32 %v2541_v18, %v3549_v16  ;;  %v2575_v16 = vld [vmem:[%s3943_s12 + $0x10] sm:$0xff] }
 0xf2b   : > { %v3346_v29 = vpack.c.bf16 %v2576_v28, %v2575_v16 }
 0xf2c   : > { %v2545_v20 = vsel %vm601_vm1, %v2542_v19, 0.0 }
 0xf2d   : > { %2546 = vadd.xlane.f32.xlu0 %v2545_v20  ;;  %3347 = vmatpush3.bf16.msra.mxu0 %v3346_v29 }
 0xfba   : > { %v2547_v21 = vpop.xlane.xlu0 %2546 }
 0xfbb   : > { %v2549_v22 = vmul.f32 0.03125, %v2547_v21 }
 0xfbd   : > { %v2550_v23 = vsub.f32 %v2542_v19, %v2549_v22 }
 0xfbf   : > { %v2551_v24 = vmul.f32 %v2550_v23, %v2550_v23 }
 0xfc1   : > { %v2552_v25 = vsel %vm601_vm1, %v2551_v24, 0.0 }
 0xfc2   : > { %2553 = vadd.xlane.f32.xlu1 %v2552_v25 }
0x104f   : > { %v2554_v40 = vpop.xlane.xlu1 %2553 }
0x1050   : > { %v2555_v41 = vmul.f32 0.03125, %v2554_v40 }
0x1052   : > { %v2556_v42 = vadd.f32 1e-05, %v2555_v41 }
0x1054   : > { %3387 = vrsqrt.f32 %v2556_v42 }
0x105e   : > { %v3388_v43 = vpop.eup %3387 }
0x105f   : > { %v2558_v45 = vmul.f32 %v3388_v43, %v2550_v23 }
0x1061   : > { %v2565_v47 = vmul.f32 %v2940_v44, %v2558_v45 }
0x1063   : > { %v2572_v48 = vadd.f32 %v2941_v46, %v2565_v47 }
0x1065   : > { %3249 = vmatmul.mubr.msk.f32.vlgmr.msra.gmra.mrb[24].mxu0 %vm601_vm1, %v2572_v48 }
0x1138   : > { %v2662_v52 = vpop.f32.mrb[24].mxu0 }
0x1139   : > { %v2663_v53 = vadd.f32 %v2942_v51, %v2662_v52  ;;  %v3250_v54 = vpop.f32.mrb[25].mxu0 }
0x113b   : > { %v2666_v55 = vmax.f32 %v2663_v53, 0.0 }
0x113d   : > { %3268 = vmatmul.mubr.msk.f32.vlgmr.msra.gmra.mrb[24].mxu1 %vm2673_vm3, %v2666_v55 }
0x1210   : > { %v2743_v57 = vpop.f32.mrb[24].mxu1 }
0x1211   : > { %v2744_v58 = vadd.f32 %v2944_v56, %v2743_v57  ;;  %v3269_v59 = vpop.f32.mrb[25].mxu1 }
0x1213   : > { %v2747_v60 = vadd.f32 %v2744_v58, %v2572_v48 }
0x1215   : > { %v2750_v61 = vsel %vm601_vm1, %v2747_v60, 0.0 }
0x1216   : > { %2751 = vadd.xlane.f32.xlu0 %v2750_v61 }
0x12a3   : > { %v2752_v62 = vpop.xlane.xlu0 %2751 }
0x12a4   : > { %v2753_v63 = vmul.f32 0.03125, %v2752_v62 }
0x12a6   : > { %v2754_v0 = vsub.f32 %v2747_v60, %v2753_v63 }
0x12a8   : > { %v2755_v1 = vmul.f32 %v2754_v0, %v2754_v0 }
0x12aa   : > { %v2756_v2 = vsel %vm601_vm1, %v2755_v1, 0.0 }
0x12ab   : > { %2757 = vadd.xlane.f32.xlu1 %v2756_v2 }
0x1338   : > { %v2758_v4 = vpop.xlane.xlu1 %2757 }
0x1339   : > { %v2759_v5 = vmul.f32 0.03125, %v2758_v4 }
0x133b   : > { %v2760_v6 = vadd.f32 1e-05, %v2759_v5 }
0x133d   : > { %3389 = vrsqrt.f32 %v2760_v6 }
0x1347   : > { %v3390_v34 = vpop.eup %3389 }
0x1348   : > { %v2762_v8 = vmul.f32 %v3390_v34, %v2754_v0 }
0x134a   : > { %v2769_v10 = vmul.f32 %v2946_v7, %v2762_v8 }
0x134c   : > { %v2776_v12 = vadd.f32 %v2947_v9, %v2769_v10 }
0x134e   : > { %2777 = vst.msk [vmem:[%s587_s24] sm:$0xff] %vm601_vm1, %v2776_v12 }
0x134f PF: > { %s28_s27 = sadd.s32 1, %s3397_s27  }
0x1350   : > { %p25_p4 = scmp.ge.s32.totalorder %s28_s27, 4  }
0x1352   :  { %27 = sbr.rel (!%p25_p4) target bundleno = 4 (0x4), region = 146 }

// kernel: transformer_forward.7
= control target key start
LH: loop header
LB: loop body
LE: loop exit
PB: predicated region body
PF: predicated region fallthrough
CT: control target
= control target key end

     0   :  { %s6316_s6 = smov 1   ;;  %s6317_s10 = smov 2   ;;  %s6990_s0 = inlined_call_operand.smem [shape: u32[31], index: -1, kind: input, shape index: {}] }
   0x1   :  { %s6357_s5 = sld [smem:[%s6990_s0]]   ;;  %s6318_s14 = smov 3  }
   0x2   :  { %s6362_s9 = sld [smem:[%s6990_s0 + %s6316_s6]]   ;;  %s6319_s18 = smov 4  }
   0x3   :  { %s6367_s13 = sld [smem:[%s6990_s0 + %s6317_s10]]   ;;  %s6320_s22 = smov 5  }
   0x4   :  { %s6372_s17 = sld [smem:[%s6990_s0 + %s6318_s14]]   ;;  %s6321_s26 = smov 6  }
   0x5   :  { %s6377_s21 = sld [smem:[%s6990_s0 + %s6319_s18]]   ;;  %s6322_s30 = smov 7  }
   0x6   :  { %s6382_s25 = sld [smem:[%s6990_s0 + %s6320_s22]]   ;;  %s6323_s4 = smov 8  }
   0x7   :  { %s6387_s29 = sld [smem:[%s6990_s0 + %s6321_s26]]   ;;  %s6324_s10 = smov 9  }
   0x8   :  { %s6392_s3 = sld [smem:[%s6990_s0 + %s6322_s30]]   ;;  %s6325_s15 = smov 10  }
   0x9   :  { %s6397_s8 = sld [smem:[%s6990_s0 + %s6323_s4]]   ;;  %s6326_s20 = smov 11  }
   0xa   :  { %6998 = sst [smem:[#allocation2_spill]] %s6372_s17  ;;  %s6327_s26 = smov 12  }
   0xb   :  { %s6402_s14 = sld [smem:[%s6990_s0 + %s6324_s10]]   ;;  %s6328_s1 = smov 13  }
   0xc   :  { %s6407_s19 = sld [smem:[%s6990_s0 + %s6325_s15]]   ;;  %s6329_s7 = smov 14  }
   0xd   :  { %s6412_s24 = sld [smem:[%s6990_s0 + %s6326_s20]]   ;;  %s6330_s15 = smov 15  }
   0xe   :  { %s6417_s30 = sld [smem:[%s6990_s0 + %s6327_s26]]   ;;  %s6331_s22 = smov 16  }
   0xf   :  { %s6422_s6 = sld [smem:[%s6990_s0 + %s6328_s1]]   ;;  %s6332_s28 = smov 17  }
  0x10   :  { %s6427_s12 = sld [smem:[%s6990_s0 + %s6329_s7]]   ;;  %s6333_s7 = smov 18  }
  0x11   :  { %s6432_s20 = sld [smem:[%s6990_s0 + %s6330_s15]]   ;;  %s6334_s15 = smov 19  }
  0x12   :  { %s6437_s27 = sld [smem:[%s6990_s0 + %s6331_s22]]   ;;  %s6335_s22 = smov 20  }
  0x13   :  { %s6442_s4 = sld [smem:[%s6990_s0 + %s6332_s28]]   ;;  %s6336_s28 = smov 21  }
  0x14   :  { %s6447_s17 = sld [smem:[%s6990_s0 + %s6333_s7]]   ;;  %s6337_s7 = smov 22  }
  0x15   :  { %6999 = sst [smem:[#allocation3_spill]] %s6422_s6 }
  0x16   :  { %s6457_s6 = sld [smem:[%s6990_s0 + %s6335_s22]]   ;;  %s6339_s22 = smov 24  }
  0x17   :  { %7000 = sst [smem:[#allocation4_spill]] %s6432_s20 }
  0x18   :  { %s6452_s20 = sld [smem:[%s6990_s0 + %s6334_s15]]   ;;  %s6338_s15 = smov 23  }
  0x19   :  { %7001 = sst [smem:[#allocation5_spill]] %s6442_s4 }
  0x1a   :  { %7002 = sst [smem:[#allocation6_spill]] %s6447_s17 }
  0x1b   :  { %s6462_s4 = sld [smem:[%s6990_s0 + %s6336_s28]]   ;;  %s6340_s28 = smov 25  }
  0x1c   :  { %7004 = sst [smem:[#allocation8_spill]] %s6457_s6 }
  0x1d   :  { %s6467_s17 = sld [smem:[%s6990_s0 + %s6337_s7]]   ;;  %s6341_s7 = smov 26  }
  0x1e   :  { %7003 = sst [smem:[#allocation7_spill]] %s6452_s20 }
  0x1f   :  { %s6472_s20 = sld [smem:[%s6990_s0 + %s6338_s15]]   ;;  %s6342_s15 = smov 27  }
  0x20   :  { %s6477_s6 = sld [smem:[%s6990_s0 + %s6339_s22]]   ;;  %s6343_s22 = smov 28  }
  0x21   :  { %7005 = sst [smem:[#allocation9_spill]] %s6462_s4 }
  0x22   :  { %s6482_s4 = sld [smem:[%s6990_s0 + %s6340_s28]]   ;;  %s6344_s28 = smov 29  }
  0x23   :  { %7006 = sst [smem:[#allocation10_spill]] %s6467_s17 }
  0x24   :  { %s6487_s17 = sld [smem:[%s6990_s0 + %s6341_s7]]   ;;  %s6345_s7 = smov 30  }
  0x25   :  { %7007 = sst [smem:[#allocation11_spill]] %s6472_s20 }
  0x26   :  { %7008 = sst [smem:[#allocation12_spill]] %s6477_s6 }
  0x27   :  { %s6492_s20 = sld [smem:[%s6990_s0 + %s6342_s15]]   ;;  %s6509_s15 = smov 0  }
  0x28   :  { %7009 = sst [smem:[#allocation13_spill]] %s6482_s4 }
  0x29   :  { %s6497_s6 = sld [smem:[%s6990_s0 + %s6343_s22]]  }
  0x2a   :  { %7010 = sst [smem:[#allocation14_spill]] %s6487_s17 }
  0x2b   :  { %s6502_s4 = sld [smem:[%s6990_s0 + %s6344_s28]]  }
  0x2c   :  { %s6507_s17 = sld [smem:[%s6990_s0 + %s6345_s7]]  }
  0x2d LB: > { %s5271_s16 = sadd.s32 4294967295, %s6314_s15   ;;  %p5275_p0 = scmp.ge.s32.totalorder %s6314_s15, 1  ;;  %s6314_s15 = sphi %s6509_s15, %s71_s15  }
  0x2e   : > { %p869_p1 = scmp.lt.s32.totalorder %s6314_s15, 3 }
  0x30   : > { %p870_p2 = pnand %p5275_p0, %p869_p1 }
  0x31   : > { %v1065_v0 = vld [vmem:[%s6387_s29] sm:$0xff] (!%p870_p2)  ;;  %v1066_v1 = vld [vmem:[%s6387_s29 + $0x8] sm:$0xff] (!%p870_p2)  ;;  %v6346_v3 = vmov (!%p870_p2), 0.0|0.0   ;;  %v1067_v6 = vld [vmem:[%s6387_s29 + $0x10] sm:$0xff] (!%p870_p2)  ;;  %p957_p3 = scmp.lt.s32.totalorder (!%p870_p2), %s5271_s16, 1  ;;  %vm6347_vm0 = vmmov (!%p870_p2), 0  }
  0x32   : > { %873 = sbr.rel (%p870_p2) target bundleno = 9156 (0x23c4), region = 140  ;;  %v980_v2 = vld [vmem:[%s6377_s21] sm:$0xff] (!%p870_p2)  ;;  %6073 = vmatprep.subr.bf16.mxu1 (!%p870_p2), %v6346_v3  ;;  %v6074_v4 = vpack.c.bf16 (!%p870_p2), %v1066_v1, %v1065_v0  ;;  %6067 = vmatprep.subr.bf16.mxu0 (!%p870_p2), %v6346_v3  ;;  %v981_v5 = vld [vmem:[%s6377_s21 + $0x8] sm:$0xff] (!%p870_p2)  ;;  %v1068_v7 = vld [vmem:[%s6387_s29 + $0x18] sm:$0xff] (!%p870_p2)  ;;  %v6348_v11 = vmov (!%p870_p2), 0.0   ;;  %vm991_vm1 = vcmask (!%p870_p2), 261120  }
  0x33   : > { %v6068_v8 = vpack.c.bf16 (!%p870_p2), %v981_v5, %v980_v2  ;;  %v982_v9 = vld [vmem:[%s6377_s21 + $0x10] sm:$0xff] (!%p870_p2)  ;;  %v983_v10 = vld [vmem:[%s6377_s21 + $0x18] sm:$0xff] (!%p870_p2)  ;;  %5672 = vmatprep.mubr.msk.f32.mxu1 (!%p870_p2), %vm6347_vm0, %v6348_v11  ;;  %5661 = vmatprep.mubr.msk.f32.mxu0 (!%p870_p2), %vm6347_vm0, %v6348_v11  ;;  %v6077_v12 = vpack.c.bf16 (!%p870_p2), %v1068_v7, %v1067_v6  ;;  %v1146_v14 = vld [vmem:[%s6397_s8] sm:$0xff] (!%p870_p2)  ;;  %vm1227_vm2 = vcmask (!%p870_p2), 64512   ;;  %s7011_s23 = sld [smem:[#allocation6_spill]] (!%p870_p2)  ;;  %s7012_s28 = sld [smem:[#allocation3_spill]] (!%p870_p2) }
  0x34   : > { %6075 = vmatpush3.bf16.msra.mxu1 (!%p870_p2), %v6074_v4  ;;  %v6071_v13 = vpack.c.bf16 (!%p870_p2), %v983_v10, %v982_v9  ;;  %v1147_v15 = vld [vmem:[%s6397_s8 + $0x8] sm:$0xff] (!%p870_p2)  ;;  %v1148_v18 = vld [vmem:[%s6397_s8 + $0x10] sm:$0xff] (!%p870_p2)  ;;  %v1149_v19 = vld [vmem:[%s6397_s8 + $0x18] sm:$0xff] (!%p870_p2)  ;;  %s7013_s1 = sld [smem:[#allocation5_spill]] (!%p870_p2)  ;;  %s7014_s2 = sld [smem:[#allocation4_spill]] (!%p870_p2)  ;;  %vm5047_vm3 = vcmask (!%p870_p2), 523264  }
  0x35   : > { %6069 = vmatpush3.bf16.msra.mxu0 (!%p870_p2), %v6068_v8  ;;  %6076 = vmatprep.subr.bf16.mxu1 (!%p870_p2), %v6346_v3  ;;  %v6080_v17 = vpack.c.bf16 (!%p870_p2), %v1147_v15, %v1146_v14  ;;  %v6083_v20 = vpack.c.bf16 (!%p870_p2), %v1149_v19, %v1148_v18  ;;  %v5283_v21 = vld [vmem:[%s6392_s3] ss:$0 sm:$0xff] (!%p870_p2)  ;;  %v5291_v45 = vld [vmem:[%s6377_s21 + $0x28] sm:$0xff] (!%p870_p2)  ;;  %v5292_v47 = vld [vmem:[%s6377_s21 + $0x30] sm:$0xff] (!%p870_p2)  ;;  %s7015_s7 = sld [smem:[#allocation7_spill]] (!%p870_p2)  ;;  %s7016_s10 = sld [smem:[#allocation2_spill]] (!%p870_p2) }
  0x36   : > { %6070 = vmatprep.subr.bf16.mxu0 (!%p870_p2), %v6346_v3  ;;  %v5281_v22 = vld [vmem:[%s6382_s25] ss:$0 sm:$0xff] (!%p870_p2)  ;;  %v5293_v48 = vld [vmem:[%s6377_s21 + $0x38] sm:$0xff] (!%p870_p2)  ;;  %v5298_v52 = vld [vmem:[%s6387_s29 + $0x28] sm:$0xff] (!%p870_p2) }
  0x37   : > { %v5285_v29 = vld [vmem:[%s6402_s14] ss:$0 sm:$0xff] (!%p870_p2)  ;;  %v6089_v49 = vpack.c.bf16 (!%p870_p2), %v5293_v48, %v5292_v47  ;;  %v5299_v56 = vld [vmem:[%s6387_s29 + $0x30] sm:$0xff] (!%p870_p2)  ;;  %v5300_v57 = vld [vmem:[%s6387_s29 + $0x38] sm:$0xff] (!%p870_p2) }
  0x38   : > { %6078 = vmatpush3.bf16.msra.mxu1 (!%p870_p2), %v6077_v12  ;;  %v5290_v44 = vld [vmem:[%s6377_s21 + $0x20] sm:$0xff] (!%p870_p2)  ;;  %v6095_v58 = vpack.c.bf16 (!%p870_p2), %v5300_v57, %v5299_v56  ;;  %v5305_v7 = vld [vmem:[%s6397_s8 + $0x28] sm:$0xff] (!%p870_p2)  ;;  %v5306_v8 = vld [vmem:[%s6397_s8 + $0x30] sm:$0xff] (!%p870_p2) }
  0x39   : > { %s7025_s16 = smov (!%p957_p3, %s5271_s16), 1  ;;  %6072 = vmatpush3.bf16.msra.mxu0 %v6071_v13  ;;  %5691 = vmatprep.subr.mxu1 %v6348_v11  ;;  %v6086_v46 = vpack.c.bf16 %v5291_v45, %v5290_v44  ;;  %v5297_v51 = vld [vmem:[%s6387_s29 + $0x20] sm:$0xff]  ;;  %v5307_v10 = vld [vmem:[%s6397_s8 + $0x38] sm:$0xff] }
  0x3a   : > { %s6533_s0 = sshll.u32 %s7025_s16, 3  ;;  %6079 = vmatprep.subr.bf16.mxu0 %v6346_v3  ;;  %v6092_v54 = vpack.c.bf16 %v5298_v52, %v5297_v51  ;;  %v5302_v63 = vld [vmem:[%s6392_s3 + $0x1] ss:$0 sm:$0xff]  ;;  %v6101_v12 = vpack.c.bf16 %v5307_v10, %v5306_v8  ;;  %v5320_v44 = vld [vmem:[%s6377_s21 + $0x58] sm:$0xff]  ;;  %v5322_v57 = vld [vmem:[%s6382_s25 + $0x2] ss:$0 sm:$0xff] }
  0x3b   : > { %s960_s18 = scalar_lea.vmem %s6357_s5, %s6533_s0  ;;  %s968_s22 = scalar_lea.vmem %s6367_s13, %s6533_s0  ;;  %v5295_v0 = vld [vmem:[%s6382_s25 + $0x1] ss:$0 sm:$0xff] }
  0x3c   : > { %v6539_v16 = vld [vmem:[%s960_s18] sm:$0xff]  ;;  %s964_s26 = scalar_lea.vmem %s6362_s9, %s6533_s0  ;;  %s972_s11 = scalar_lea.vmem %s7016_s10, %s6533_s0 }
  0x3d   : > { %5673 = vmatmul.mubr.msk.f32.vlgmr.msra.gmra.mrb[0].mxu1 %vm991_vm1, %v6539_v16  ;;  %5662 = vmatmul.mubr.msk.f32.vlgmr.msra.gmra.mrb[0].mxu0 %vm991_vm1, %v6539_v16  ;;  %v6570_v34 = vld [vmem:[%s968_s22] sm:$0xff]  ;;  %s7017_s16 = sld [smem:[#allocation8_spill]]  ;;  %s7018_s18 = sld [smem:[#allocation9_spill]] }
  0x3e   : > { %5693 = vmatprep.mubr.msk.f32.mxu1 %vm6347_vm0, %v6348_v11  ;;  %6081 = vmatpush3.bf16.msra.mxu0 %v6080_v17  ;;  %v5304_v6 = vld [vmem:[%s6397_s8 + $0x20] sm:$0xff]  ;;  %s7019_s22 = sld [smem:[#allocation12_spill]]  ;;  %s7022_s10 = sld [smem:[#allocation11_spill]] }
  0x3f   : > { %5683 = vmatprep.mubr.msk.f32.mxu0 %vm6347_vm0, %v6348_v11  ;;  %6082 = vmatprep.subr.bf16.mxu0 %v6346_v3  ;;  %v6098_v9 = vpack.c.bf16 %v5305_v7, %v5304_v6 }
  0x42   : > { %6084 = vmatpush3.bf16.msra.mxu0 %v6083_v20 }
  0x43   : > { %5686 = vmatprep.subr.mxu0 %v6348_v11 }
  0x45   : > { %5684 = vmatmul.mubr.msk.f32.vlgmr.msra.gmra.mrb[2].mxu0 %vm991_vm1, %v6539_v16 }
  0x46   : > { %5688 = vmatprep.mubr.msk.f32.mxu0 %vm6347_vm0, %v6348_v11 }
 0x110   : > { %v1142_v23 = vpop.f32.mrb[0].mxu1  ;;  %v1061_v26 = vpop.f32.mrb[0].mxu0 }
 0x111   : > { %v1143_v24 = vadd.f32 %v5283_v21, %v1142_v23  ;;  %v5674_v25 = vpop.f32.mrb[1].mxu1  ;;  %v1062_v27 = vadd.f32 %v5281_v22, %v1061_v26  ;;  %v5663_v28 = vpop.f32.mrb[1].mxu0 }
 0x112   : > { %v5309_v25 = vld [vmem:[%s6402_s14 + $0x1] ss:$0 sm:$0xff]  ;;  %v5314_v28 = vld [vmem:[%s6407_s19 + $0x8] sm:$0xff] }
 0x113   : > { %5687 = vmatpush3.xpose.msk.msra.mxu0 %vm1227_vm2, %v1143_v24 }
 0x114   : > { %6085 = vmatprep.subr.bf16.mxu0 %v6346_v3 }
 0x116   : > { %5689 = vmatmul.mubr.msk.f32.vlgmr.msra.gmra.mrb[4].mxu0 %vm1227_vm2, %v1062_v27 }
 0x117   : > { %5704 = vmatprep.mubr.msk.f32.mxu0 %vm6347_vm0, %v6348_v11  ;;  %6087 = vmatpush3.bf16.msra.mxu0 %v6086_v46 }
 0x118   : > { %v1223_v30 = vpop.f32.mrb[2].mxu0  ;;  %6088 = vmatprep.subr.bf16.mxu0 %v6346_v3 }
 0x119   : > { %v1224_v31 = vadd.f32 %v5285_v29, %v1223_v30  ;;  %v5685_v32 = vpop.f32.mrb[3].mxu0 }
 0x11a   : > { %v1390_v32 = vld [vmem:[%s6407_s19] sm:$0xff] }
 0x11b   : > { %5692 = vmatpush3.msra.mxu1 %v1224_v31  ;;  %6090 = vmatpush3.bf16.msra.mxu0 %v6089_v49 }
 0x11c   : > { %6091 = vmatprep.subr.bf16.mxu1 %v6346_v3  ;;  %6097 = vmatprep.subr.bf16.mxu0 %v6346_v3 }
 0x11e   : > { %5705 = vmatmul.mubr.msk.f32.vlgmr.msra.gmra.mrb[6].mxu0 %vm991_vm1, %v6539_v16 }
 0x11f   : > { %5726 = vmatprep.mubr.msk.f32.mxu0 %vm6347_vm0, %v6348_v11  ;;  %6099 = vmatpush3.bf16.msra.mxu0 %v6098_v9 }
 0x120   : > { %6100 = vmatprep.subr.bf16.mxu0 %v6346_v3 }
 0x123   : > { %6102 = vmatpush3.bf16.msra.mxu0 %v6101_v12 }
 0x124   : > { %5739 = vmatprep.subr.mxu0 %v6348_v11 }
 0x126   : > { %5727 = vmatmul.mubr.msk.f32.vlgmr.msra.gmra.mrb[8].mxu0 %vm991_vm1, %v6539_v16 }
 0x127   : > { %5741 = vmatprep.mubr.msk.f32.mxu0 %vm6347_vm0, %v6348_v11  ;;  %5740 = vmatpush3.msra.mxu0 %v5314_v28  ;;  %v5346_v28 = vld [vmem:[%s6377_s21 + $0x78] sm:$0xff] }
 0x128   : > { %6103 = vmatprep.subr.bf16.mxu0 %v6346_v3 }
 0x1e9   : > { %v1300_v33 = vpop.f32.mrb[4].mxu0 }
 0x1ea   : > { %v1304_v35 = vmul.f32 0.35355338, %v1300_v33  ;;  %v5690_v36 = vpop.f32.mrb[5].mxu0  ;;  %v5324_v33 = vld [vmem:[%s6387_s29 + $0x40] sm:$0xff] }
 0x1ec   : > { %v1305_v37 = vadd.f32 %v1304_v35, %v6570_v34  ;;  %v5325_v35 = vld [vmem:[%s6387_s29 + $0x48] sm:$0xff] }
 0x1ed   : > { %v6110_v36 = vpack.c.bf16 %v5325_v35, %v5324_v33  ;;  %v5352_v33 = vld [vmem:[%s6387_s29 + $0x70] sm:$0xff]  ;;  %v5353_v35 = vld [vmem:[%s6387_s29 + $0x78] sm:$0xff] }
 0x1ee   : > { %v1306_v38 = vsel %vm1227_vm2, %v1305_v37, -inf }
 0x1ef   : > { %1307 = vmax.xlane.f32.xlu0 %v1306_v38  ;;  %v5327_v38 = vld [vmem:[%s6387_s29 + $0x58] sm:$0xff] }
 0x1f1   : > { %v1470_v59 = vpop.f32.mrb[6].mxu0 }
 0x1f2   : > { %v5706_v60 = vpop.f32.mrb[7].mxu0  ;;  %v1471_v5 = vadd.f32 %v5295_v0, %v1470_v59 }
 0x1f9   : > { %v1636_v24 = vpop.f32.mrb[8].mxu0 }
 0x1fa   : > { %v5728_v26 = vpop.f32.mrb[9].mxu0  ;;  %v1637_v27 = vadd.f32 %v5309_v25, %v1636_v24  ;;  %v5343_v24 = vld [vmem:[%s6377_s21 + $0x60] sm:$0xff]  ;;  %v5344_v25 = vld [vmem:[%s6377_s21 + $0x68] sm:$0xff] }
 0x1fb   : > { %v6122_v26 = vpack.c.bf16 %v5344_v25, %v5343_v24 }
 0x27c   : > { %v1308_v39 = vpop.xlane.xlu0 %1307 }
 0x27d   : > { %v1309_v40 = vsub.f32 %v1305_v37, %v1308_v39  ;;  %v5326_v37 = vld [vmem:[%s6387_s29 + $0x50] sm:$0xff] }
 0x27e   : > { %v6113_v39 = vpack.c.bf16 %v5327_v38, %v5326_v37  ;;  %v6131_v38 = vpack.c.bf16 %v5353_v35, %v5352_v33  ;;  %v2966_v35 = vld [vmem:[%s6427_s12 + $0x10] sm:$0xff] }
 0x27f   : > { %v1310_v41 = vmul.f32 1.442695, %v1309_v40  ;;  %v5317_v40 = vld [vmem:[%s6377_s21 + $0x40] sm:$0xff] }
 0x281   : > { %6270 = vpow2.f32 %v1310_v41  ;;  %v5318_v41 = vld [vmem:[%s6377_s21 + $0x48] sm:$0xff] }
 0x28b   : > { %v6271_v42 = vpop.eup %6270 }
 0x28c   : > { %v1312_v43 = vsel %vm1227_vm2, %v6271_v42, 0.0 }
 0x28d   : > { %1313 = vadd.xlane.f32.xlu0 %v1312_v43  ;;  %v5319_v43 = vld [vmem:[%s6377_s21 + $0x50] sm:$0xff] }
 0x28e   : > { %v6107_v47 = vpack.c.bf16 %v5320_v44, %v5319_v43  ;;  %v5355_v44 = vld [vmem:[%s6392_s3 + $0x3] ss:$0 sm:$0xff] }
 0x31a   : > { %v1314_v50 = vpop.xlane.xlu0 %1313 }
 0x31b   : > { %6272 = vrcp.f32 %v1314_v50  ;;  %v5329_v50 = vld [vmem:[%s6392_s3 + $0x2] ss:$0 sm:$0xff] }
 0x325   : > { %v6273_v53 = vpop.eup %6272 }
 0x326   : > { %v1316_v55 = vmul.f32 %v6273_v53, %v6271_v42  ;;  %v6104_v42 = vpack.c.bf16 %v5318_v41, %v5317_v40 }
 0x328   : > { %5694 = vmatmul.mubr.msk.f32.vlgmr.msra.gmra.mrb[2].mxu1 %vm1227_vm2, %v1316_v55 }
 0x329   : > { %6093 = vmatpush3.bf16.msra.mxu1 %v6092_v54  ;;  %5715 = vmatprep.mubr.msk.f32.mxu1 %vm6347_vm0, %v6348_v11 }
 0x32a   : > { %6094 = vmatprep.subr.bf16.mxu1 %v6346_v3 }
 0x32d   : > { %6096 = vmatpush3.bf16.msra.mxu1 %v6095_v58 }
 0x32e   : > { %5729 = vmatprep.subr.mxu1 %v6348_v11 }
 0x330   : > { %5716 = vmatmul.mubr.msk.f32.vlgmr.msra.gmra.mrb[4].mxu1 %vm991_vm1, %v6539_v16 }
 0x331   : > { %5731 = vmatprep.mubr.msk.f32.mxu1 %vm6347_vm0, %v6348_v11 }
 0x3fb   : > { %v1386_v61 = vpop.f32.mrb[2].mxu1 }
 0x3fc   : > { %v5695_v62 = vpop.f32.mrb[3].mxu1 }
 0x3fd   : > { %v5332_v62 = vld [vmem:[%s6397_s8 + $0x48] sm:$0xff] }
 0x403   : > { %v1553_v1 = vpop.f32.mrb[4].mxu1 }
 0x404   : > { %v1554_v2 = vadd.f32 %v5302_v63, %v1553_v1  ;;  %v5717_v4 = vpop.f32.mrb[5].mxu1  ;;  %v5333_v63 = vld [vmem:[%s6397_s8 + $0x50] sm:$0xff]  ;;  %v5334_v1 = vld [vmem:[%s6397_s8 + $0x58] sm:$0xff] }
 0x406   : > { %5730 = vmatpush3.xpose.msk.msra.mxu1 %vm1227_vm2, %v1554_v2  ;;  %v6119_v2 = vpack.c.bf16 %v5334_v1, %v5333_v63 }
 0x407   : > { %5734 = vmatprep.subr.mxu1 %v6348_v11 }
 0x409   : > { %5732 = vmatmul.mubr.msk.f32.vlgmr.msra.gmra.mrb[6].mxu1 %vm1227_vm2, %v1471_v5 }
 0x40a   : > { %5736 = vmatprep.mubr.msk.f32.mxu1 %vm6347_vm0, %v6348_v11  ;;  %5735 = vmatpush3.msra.mxu1 %v1637_v27  ;;  %v5345_v27 = vld [vmem:[%s6377_s21 + $0x70] sm:$0xff] }
 0x40b   : > { %5744 = vmatprep.subr.mxu1 %v6348_v11 }
 0x4dc   : > { %v1712_v13 = vpop.f32.mrb[6].mxu1 }
 0x4dd   : > { %v1716_v14 = vmul.f32 0.35355338, %v1712_v13  ;;  %v5733_v15 = vpop.f32.mrb[7].mxu1 }
 0x4df   : > { %v1717_v17 = vadd.f32 %v1716_v14, %v6570_v34 }
 0x4e1   : > { %v1718_v18 = vsel %vm1227_vm2, %v1717_v17, -inf }
 0x4e2   : > { %1719 = vmax.xlane.f32.xlu1 %v1718_v18 }
 0x56f   : > { %v1720_v19 = vpop.xlane.xlu1 %1719 }
 0x570   : > { %v1721_v20 = vsub.f32 %v1717_v17, %v1720_v19  ;;  %v5336_v17 = vld [vmem:[%s6402_s14 + $0x2] ss:$0 sm:$0xff] }
 0x572   : > { %v1722_v21 = vmul.f32 1.442695, %v1721_v20  ;;  %v5341_v20 = vld [vmem:[%s6407_s19 + $0x10] sm:$0xff] }
 0x574   : > { %6274 = vpow2.f32 %v1722_v21 }
 0x57e   : > { %v6275_v22 = vpop.eup %6274 }
 0x57f   : > { %v1724_v23 = vsel %vm1227_vm2, %v6275_v22, 0.0 }
 0x580   : > { %1725 = vadd.xlane.f32.xlu1 %v1724_v23 }
 0x60d   : > { %v1726_v29 = vpop.xlane.xlu1 %1725 }
 0x60e   : > { %6276 = vrcp.f32 %v1726_v29  ;;  %v6125_v29 = vpack.c.bf16 %v5346_v28, %v5345_v27  ;;  %v3049_v27 = vld [vmem:[%s6437_s27 + $0x8] sm:$0xff] }
 0x618   : > { %v6277_v30 = vpop.eup %6276 }
 0x619   : > { %v1728_v31 = vmul.f32 %v6277_v30, %v6275_v22  ;;  %v5350_v30 = vld [vmem:[%s6387_s29 + $0x60] sm:$0xff] }
 0x61b   : > { %5737 = vmatmul.mubr.msk.f32.vlgmr.msra.gmra.mrb[8].mxu1 %vm1227_vm2, %v1728_v31  ;;  %v5351_v31 = vld [vmem:[%s6387_s29 + $0x68] sm:$0xff] }
 0x61c   : > { %5745 = vmatpush3.msra.mxu1 %v1390_v32  ;;  %5746 = vmatprep.mubr.msk.f32.mxu1 %vm6347_vm0, %v6348_v11  ;;  %v6128_v32 = vpack.c.bf16 %v5351_v31, %v5350_v30  ;;  %v3050_v31 = vld [vmem:[%s6437_s27 + $0x10] sm:$0xff] }
 0x61d   : > { %6109 = vmatprep.subr.bf16.mxu1 %v6346_v3 }
 0x61f   : > { %5747 = vmatmul.mubr.msk.f32.vlgmr.msra.gmra.mrb[10].mxu1 %vm1227_vm2, %v1386_v61  ;;  %v5331_v61 = vld [vmem:[%s6397_s8 + $0x40] sm:$0xff] }
 0x620   : > { %6111 = vmatpush3.bf16.msra.mxu1 %v6110_v36  ;;  %5768 = vmatprep.mubr.msk.f32.mxu1 %vm6347_vm0, %v6348_v11  ;;  %v6116_v0 = vpack.c.bf16 %v5332_v62, %v5331_v61 }
 0x621   : > { %6112 = vmatprep.subr.bf16.mxu1 %v6346_v3 }
 0x624   : > { %6114 = vmatpush3.bf16.msra.mxu1 %v6113_v39 }
 0x625   : > { %5782 = vmatprep.subr.mxu1 %v6348_v11 }
 0x627   : > { %5769 = vmatmul.mubr.msk.f32.vlgmr.msra.gmra.mrb[12].mxu1 %vm991_vm1, %v6539_v16 }
 0x628   : > { %5784 = vmatprep.mubr.msk.f32.mxu1 %vm6347_vm0, %v6348_v11 }
 0x6ee   : > { %v1798_v45 = vpop.f32.mrb[8].mxu1 }
 0x6ef   : > { %v5738_v46 = vpop.f32.mrb[9].mxu1  ;;  %5742 = vmatmul.mubr.msk.f32.vlgmr.msra.gmra.mrb[10].mxu0 %vm1227_vm2, %v1798_v45  ;;  %v5348_v45 = vld [vmem:[%s6382_s25 + $0x3] ss:$0 sm:$0xff] }
 0x6f0   : > { %6105 = vmatpush3.bf16.msra.mxu0 %v6104_v42  ;;  %5757 = vmatprep.mubr.msk.f32.mxu0 %vm6347_vm0, %v6348_v11 }
 0x6f1   : > { %6106 = vmatprep.subr.bf16.mxu0 %v6346_v3 }
 0x6f2   : > { %v1946_v48 = vpop.f32.mrb[10].mxu1 }
 0x6f3   : > { %v5748_v49 = vpop.f32.mrb[11].mxu1 }
 0x6f4   : > { %6108 = vmatpush3.bf16.msra.mxu0 %v6107_v47 }
 0x6f5   : > { %6115 = vmatprep.subr.bf16.mxu0 %v6346_v3 }
 0x6f7   : > { %5758 = vmatmul.mubr.msk.f32.vlgmr.msra.gmra.mrb[12].mxu0 %vm991_vm1, %v6539_v16 }
 0x6f8   : > { %5779 = vmatprep.mubr.msk.f32.mxu0 %vm6347_vm0, %v6348_v11  ;;  %6117 = vmatpush3.bf16.msra.mxu0 %v6116_v0 }
 0x6f9   : > { %6118 = vmatprep.subr.bf16.mxu0 %v6346_v3 }
 0x6fa   : > { %v2112_v51 = vpop.f32.mrb[12].mxu1 }
 0x6fb   : > { %v2113_v52 = vadd.f32 %v5329_v50, %v2112_v51  ;;  %v5770_v53 = vpop.f32.mrb[13].mxu1  ;;  %v5357_v50 = vld [vmem:[%s6397_s8 + $0x60] sm:$0xff]  ;;  %v5358_v51 = vld [vmem:[%s6397_s8 + $0x68] sm:$0xff] }
 0x6fc   : > { %6120 = vmatpush3.bf16.msra.mxu0 %v6119_v2  ;;  %v6134_v53 = vpack.c.bf16 %v5358_v51, %v5357_v50  ;;  %v3134_v51 = vld [vmem:[%s7011_s23 + $0x10] sm:$0xff] }
 0x6fd   : > { %5783 = vmatpush3.xpose.msk.msra.mxu1 %vm1227_vm2, %v2113_v52  ;;  %5792 = vmatprep.subr.mxu0 %v6348_v11  ;;  %v5359_v52 = vld [vmem:[%s6397_s8 + $0x70] sm:$0xff] }
 0x6fe   : > { %5787 = vmatprep.subr.mxu1 %v6348_v11 }
 0x6ff   : > { %5780 = vmatmul.mubr.msk.f32.vlgmr.msra.gmra.mrb[14].mxu0 %vm991_vm1, %v6539_v16 }
 0x700   : > { %5794 = vmatprep.mubr.msk.f32.mxu0 %vm6347_vm0, %v6348_v11  ;;  %5793 = vmatpush3.msra.mxu0 %v5341_v20 }
 0x701   : > { %6127 = vmatprep.subr.bf16.mxu0 %v6346_v3 }
 0x7c2   : > { %v1873_v54 = vpop.f32.mrb[10].mxu0 }
 0x7c3   : > { %v6656_v55 = vadd.f32 %v1946_v48, %v1873_v54  ;;  %v5743_v56 = vpop.f32.mrb[11].mxu0  ;;  %v5360_v54 = vld [vmem:[%s6397_s8 + $0x78] sm:$0xff] }
 0x7ca   : > { %v2029_v58 = vpop.f32.mrb[12].mxu0 }
 0x7cb   : > { %v2030_v59 = vadd.f32 %v5322_v57, %v2029_v58  ;;  %v5759_v60 = vpop.f32.mrb[13].mxu0 }
 0x7cd   : > { %5785 = vmatmul.mubr.msk.f32.vlgmr.msra.gmra.mrb[14].mxu1 %vm1227_vm2, %v2030_v59 }
 0x7ce   : > { %5789 = vmatprep.mubr.msk.f32.mxu1 %vm6347_vm0, %v6348_v11 }
 0x7d2   : > { %v2195_v15 = vpop.f32.mrb[14].mxu0 }
 0x7d3   : > { %v5781_v18 = vpop.f32.mrb[15].mxu0  ;;  %v2196_v19 = vadd.f32 %v5336_v17, %v2195_v15 }
 0x7d5   : > { %5788 = vmatpush3.msra.mxu1 %v2196_v19 }
 0x7d6   : > { %6121 = vmatprep.subr.bf16.mxu1 %v6346_v3 }
 0x8a0   : > { %v2271_v4 = vpop.f32.mrb[14].mxu1 }
 0x8a1   : > { %v2275_v5 = vmul.f32 0.35355338, %v2271_v4  ;;  %v5786_v6 = vpop.f32.mrb[15].mxu1  ;;  %v5362_v4 = vld [vmem:[%s6402_s14 + $0x3] ss:$0 sm:$0xff] }
 0x8a3   : > { %v2276_v7 = vadd.f32 %v2275_v5, %v6570_v34 }
 0x8a5   : > { %v2277_v8 = vsel %vm1227_vm2, %v2276_v7, -inf }
 0x8a6   : > { %2278 = vmax.xlane.f32.xlu0 %v2277_v8 }
 0x933   : > { %v2279_v9 = vpop.xlane.xlu0 %2278 }
 0x934   : > { %v2280_v10 = vsub.f32 %v2276_v7, %v2279_v9  ;;  %v5367_v7 = vld [vmem:[%s6407_s19 + $0x18] sm:$0xff] }
 0x936   : > { %v2281_v12 = vmul.f32 1.442695, %v2280_v10 }
 0x938   : > { %6278 = vpow2.f32 %v2281_v12 }
 0x942   : > { %v6279_v13 = vpop.eup %6278 }
 0x943   : > { %v2283_v14 = vsel %vm1227_vm2, %v6279_v13, 0.0 }
 0x944   : > { %2284 = vadd.xlane.f32.xlu1 %v2283_v14  ;;  %v5369_v14 = vld [vmem:[%s6412_s24] ss:$0 sm:$0xff] }
 0x9d1   : > { %v2285_v21 = vpop.xlane.xlu1 %2284 }
 0x9d2   : > { %6280 = vrcp.f32 %v2285_v21 }
 0x9dc   : > { %v6281_v22 = vpop.eup %6280 }
 0x9dd   : > { %v2287_v23 = vmul.f32 %v6281_v22, %v6279_v13 }
 0x9df   : > { %5790 = vmatmul.mubr.msk.f32.vlgmr.msra.gmra.mrb[16].mxu1 %vm1227_vm2, %v2287_v23 }
 0x9e0   : > { %5805 = vmatprep.mubr.msk.f32.mxu1 %vm6347_vm0, %v6348_v11  ;;  %6123 = vmatpush3.bf16.msra.mxu1 %v6122_v26  ;;  %v3048_v26 = vld [vmem:[%s6437_s27] sm:$0xff] }
 0x9e1   : > { %6124 = vmatprep.subr.bf16.mxu1 %v6346_v3  ;;  %v6146_v28 = vpack.c.bf16 %v3049_v27, %v3048_v26 }
 0x9e4   : > { %6126 = vmatpush3.bf16.msra.mxu1 %v6125_v29  ;;  %v2965_v29 = vld [vmem:[%s6427_s12 + $0x8] sm:$0xff] }
 0x9e5   : > { %6133 = vmatprep.subr.bf16.mxu1 %v6346_v3 }
 0x9e7   : > { %5806 = vmatmul.mubr.msk.f32.vlgmr.msra.gmra.mrb[18].mxu1 %vm991_vm1, %v6539_v16 }
 0x9e8   : > { %5827 = vmatprep.mubr.msk.f32.mxu1 %vm6347_vm0, %v6348_v11  ;;  %6135 = vmatpush3.bf16.msra.mxu1 %v6134_v53 }
 0x9e9   : > { %6136 = vmatprep.subr.bf16.mxu1 %v6346_v3 }
 0xab2   : > { %v2357_v36 = vpop.f32.mrb[16].mxu1 }
 0xab3   : > { %v5791_v37 = vpop.f32.mrb[17].mxu1  ;;  %5795 = vmatmul.mubr.msk.f32.vlgmr.msra.gmra.mrb[16].mxu0 %vm1227_vm2, %v2357_v36  ;;  %v2967_v36 = vld [vmem:[%s6427_s12 + $0x18] sm:$0xff] }
 0xab4   : > { %6129 = vmatpush3.bf16.msra.mxu0 %v6128_v32  ;;  %5816 = vmatprep.mubr.msk.f32.mxu0 %vm6347_vm0, %v6348_v11  ;;  %v3051_v32 = vld [vmem:[%s6437_s27 + $0x18] sm:$0xff]  ;;  %v6143_v37 = vpack.c.bf16 %v2967_v36, %v2966_v35  ;;  %v5386_v36 = vld [vmem:[%s7014_s2 + $0x1] ss:$0 sm:$0xff] }
 0xab5   : > { %6130 = vmatprep.subr.bf16.mxu0 %v6346_v3  ;;  %v6149_v33 = vpack.c.bf16 %v3051_v32, %v3050_v31 }
 0xab8   : > { %6132 = vmatpush3.bf16.msra.mxu0 %v6131_v38  ;;  %v6753_v38 = vld [vmem:[%s964_s26] sm:$0xff]  ;;  %s7020_s26 = sld [smem:[#allocation14_spill]] }
 0xab9   : > { %5830 = vmatprep.subr.mxu0 %v6348_v11 }
 0xaba   : > { %v2516_v39 = vpop.f32.mrb[18].mxu1 }
 0xabb   : > { %5817 = vmatmul.mubr.msk.f32.vlgmr.msra.gmra.mrb[18].mxu0 %vm991_vm1, %v6539_v16  ;;  %v5807_v40 = vpop.f32.mrb[19].mxu1  ;;  %v2517_v49 = vadd.f32 %v5348_v45, %v2516_v39  ;;  %v3132_v45 = vld [vmem:[%s7011_s23] sm:$0xff] }
 0xabc   : > { %5832 = vmatprep.mubr.msk.f32.mxu0 %vm6347_vm0, %v6348_v11 }
 0xb86   : > { %v2432_v41 = vpop.f32.mrb[16].mxu0 }
 0xb87   : > { %v2436_v42 = vadd.f32 %v2432_v41, %v6656_v55  ;;  %v5796_v43 = vpop.f32.mrb[17].mxu0  ;;  %v6137_v55 = vpack.c.bf16 %v5360_v54, %v5359_v52  ;;  %v3135_v52 = vld [vmem:[%s7011_s23 + $0x18] sm:$0xff]  ;;  %v5381_v54 = vld [vmem:[%s6427_s12 + $0x20] sm:$0xff] }
 0xb88   : > { %v5370_v43 = vld [vmem:[%s6417_s30] ss:$0 sm:$0xff]  ;;  %v6155_v53 = vpack.c.bf16 %v3135_v52, %v3134_v51 }
 0xb89   : > { %6138 = vmatpush3.bf16.msra.mxu1 %v6137_v55  ;;  %v5382_v55 = vld [vmem:[%s6427_s12 + $0x28] sm:$0xff] }
 0xb8a   : > { %5840 = vmatprep.subr.mxu1 %v6348_v11 }
 0xb8c   : > { %5828 = vmatmul.mubr.msk.f32.vlgmr.msra.gmra.mrb[20].mxu1 %vm991_vm1, %v6539_v16 }
 0xb8d   : > { %5842 = vmatprep.mubr.msk.f32.mxu1 %vm6347_vm0, %v6348_v11  ;;  %5841 = vmatpush3.msra.mxu1 %v5367_v7 }
 0xb8e   : > { %v2599_v46 = vpop.f32.mrb[18].mxu0  ;;  %6145 = vmatprep.subr.bf16.mxu1 %v6346_v3 }
 0xb8f   : > { %v2600_v47 = vadd.f32 %v5355_v44, %v2599_v46  ;;  %v5818_v48 = vpop.f32.mrb[19].mxu0  ;;  %v3133_v46 = vld [vmem:[%s7011_s23 + $0x8] sm:$0xff] }
 0xb91   : > { %5831 = vmatpush3.xpose.msk.msra.mxu0 %vm1227_vm2, %v2600_v47  ;;  %v5371_v47 = vld [vmem:[%s7012_s28] ss:$0 sm:$0xff]  ;;  %s7021_s28 = sld [smem:[#allocation10_spill]] }
 0xb92   : > { %5835 = vmatprep.subr.mxu0 %v6348_v11 }
 0xb94   : > { %5833 = vmatmul.mubr.msk.f32.vlgmr.msra.gmra.mrb[20].mxu0 %vm1227_vm2, %v2517_v49  ;;  %v6152_v49 = vpack.c.bf16 %v3133_v46, %v3132_v45  ;;  %v5398_v45 = vld [vmem:[%s7011_s23 + $0x38] sm:$0xff] }
 0xb95   : > { %5837 = vmatprep.mubr.msk.f32.mxu0 %vm6347_vm0, %v6348_v11 }
 0xc5f   : > { %v2682_v2 = vpop.f32.mrb[20].mxu1 }
 0xc60   : > { %v5829_v5 = vpop.f32.mrb[21].mxu1  ;;  %v2683_v6 = vadd.f32 %v5362_v4, %v2682_v2 }
 0xc61   : > { %v5376_v5 = vld [vmem:[%s7015_s7] ss:$0 sm:$0xff] }
 0xc62   : > { %5836 = vmatpush3.msra.mxu0 %v2683_v6 }
 0xc63   : > { %6139 = vmatprep.subr.bf16.mxu0 %v6346_v3 }
 0xc67   : > { %v2758_v56 = vpop.f32.mrb[20].mxu0 }
 0xc68   : > { %v2762_v57 = vmul.f32 0.35355338, %v2758_v56  ;;  %v5834_v58 = vpop.f32.mrb[21].mxu0  ;;  %v6158_v56 = vpack.c.bf16 %v5382_v55, %v5381_v54 }
 0xc69   : > { %v5384_v58 = vld [vmem:[%s6427_s12 + $0x38] sm:$0xff] }
 0xc6a   : > { %v2763_v59 = vadd.f32 %v2762_v57, %v6570_v34  ;;  %v5383_v57 = vld [vmem:[%s6427_s12 + $0x30] sm:$0xff] }
 0xc6c   : > { %v2764_v60 = vsel %vm1227_vm2, %v2763_v59, -inf }
 0xc6d   : > { %2765 = vmax.xlane.f32.xlu0 %v2764_v60  ;;  %v5374_v60 = vld [vmem:[%s7013_s1] ss:$0 sm:$0xff] }
 0xcfa   : > { %v2766_v61 = vpop.xlane.xlu0 %2765 }
 0xcfb   : > { %v2767_v62 = vsub.f32 %v2763_v59, %v2766_v61  ;;  %v6161_v59 = vpack.c.bf16 %v5384_v58, %v5383_v57 }
 0xcfd   : > { %v2768_v63 = vmul.f32 1.442695, %v2767_v62 }
 0xcff   : > { %6282 = vpow2.f32 %v2768_v63 }
 0xd09   : > { %v6283_v0 = vpop.eup %6282 }
 0xd0a   : > { %v2770_v1 = vsel %vm1227_vm2, %v6283_v0, 0.0 }
 0xd0b   : > { %2771 = vadd.xlane.f32.xlu1 %v2770_v1 }
 0xd98   : > { %v2772_v34 = vpop.xlane.xlu1 %2771 }
 0xd99   : > { %6284 = vrcp.f32 %v2772_v34 }
 0xda3   : > { %v6285_v8 = vpop.eup %6284 }
 0xda4   : > { %v2774_v9 = vmul.f32 %v6285_v8, %v6283_v0  ;;  %v5372_v0 = vld [vmem:[%s7014_s2] ss:$0 sm:$0xff] }
 0xda6   : > { %5838 = vmatmul.mubr.msk.f32.vlgmr.msra.gmra.mrb[22].mxu0 %vm1227_vm2, %v2774_v9 }
 0xda7   : > { %5853 = vmatprep.mubr.msk.f32.mxu0 %vm6347_vm0, %v6348_v11 }
 0xe79   : > { %v2844_v10 = vpop.f32.mrb[22].mxu0 }
 0xe7a   : > { %v5839_v12 = vpop.f32.mrb[23].mxu0  ;;  %5843 = vmatmul.mubr.msk.f32.vlgmr.msra.gmra.mrb[22].mxu1 %vm1227_vm2, %v2844_v10 }
 0xe7b   : > { %5864 = vmatprep.mubr.msk.f32.mxu1 %vm6347_vm0, %v6348_v11  ;;  %6147 = vmatpush3.bf16.msra.mxu1 %v6146_v28  ;;  %v6799_v12 = vld [vmem:[%s972_s11] sm:$0xff]  ;;  %s7023_s11 = sld [smem:[#allocation13_spill]] }
 0xe7c   : > { %6148 = vmatprep.subr.bf16.mxu1 %v6346_v3 }
 0xe7f   : > { %6150 = vmatpush3.bf16.msra.mxu1 %v6149_v33  ;;  %v5393_v33 = vld [vmem:[%s7013_s1 + $0x1] ss:$0 sm:$0xff] }
 0xe80   : > { %5878 = vmatprep.subr.mxu1 %v6348_v11 }
 0xe82   : > { %5865 = vmatmul.mubr.msk.f32.vlgmr.msra.gmra.mrb[24].mxu1 %vm991_vm1, %v6753_v38 }
 0xe83   : > { %5880 = vmatprep.mubr.msk.f32.mxu1 %vm6347_vm0, %v6348_v11 }
 0xf4d   : > { %v2919_v13 = vpop.f32.mrb[22].mxu1 }
 0xf4e   : > { %v2923_v15 = vadd.f32 %v2919_v13, %v2436_v42  ;;  %v5844_v17 = vpop.f32.mrb[23].mxu1 }
 0xf50   : > { %v2931_v18 = vadd.f32 %v5369_v14, %v2923_v15 }
 0xf52   : > { %v2932_v19 = vadd.f32 %v2931_v18, %v6539_v16  ;;  %v2964_v16 = vld [vmem:[%s6427_s12] sm:$0xff] }
 0xf53   : > { %v6140_v30 = vpack.c.bf16 %v2965_v29, %v2964_v16  ;;  %v5390_v16 = vld [vmem:[%s6437_s27 + $0x30] sm:$0xff]  ;;  %v5391_v29 = vld [vmem:[%s6437_s27 + $0x38] sm:$0xff] }
 0xf54   : > { %v2935_v20 = vsel %vm991_vm1, %v2932_v19, 0.0 }
 0xf55   : > { %2936 = vadd.xlane.f32.xlu0 %v2935_v20  ;;  %6141 = vmatpush3.bf16.msra.mxu0 %v6140_v30  ;;  %v3128_v61 = vpop.f32.mrb[24].mxu1  ;;  %v6167_v30 = vpack.c.bf16 %v5391_v29, %v5390_v16  ;;  %v5413_v16 = vld [vmem:[%s7014_s2 + $0x2] ss:$0 sm:$0xff] }
 0xf56   : > { %6142 = vmatprep.subr.bf16.mxu0 %v6346_v3  ;;  %v3129_v62 = vadd.f32 %v5374_v60, %v3128_v61  ;;  %v5866_v63 = vpop.f32.mrb[25].mxu1 }
 0xf58   : > { %5879 = vmatpush3.xpose.msk.msra.mxu1 %vm1227_vm2, %v3129_v62  ;;  %v5405_v62 = vld [vmem:[%s7017_s16 + $0x8] sm:$0xff] }
 0xf59   : > { %6144 = vmatpush3.bf16.msra.mxu0 %v6143_v37  ;;  %5883 = vmatprep.subr.mxu1 %v6348_v11 }
 0xf5a   : > { %6151 = vmatprep.subr.bf16.mxu0 %v6346_v3 }
 0xfe2   : > { %v2937_v21 = vpop.xlane.xlu0 %2936 }
 0xfe3   : > { %v2939_v22 = vmul.f32 0.03125, %v2937_v21 }
 0xfe5   : > { %v2940_v23 = vsub.f32 %v2932_v19, %v2939_v22 }
 0xfe7   : > { %v2941_v24 = vmul.f32 %v2940_v23, %v2940_v23 }
 0xfe9   : > { %v2942_v25 = vsel %vm991_vm1, %v2941_v24, 0.0  ;;  %v5388_v24 = vld [vmem:[%s6437_s27 + $0x20] sm:$0xff] }
 0xfea   : > { %2943 = vadd.xlane.f32.xlu1 %v2942_v25  ;;  %v5389_v25 = vld [vmem:[%s6437_s27 + $0x28] sm:$0xff] }
 0xfeb   : > { %v6164_v27 = vpack.c.bf16 %v5389_v25, %v5388_v24 }
0x1077   : > { %v2944_v39 = vpop.xlane.xlu1 %2943 }
0x1078   : > { %v2945_v40 = vmul.f32 0.03125, %v2944_v39 }
0x107a   : > { %v2946_v41 = vadd.f32 1e-05, %v2945_v40 }
0x107c   : > { %6286 = vrsqrt.f32 %v2946_v41  ;;  %v5395_v41 = vld [vmem:[%s7011_s23 + $0x20] sm:$0xff] }
0x1086   : > { %v6287_v42 = vpop.eup %6286 }
0x1087   : > { %v2948_v44 = vmul.f32 %v6287_v42, %v2940_v23  ;;  %v5396_v42 = vld [vmem:[%s7011_s23 + $0x28] sm:$0xff] }
0x1089   : > { %v2955_v48 = vmul.f32 %v5370_v43, %v2948_v44  ;;  %v5397_v43 = vld [vmem:[%s7011_s23 + $0x30] sm:$0xff]  ;;  %v6170_v44 = vpack.c.bf16 %v5396_v42, %v5395_v41 }
0x108a   : > { %v6173_v46 = vpack.c.bf16 %v5398_v45, %v5397_v43 }
0x108b   : > { %v6764_v50 = vadd.f32 %v5371_v47, %v2955_v48 }
0x108d   : > { %5854 = vmatmul.mubr.msk.f32.vlgmr.msra.gmra.mrb[24].mxu0 %vm991_vm1, %v6764_v50 }
0x108e   : > { %6153 = vmatpush3.bf16.msra.mxu0 %v6152_v49  ;;  %5875 = vmatprep.mubr.msk.f32.mxu0 %vm6347_vm0, %v6348_v11 }
0x108f   : > { %6154 = vmatprep.subr.bf16.mxu0 %v6346_v3 }
0x1092   : > { %6156 = vmatpush3.bf16.msra.mxu0 %v6155_v53 }
0x1093   : > { %6157 = vmatprep.subr.bf16.mxu0 %v6346_v3 }
0x1095   : > { %5876 = vmatmul.mubr.msk.f32.vlgmr.msra.gmra.mrb[26].mxu0 %vm991_vm1, %v6753_v38 }
0x1096   : > { %6159 = vmatpush3.bf16.msra.mxu0 %v6158_v56  ;;  %5896 = vmatprep.mubr.msk.f32.mxu0 %vm6347_vm0, %v6348_v11 }
0x1097   : > { %6160 = vmatprep.subr.bf16.mxu0 %v6346_v3 }
0x109a   : > { %6162 = vmatpush3.bf16.msra.mxu0 %v6161_v59  ;;  %v5400_v59 = vld [vmem:[%s7015_s7 + $0x1] ss:$0 sm:$0xff] }
0x109b   : > { %6169 = vmatprep.subr.bf16.mxu0 %v6346_v3 }
0x109d   : > { %5897 = vmatmul.mubr.msk.f32.vlgmr.msra.gmra.mrb[28].mxu0 %vm991_vm1, %v6764_v50 }
0x109e   : > { %5918 = vmatprep.mubr.msk.f32.mxu0 %vm6347_vm0, %v6348_v11  ;;  %6171 = vmatpush3.bf16.msra.mxu0 %v6170_v44 }
0x109f   : > { %6172 = vmatprep.subr.bf16.mxu0 %v6346_v3 }
0x10a2   : > { %6174 = vmatpush3.bf16.msra.mxu0 %v6173_v46 }
0x10a3   : > { %5931 = vmatprep.subr.mxu0 %v6348_v11 }
0x10a5   : > { %5919 = vmatmul.mubr.msk.f32.vlgmr.msra.gmra.mrb[30].mxu0 %vm991_vm1, %v6753_v38 }
0x10a6   : > { %5933 = vmatprep.mubr.msk.f32.mxu0 %vm6347_vm0, %v6348_v11  ;;  %5932 = vmatpush3.msra.mxu0 %v5405_v62  ;;  %v5436_v62 = vld [vmem:[%s6427_s12 + $0x70] sm:$0xff] }
0x10a7   : > { %6175 = vmatprep.subr.bf16.mxu0 %v6346_v3 }
0x1160   : > { %v3044_v1 = vpop.f32.mrb[24].mxu0 }
0x1161   : > { %v3045_v2 = vadd.f32 %v5372_v0, %v3044_v1  ;;  %v5855_v4 = vpop.f32.mrb[25].mxu0 }
0x1162   : > { %v5415_v4 = vld [vmem:[%s6437_s27 + $0x40] sm:$0xff] }
0x1163   : > { %5881 = vmatmul.mubr.msk.f32.vlgmr.msra.gmra.mrb[26].mxu1 %vm1227_vm2, %v3045_v2  ;;  %v3375_v2 = vld [vmem:[%s7017_s16] sm:$0xff] }
0x1164   : > { %5885 = vmatprep.mubr.msk.f32.mxu1 %vm6347_vm0, %v6348_v11 }
0x1168   : > { %v3209_v6 = vpop.f32.mrb[26].mxu0 }
0x1169   : > { %v3210_v7 = vadd.f32 %v5376_v5, %v3209_v6  ;;  %v5877_v34 = vpop.f32.mrb[27].mxu0  ;;  %v5416_v5 = vld [vmem:[%s6437_s27 + $0x48] sm:$0xff] }
0x116a   : > { %v6182_v6 = vpack.c.bf16 %v5416_v5, %v5415_v4  ;;  %v5418_v34 = vld [vmem:[%s6437_s27 + $0x58] sm:$0xff]  ;;  %v5443_v5 = vld [vmem:[%s6437_s27 + $0x70] sm:$0xff] }
0x116b   : > { %5884 = vmatpush3.msra.mxu1 %v3210_v7  ;;  %v5417_v7 = vld [vmem:[%s6437_s27 + $0x50] sm:$0xff] }
0x116c   : > { %6163 = vmatprep.subr.bf16.mxu1 %v6346_v3 }
0x1170   : > { %v3455_v8 = vpop.f32.mrb[28].mxu0 }
0x1171   : > { %v5898_v9 = vpop.f32.mrb[29].mxu0  ;;  %v3456_v40 = vadd.f32 %v5386_v36, %v3455_v8  ;;  %v6185_v8 = vpack.c.bf16 %v5418_v34, %v5417_v7 }
0x1172   : > { %v5408_v9 = vld [vmem:[%s6427_s12 + $0x40] sm:$0xff] }
0x1178   : > { %v3621_v58 = vpop.f32.mrb[30].mxu0 }
0x1179   : > { %v5920_v60 = vpop.f32.mrb[31].mxu0  ;;  %v3622_v61 = vadd.f32 %v5400_v59, %v3621_v58  ;;  %v5435_v58 = vld [vmem:[%s6427_s12 + $0x68] sm:$0xff] }
0x1236   : > { %v3285_v10 = vpop.f32.mrb[26].mxu1 }
0x1237   : > { %v3289_v13 = vmul.f32 0.35355338, %v3285_v10  ;;  %v5882_v14 = vpop.f32.mrb[27].mxu1  ;;  %v5409_v10 = vld [vmem:[%s6427_s12 + $0x48] sm:$0xff] }
0x1238   : > { %v5410_v14 = vld [vmem:[%s6427_s12 + $0x50] sm:$0xff] }
0x1239   : > { %v3290_v15 = vadd.f32 %v3289_v13, %v6799_v12  ;;  %v6176_v13 = vpack.c.bf16 %v5409_v10, %v5408_v9 }
0x123b   : > { %v3291_v17 = vsel %vm1227_vm2, %v3290_v15, -inf }
0x123c   : > { %3292 = vmax.xlane.f32.xlu0 %v3291_v17 }
0x12c9   : > { %v3293_v18 = vpop.xlane.xlu0 %3292 }
0x12ca   : > { %v3294_v19 = vsub.f32 %v3290_v15, %v3293_v18  ;;  %v5411_v15 = vld [vmem:[%s6427_s12 + $0x58] sm:$0xff] }
0x12cc   : > { %v3295_v20 = vmul.f32 1.442695, %v3294_v19  ;;  %v6179_v19 = vpack.c.bf16 %v5411_v15, %v5410_v14 }
0x12ce   : > { %6288 = vpow2.f32 %v3295_v20 }
0x12d8   : > { %v6289_v21 = vpop.eup %6288 }
0x12d9   : > { %v3297_v22 = vsel %vm1227_vm2, %v6289_v21, 0.0 }
0x12da   : > { %3298 = vadd.xlane.f32.xlu1 %v3297_v22  ;;  %v5420_v22 = vld [vmem:[%s7013_s1 + $0x2] ss:$0 sm:$0xff] }
0x1367   : > { %v3299_v23 = vpop.xlane.xlu1 %3298 }
0x1368   : > { %6290 = vrcp.f32 %v3299_v23 }
0x1372   : > { %v6291_v26 = vpop.eup %6290 }
0x1373   : > { %v3301_v28 = vmul.f32 %v6291_v26, %v6289_v21 }
0x1375   : > { %5886 = vmatmul.mubr.msk.f32.vlgmr.msra.gmra.mrb[28].mxu1 %vm1227_vm2, %v3301_v28 }
0x1376   : > { %6165 = vmatpush3.bf16.msra.mxu1 %v6164_v27  ;;  %5907 = vmatprep.mubr.msk.f32.mxu1 %vm6347_vm0, %v6348_v11 }
0x1377   : > { %6166 = vmatprep.subr.bf16.mxu1 %v6346_v3 }
0x137a   : > { %6168 = vmatpush3.bf16.msra.mxu1 %v6167_v30 }
0x137b   : > { %5921 = vmatprep.subr.mxu1 %v6348_v11 }
0x137d   : > { %5908 = vmatmul.mubr.msk.f32.vlgmr.msra.gmra.mrb[30].mxu1 %vm991_vm1, %v6753_v38 }
0x137e   : > { %5923 = vmatprep.mubr.msk.f32.mxu1 %vm6347_vm0, %v6348_v11 }
0x1448   : > { %v3371_v31 = vpop.f32.mrb[28].mxu1 }
0x1449   : > { %v5887_v32 = vpop.f32.mrb[29].mxu1 }
0x144a   : > { %v5422_v32 = vld [vmem:[%s7011_s23 + $0x40] sm:$0xff] }
0x1450   : > { %v3538_v35 = vpop.f32.mrb[30].mxu1 }
0x1451   : > { %v3539_v37 = vadd.f32 %v5393_v33, %v3538_v35  ;;  %v5909_v39 = vpop.f32.mrb[31].mxu1  ;;  %v5423_v33 = vld [vmem:[%s7011_s23 + $0x48] sm:$0xff]  ;;  %v5424_v35 = vld [vmem:[%s7011_s23 + $0x50] sm:$0xff] }
0x1452   : > { %v6188_v36 = vpack.c.bf16 %v5423_v33, %v5422_v32 }
0x1453   : > { %5922 = vmatpush3.xpose.msk.msra.mxu1 %vm1227_vm2, %v3539_v37  ;;  %v5425_v37 = vld [vmem:[%s7011_s23 + $0x58] sm:$0xff] }
0x1454   : > { %5926 = vmatprep.subr.mxu1 %v6348_v11  ;;  %v6191_v39 = vpack.c.bf16 %v5425_v37, %v5424_v35 }
0x1456   : > { %5924 = vmatmul.mubr.msk.f32.vlgmr.msra.gmra.mrb[32].mxu1 %vm1227_vm2, %v3456_v40 }
0x1457   : > { %5928 = vmatprep.mubr.msk.f32.mxu1 %vm6347_vm0, %v6348_v11  ;;  %5927 = vmatpush3.msra.mxu1 %v3622_v61 }
0x1458   : > { %5936 = vmatprep.subr.mxu1 %v6348_v11 }
0x1529   : > { %v3697_v47 = vpop.f32.mrb[32].mxu1 }
0x152a   : > { %v3701_v48 = vmul.f32 0.35355338, %v3697_v47  ;;  %v5925_v49 = vpop.f32.mrb[33].mxu1 }
0x152c   : > { %v3702_v51 = vadd.f32 %v3701_v48, %v6799_v12 }
0x152e   : > { %v3703_v52 = vsel %vm1227_vm2, %v3702_v51, -inf }
0x152f   : > { %3704 = vmax.xlane.f32.xlu0 %v3703_v52 }
0x15bc   : > { %v3705_v53 = vpop.xlane.xlu0 %3704 }
0x15bd   : > { %v3706_v54 = vsub.f32 %v3702_v51, %v3705_v53  ;;  %v5427_v51 = vld [vmem:[%s7015_s7 + $0x2] ss:$0 sm:$0xff] }
0x15bf   : > { %v3707_v55 = vmul.f32 1.442695, %v3706_v54 }
0x15c1   : > { %6292 = vpow2.f32 %v3707_v55  ;;  %v5432_v55 = vld [vmem:[%s7017_s16 + $0x10] sm:$0xff] }
0x15cb   : > { %v6293_v56 = vpop.eup %6292 }
0x15cc   : > { %v3709_v57 = vsel %vm1227_vm2, %v6293_v56, 0.0 }
0x15cd   : > { %3710 = vadd.xlane.f32.xlu1 %v3709_v57  ;;  %v5434_v57 = vld [vmem:[%s6427_s12 + $0x60] sm:$0xff] }
0x15ce   : > { %v6194_v60 = vpack.c.bf16 %v5435_v58, %v5434_v57 }
0x165a   : > { %v3711_v63 = vpop.xlane.xlu1 %3710 }
0x165b   : > { %6294 = vrcp.f32 %v3711_v63  ;;  %v5437_v63 = vld [vmem:[%s6427_s12 + $0x78] sm:$0xff] }
0x1665   : > { %v6295_v0 = vpop.eup %6294 }
0x1666   : > { %v3713_v1 = vmul.f32 %v6295_v0, %v6293_v56  ;;  %v6197_v0 = vpack.c.bf16 %v5437_v63, %v5436_v62  ;;  %v4950_v63 = vld [vmem:[%s7019_s22 + $0x18] sm:$0xff] }
0x1668   : > { %5929 = vmatmul.mubr.msk.f32.vlgmr.msra.gmra.mrb[34].mxu1 %vm1227_vm2, %v3713_v1  ;;  %v5441_v1 = vld [vmem:[%s6437_s27 + $0x60] sm:$0xff] }
0x1669   : > { %5937 = vmatpush3.msra.mxu1 %v3375_v2  ;;  %5938 = vmatprep.mubr.msk.f32.mxu1 %vm6347_vm0, %v6348_v11  ;;  %v5442_v2 = vld [vmem:[%s6437_s27 + $0x68] sm:$0xff] }
0x166a   : > { %6181 = vmatprep.subr.bf16.mxu1 %v6346_v3  ;;  %v6200_v4 = vpack.c.bf16 %v5442_v2, %v5441_v1  ;;  %v4952_v1 = vld [vmem:[%s7020_s26] sm:$0xff]  ;;  %v4953_v2 = vld [vmem:[%s7020_s26 + $0x8] sm:$0xff] }
0x166c   : > { %5939 = vmatmul.mubr.msk.f32.vlgmr.msra.gmra.mrb[36].mxu1 %vm1227_vm2, %v3371_v31 }
0x166d   : > { %6183 = vmatpush3.bf16.msra.mxu1 %v6182_v6  ;;  %5960 = vmatprep.mubr.msk.f32.mxu1 %vm6347_vm0, %v6348_v11  ;;  %v5444_v6 = vld [vmem:[%s6437_s27 + $0x78] sm:$0xff] }
0x166e   : > { %6184 = vmatprep.subr.bf16.mxu1 %v6346_v3 }
0x1671   : > { %6186 = vmatpush3.bf16.msra.mxu1 %v6185_v8  ;;  %v6203_v8 = vpack.c.bf16 %v5444_v6, %v5443_v5  ;;  %v6218_v5 = vpack.c.bf16 %v4953_v2, %v4952_v1  ;;  %v4955_v6 = vld [vmem:[%s7020_s26 + $0x18] sm:$0xff] }
0x1672   : > { %5974 = vmatprep.subr.mxu1 %v6348_v11 }
0x1674   : > { %5961 = vmatmul.mubr.msk.f32.vlgmr.msra.gmra.mrb[38].mxu1 %vm991_vm1, %v6753_v38 }
0x1675   : > { %5976 = vmatprep.mubr.msk.f32.mxu1 %vm6347_vm0, %v6348_v11 }
0x173b   : > { %v3783_v17 = vpop.f32.mrb[34].mxu1 }
0x173c   : > { %v5930_v18 = vpop.f32.mrb[35].mxu1  ;;  %5934 = vmatmul.mubr.msk.f32.vlgmr.msra.gmra.mrb[32].mxu0 %vm1227_vm2, %v3783_v17  ;;  %v5446_v17 = vld [vmem:[%s7013_s1 + $0x3] ss:$0 sm:$0xff] }
0x173d   : > { %6177 = vmatpush3.bf16.msra.mxu0 %v6176_v13  ;;  %5949 = vmatprep.mubr.msk.f32.mxu0 %vm6347_vm0, %v6348_v11 }
0x173e   : > { %6178 = vmatprep.subr.bf16.mxu0 %v6346_v3 }
0x173f   : > { %v3931_v20 = vpop.f32.mrb[36].mxu1 }
0x1740   : > { %v5940_v21 = vpop.f32.mrb[37].mxu1 }
0x1741   : > { %6180 = vmatpush3.bf16.msra.mxu0 %v6179_v19  ;;  %v5439_v19 = vld [vmem:[%s7014_s2 + $0x3] ss:$0 sm:$0xff] }
0x1742   : > { %6187 = vmatprep.subr.bf16.mxu0 %v6346_v3 }
0x1744   : > { %5950 = vmatmul.mubr.msk.f32.vlgmr.msra.gmra.mrb[34].mxu0 %vm991_vm1, %v6764_v50 }
0x1745   : > { %5971 = vmatprep.mubr.msk.f32.mxu0 %vm6347_vm0, %v6348_v11  ;;  %6189 = vmatpush3.bf16.msra.mxu0 %v6188_v36 }
0x1746   : > { %6190 = vmatprep.subr.bf16.mxu0 %v6346_v3 }
0x1747   : > { %v4097_v23 = vpop.f32.mrb[38].mxu1 }
0x1748   : > { %v4098_v24 = vadd.f32 %v5420_v22, %v4097_v23  ;;  %v5962_v25 = vpop.f32.mrb[39].mxu1  ;;  %v5448_v23 = vld [vmem:[%s7011_s23 + $0x60] sm:$0xff] }
0x1749   : > { %6192 = vmatpush3.bf16.msra.mxu0 %v6191_v39  ;;  %v5450_v25 = vld [vmem:[%s7011_s23 + $0x70] sm:$0xff] }
0x174a   : > { %5975 = vmatpush3.xpose.msk.msra.mxu1 %vm1227_vm2, %v4098_v24  ;;  %5984 = vmatprep.subr.mxu0 %v6348_v11  ;;  %v5449_v24 = vld [vmem:[%s7011_s23 + $0x68] sm:$0xff] }
0x174b   : > { %5979 = vmatprep.subr.mxu1 %v6348_v11 }
0x174c   : > { %5972 = vmatmul.mubr.msk.f32.vlgmr.msra.gmra.mrb[36].mxu0 %vm991_vm1, %v6753_v38 }
0x174d   : > { %5986 = vmatprep.mubr.msk.f32.mxu0 %vm6347_vm0, %v6348_v11  ;;  %5985 = vmatpush3.msra.mxu0 %v5432_v55 }
0x174e   : > { %6199 = vmatprep.subr.bf16.mxu0 %v6346_v3 }
0x180f   : > { %v3858_v26 = vpop.f32.mrb[32].mxu0 }
0x1810   : > { %v6875_v27 = vadd.f32 %v3931_v20, %v3858_v26  ;;  %v5935_v28 = vpop.f32.mrb[33].mxu0  ;;  %v6206_v26 = vpack.c.bf16 %v5449_v24, %v5448_v23  ;;  %v4959_v23 = vld [vmem:[%s7020_s26 + $0x38] sm:$0xff] }
0x1817   : > { %v4014_v29 = vpop.f32.mrb[34].mxu0 }
0x1818   : > { %v4015_v30 = vadd.f32 %v5413_v16, %v4014_v29  ;;  %v5951_v31 = vpop.f32.mrb[35].mxu0 }
0x181a   : > { %5977 = vmatmul.mubr.msk.f32.vlgmr.msra.gmra.mrb[40].mxu1 %vm1227_vm2, %v4015_v30 }
0x181b   : > { %5981 = vmatprep.mubr.msk.f32.mxu1 %vm6347_vm0, %v6348_v11 }
0x181f   : > { %v4180_v52 = vpop.f32.mrb[36].mxu0 }
0x1820   : > { %v4181_v53 = vadd.f32 %v5427_v51, %v4180_v52  ;;  %v5973_v54 = vpop.f32.mrb[37].mxu0 }
0x1822   : > { %5980 = vmatpush3.msra.mxu1 %v4181_v53 }
0x1823   : > { %6193 = vmatprep.subr.bf16.mxu1 %v6346_v3 }
0x18ed   : > { %v4256_v40 = vpop.f32.mrb[40].mxu1 }
0x18ee   : > { %v4260_v41 = vmul.f32 0.35355338, %v4256_v40  ;;  %v5978_v42 = vpop.f32.mrb[41].mxu1  ;;  %v5453_v40 = vld [vmem:[%s7015_s7 + $0x3] ss:$0 sm:$0xff] }
0x18f0   : > { %v4261_v43 = vadd.f32 %v4260_v41, %v6799_v12 }
0x18f2   : > { %v4262_v44 = vsel %vm1227_vm2, %v4261_v43, -inf }
0x18f3   : > { %4263 = vmax.xlane.f32.xlu0 %v4262_v44 }
0x1980   : > { %v4264_v45 = vpop.xlane.xlu0 %4263 }
0x1981   : > { %v4265_v46 = vsub.f32 %v4261_v43, %v4264_v45  ;;  %v5458_v43 = vld [vmem:[%s7017_s16 + $0x18] sm:$0xff] }
0x1983   : > { %v4266_v47 = vmul.f32 1.442695, %v4265_v46 }
0x1985   : > { %6296 = vpow2.f32 %v4266_v47 }
0x198f   : > { %v6297_v48 = vpop.eup %6296 }
0x1990   : > { %v4268_v49 = vsel %vm1227_vm2, %v6297_v48, 0.0 }
0x1991   : > { %4269 = vadd.xlane.f32.xlu1 %v4268_v49  ;;  %v5460_v49 = vld [vmem:[%s7018_s18] ss:$0 sm:$0xff]  ;;  %s976_s18 = scalar_lea.vmem %s6507_s17, %s6533_s0 }
0x1a1e   : > { %v4270_v56 = vpop.xlane.xlu1 %4269 }
0x1a1f   : > { %6298 = vrcp.f32 %v4270_v56 }
0x1a29   : > { %v6299_v59 = vpop.eup %6298 }
0x1a2a   : > { %v4272_v61 = vmul.f32 %v6299_v59, %v6297_v48 }
0x1a2c   : > { %5982 = vmatmul.mubr.msk.f32.vlgmr.msra.gmra.mrb[42].mxu1 %vm1227_vm2, %v4272_v61  ;;  %v4948_v61 = vld [vmem:[%s7019_s22 + $0x8] sm:$0xff] }
0x1a2d   : > { %6195 = vmatpush3.bf16.msra.mxu1 %v6194_v60  ;;  %5997 = vmatprep.mubr.msk.f32.mxu1 %vm6347_vm0, %v6348_v11  ;;  %v4947_v60 = vld [vmem:[%s7019_s22] sm:$0xff] }
0x1a2e   : > { %6196 = vmatprep.subr.bf16.mxu1 %v6346_v3  ;;  %v6212_v62 = vpack.c.bf16 %v4948_v61, %v4947_v60 }
0x1a31   : > { %6198 = vmatpush3.bf16.msra.mxu1 %v6197_v0 }
0x1a32   : > { %6205 = vmatprep.subr.bf16.mxu1 %v6346_v3 }
0x1a34   : > { %5998 = vmatmul.mubr.msk.f32.vlgmr.msra.gmra.mrb[44].mxu1 %vm991_vm1, %v6764_v50 }
0x1a35   : > { %6019 = vmatprep.mubr.msk.f32.mxu1 %vm6347_vm0, %v6348_v11  ;;  %6207 = vmatpush3.bf16.msra.mxu1 %v6206_v26 }
0x1a36   : > { %6208 = vmatprep.subr.bf16.mxu1 %v6346_v3 }
0x1aff   : > { %v4342_v7 = vpop.f32.mrb[42].mxu1 }
0x1b00   : > { %v5983_v34 = vpop.f32.mrb[43].mxu1  ;;  %5987 = vmatmul.mubr.msk.f32.vlgmr.msra.gmra.mrb[38].mxu0 %vm1227_vm2, %v4342_v7 }
0x1b01   : > { %6201 = vmatpush3.bf16.msra.mxu0 %v6200_v4  ;;  %6008 = vmatprep.mubr.msk.f32.mxu0 %vm6347_vm0, %v6348_v11  ;;  %v4954_v4 = vld [vmem:[%s7020_s26 + $0x10] sm:$0xff]  ;;  %v4956_v34 = vld [vmem:[%s7020_s26 + $0x20] sm:$0xff] }
0x1b02   : > { %6202 = vmatprep.subr.bf16.mxu0 %v6346_v3  ;;  %v6221_v7 = vpack.c.bf16 %v4955_v6, %v4954_v4 }
0x1b05   : > { %6204 = vmatpush3.bf16.msra.mxu0 %v6203_v8  ;;  %v4957_v8 = vld [vmem:[%s7020_s26 + $0x28] sm:$0xff] }
0x1b06   : > { %6022 = vmatprep.subr.mxu0 %v6348_v11 }
0x1b07   : > { %v4501_v9 = vpop.f32.mrb[44].mxu1 }
0x1b08   : > { %v5999_v10 = vpop.f32.mrb[45].mxu1  ;;  %6009 = vmatmul.mubr.msk.f32.vlgmr.msra.gmra.mrb[40].mxu0 %vm991_vm1, %v6753_v38  ;;  %v4502_v22 = vadd.f32 %v5439_v19, %v4501_v9  ;;  %v6224_v9 = vpack.c.bf16 %v4957_v8, %v4956_v34  ;;  %v5462_v19 = vld [vmem:[%s7022_s10] ss:$0 sm:$0xff] }
0x1b09   : > { %6024 = vmatprep.mubr.msk.f32.mxu0 %vm6347_vm0, %v6348_v11 }
0x1bd3   : > { %v4417_v13 = vpop.f32.mrb[38].mxu0 }
0x1bd4   : > { %v4421_v14 = vadd.f32 %v4417_v13, %v6875_v27  ;;  %v5988_v15 = vpop.f32.mrb[39].mxu0  ;;  %v5451_v27 = vld [vmem:[%s7011_s23 + $0x78] sm:$0xff] }
0x1bd5   : > { %v6209_v28 = vpack.c.bf16 %v5451_v27, %v5450_v25  ;;  %v5463_v25 = vld [vmem:[%s7023_s11] ss:$0 sm:$0xff] }
0x1bd7   : > { %6210 = vmatpush3.bf16.msra.mxu1 %v6209_v28 }
0x1bd8   : > { %6032 = vmatprep.subr.mxu1 %v6348_v11 }
0x1bda   : > { %6020 = vmatmul.mubr.msk.f32.vlgmr.msra.gmra.mrb[46].mxu1 %vm991_vm1, %v6753_v38 }
0x1bdb   : > { %v4584_v18 = vpop.f32.mrb[40].mxu0  ;;  %6034 = vmatprep.mubr.msk.f32.mxu1 %vm6347_vm0, %v6348_v11  ;;  %6033 = vmatpush3.msra.mxu1 %v5458_v43 }
0x1bdc   : > { %v4585_v20 = vadd.f32 %v5446_v17, %v4584_v18  ;;  %v6010_v21 = vpop.f32.mrb[41].mxu0  ;;  %6217 = vmatprep.subr.bf16.mxu1 %v6346_v3  ;;  %v5461_v17 = vld [vmem:[%s7021_s28] ss:$0 sm:$0xff] }
0x1bde   : > { %6023 = vmatpush3.xpose.msk.msra.mxu0 %vm1227_vm2, %v4585_v20 }
0x1bdf   : > { %6027 = vmatprep.subr.mxu0 %v6348_v11 }
0x1be1   : > { %6025 = vmatmul.mubr.msk.f32.vlgmr.msra.gmra.mrb[42].mxu0 %vm1227_vm2, %v4502_v22  ;;  %v4958_v22 = vld [vmem:[%s7020_s26 + $0x30] sm:$0xff] }
0x1be2   : > { %6029 = vmatprep.mubr.msk.f32.mxu0 %vm6347_vm0, %v6348_v11  ;;  %v6227_v24 = vpack.c.bf16 %v4959_v23, %v4958_v22 }
0x1cad   : > { %v4667_v39 = vpop.f32.mrb[46].mxu1 }
0x1cae   : > { %v6021_v41 = vpop.f32.mrb[47].mxu1  ;;  %v4668_v42 = vadd.f32 %v5453_v40, %v4667_v39 }
0x1cb0   : > { %6028 = vmatpush3.msra.mxu0 %v4668_v42 }
0x1cb1   : > { %6211 = vmatprep.subr.bf16.mxu0 %v6346_v3 }
0x1cb4   : > { %v4743_v16 = vpop.f32.mrb[42].mxu0 }
0x1cb5   : > { %v4747_v29 = vmul.f32 0.35355338, %v4743_v16  ;;  %v6026_v30 = vpop.f32.mrb[43].mxu0  ;;  %v5465_v16 = vld [vmem:[%s6492_s20] ss:$0 sm:$0xff] }
0x1cb7   : > { %v4748_v31 = vadd.f32 %v4747_v29, %v6799_v12 }
0x1cb9   : > { %v4749_v32 = vsel %vm1227_vm2, %v4748_v31, -inf }
0x1cba   : > { %4750 = vmax.xlane.f32.xlu0 %v4749_v32 }
0x1d47   : > { %v4751_v33 = vpop.xlane.xlu0 %4750 }
0x1d48   : > { %v4752_v35 = vsub.f32 %v4748_v31, %v4751_v33 }
0x1d4a   : > { %v4753_v36 = vmul.f32 1.442695, %v4752_v35 }
0x1d4c   : > { %6300 = vpow2.f32 %v4753_v36 }
0x1d56   : > { %v6301_v37 = vpop.eup %6300 }
0x1d57   : > { %v4755_v38 = vsel %vm1227_vm2, %v6301_v37, 0.0 }
0x1d58   : > { %4756 = vadd.xlane.f32.xlu1 %v4755_v38 }
0x1de5   : > { %v4757_v12 = vpop.xlane.xlu1 %4756 }
0x1de6   : > { %6302 = vrcp.f32 %v4757_v12  ;;  %v5467_v12 = vld [vmem:[%s6497_s6] ss:$0 sm:$0xff] }
0x1df0   : > { %v6303_v44 = vpop.eup %6302 }
0x1df1   : > { %v4759_v45 = vmul.f32 %v6303_v44, %v6301_v37 }
0x1df3   : > { %6030 = vmatmul.mubr.msk.f32.vlgmr.msra.gmra.mrb[44].mxu0 %vm1227_vm2, %v4759_v45  ;;  %v5468_v45 = vld [vmem:[%s6502_s4] ss:$0 sm:$0xff] }
0x1df4   : > { %6045 = vmatprep.mubr.msk.f32.mxu0 %vm6347_vm0, %v6348_v11  ;;  %6213 = vmatpush3.bf16.msra.mxu0 %v6212_v62 }
0x1df5   : > { %6214 = vmatprep.subr.bf16.mxu0 %v6346_v3 }
0x1ec6   : > { %v4829_v46 = vpop.f32.mrb[44].mxu0 }
0x1ec7   : > { %v6031_v47 = vpop.f32.mrb[45].mxu0  ;;  %6035 = vmatmul.mubr.msk.f32.vlgmr.msra.gmra.mrb[48].mxu1 %vm1227_vm2, %v4829_v46 }
0x1ec8   : > { %6064 = vmatprep.mubr.msk.f32.mxu1 %vm6347_vm0, %v6348_v11  ;;  %6219 = vmatpush3.bf16.msra.mxu1 %v6218_v5 }
0x1ec9   : > { %6220 = vmatprep.subr.bf16.mxu1 %v6346_v3 }
0x1ecc   : > { %6222 = vmatpush3.bf16.msra.mxu1 %v6221_v7 }
0x1ecd   : > { %6223 = vmatprep.subr.bf16.mxu1 %v6346_v3 }
0x1ed0   : > { %6225 = vmatpush3.bf16.msra.mxu1 %v6224_v9 }
0x1ed1   : > { %6226 = vmatprep.subr.bf16.mxu1 %v6346_v3 }
0x1ed4   : > { %6228 = vmatpush3.bf16.msra.mxu1 %v6227_v24 }
0x1f9a   : > { %v4904_v48 = vpop.f32.mrb[48].mxu1 }
0x1f9b   : > { %v4908_v51 = vadd.f32 %v4904_v48, %v4421_v14  ;;  %v6036_v52 = vpop.f32.mrb[49].mxu1 }
0x1f9d   : > { %v4916_v53 = vadd.f32 %v5460_v49, %v4908_v51 }
0x1f9f   : > { %v4917_v54 = vadd.f32 %v4916_v53, %v6764_v50  ;;  %v4949_v50 = vld [vmem:[%s7019_s22 + $0x10] sm:$0xff] }
0x1fa0   : > { %v6215_v0 = vpack.c.bf16 %v4950_v63, %v4949_v50 }
0x1fa1   : > { %v4920_v55 = vsel %vm991_vm1, %v4917_v54, 0.0 }
0x1fa2   : > { %4921 = vadd.xlane.f32.xlu0 %v4920_v55  ;;  %6216 = vmatpush3.bf16.msra.mxu0 %v6215_v0 }
0x202f   : > { %v4922_v56 = vpop.xlane.xlu0 %4921 }
0x2030   : > { %v4923_v57 = vmul.f32 0.03125, %v4922_v56 }
0x2032   : > { %v4924_v58 = vsub.f32 %v4917_v54, %v4923_v57 }
0x2034   : > { %v4925_v11 = vmul.f32 %v4924_v58, %v4924_v58 }
0x2036   : > { %v4926_v59 = vsel %vm991_vm1, %v4925_v11, 0.0 }
0x2037   : > { %4927 = vadd.xlane.f32.xlu1 %v4926_v59 }
0x20c4   : > { %v4928_v10 = vpop.xlane.xlu1 %4927 }
0x20c5   : > { %v4929_v13 = vmul.f32 0.03125, %v4928_v10 }
0x20c7   : > { %v4930_v14 = vadd.f32 1e-05, %v4929_v13 }
0x20c9   : > { %6304 = vrsqrt.f32 %v4930_v14 }
0x20d3   : > { %v6305_v15 = vpop.eup %6304 }
0x20d4   : > { %v4932_v18 = vmul.f32 %v6305_v15, %v4924_v58 }
0x20d6   : > { %v4939_v20 = vmul.f32 %v5461_v17, %v4932_v18 }
0x20d8   : > { %v4946_v21 = vadd.f32 %v5462_v19, %v4939_v20 }
0x20da   : > { %6046 = vmatmul.mubr.msk.f32.vlgmr.msra.gmra.mrb[46].mxu0 %vm991_vm1, %v4946_v21 }
0x21ad   : > { %v5036_v3 = vpop.f32.mrb[46].mxu0 }
0x21ae   : > { %v5037_v26 = vadd.f32 %v5463_v25, %v5036_v3  ;;  %v6047_v27 = vpop.f32.mrb[47].mxu0 }
0x21b0   : > { %v5040_v28 = vmax.f32 %v5037_v26, 0.0 }
0x21b2   : > { %6065 = vmatmul.mubr.msk.f32.vlgmr.msra.gmra.mrb[50].mxu1 %vm5047_vm3, %v5040_v28 }
0x2285   : > { %v5117_v29 = vpop.f32.mrb[50].mxu1 }
0x2286   : > { %v5118_v30 = vadd.f32 %v5465_v16, %v5117_v29  ;;  %v6066_v31 = vpop.f32.mrb[51].mxu1 }
0x2288   : > { %v5121_v32 = vadd.f32 %v5118_v30, %v4946_v21 }
0x228a   : > { %v5124_v33 = vsel %vm991_vm1, %v5121_v32, 0.0 }
0x228b   : > { %5125 = vadd.xlane.f32.xlu0 %v5124_v33 }
0x2318   : > { %v5126_v35 = vpop.xlane.xlu0 %5125 }
0x2319   : > { %v5127_v36 = vmul.f32 0.03125, %v5126_v35 }
0x231b   : > { %v5128_v37 = vsub.f32 %v5121_v32, %v5127_v36 }
0x231d   : > { %v5129_v38 = vmul.f32 %v5128_v37, %v5128_v37 }
0x231f   : > { %v5130_v39 = vsel %vm991_vm1, %v5129_v38, 0.0 }
0x2320   : > { %5131 = vadd.xlane.f32.xlu1 %v5130_v39 }
0x23ad   : > { %v5132_v40 = vpop.xlane.xlu1 %5131 }
0x23ae   : > { %v5133_v41 = vmul.f32 0.03125, %v5132_v40 }
0x23b0   : > { %v5134_v42 = vadd.f32 1e-05, %v5133_v41 }
0x23b2   : > { %6306 = vrsqrt.f32 %v5134_v42 }
0x23bc   : > { %v6307_v43 = vpop.eup %6306 }
0x23bd   : > { %v5136_v44 = vmul.f32 %v6307_v43, %v5128_v37 }
0x23bf   : > { %v5143_v46 = vmul.f32 %v5467_v12, %v5136_v44 }
0x23c1   : > { %v5150_v47 = vadd.f32 %v5468_v45, %v5143_v46 }
0x23c3   : > { %5151 = vst.msk [vmem:[%s976_s18] sm:$0xff] %vm991_vm1, %v5150_v47 }
0x23c4 PF: > { %s71_s15 = sadd.s32 1, %s6314_s15  }
0x23c5   : > { %p68_p4 = scmp.ge.s32.totalorder %s71_s15, 4  }
0x23c7   :  { %70 = sbr.rel (!%p68_p4) target bundleno = 45 (0x2d), region = 251 }

</bundles_post_ra>
